<compile_context>
chip_gen: v6e
topology: v6e:2x2x1
jax: 0.10.0
libtpu: 0.0.40
codegen_flags: <defaults>
</compile_context>

<pallas_src>
import functools

import jax
import jax.numpy as jnp
from jax import lax
from jax.experimental import pallas as pl
from jax.experimental.pallas import tpu as pltpu

_EPS = 1e-5


def _round_up(v, m):
    return -(-v // m) * m


def fold_bn(gamma, beta, mean, var):
    scale = gamma / jnp.sqrt(var + _EPS)
    bias = beta - mean * scale
    return scale.reshape(1, -1), bias.reshape(1, -1)


# ---------------------------------------------------------------------------
# Fused kernel: conv1x1+bn1+relu -> conv3x3+bn2+relu -> conv1x1+bn3
#               -> + identity -> relu        (one grid step per batch image)
# ---------------------------------------------------------------------------
def _bottleneck_kernel(x_ref, w1_ref, s1_ref, b1_ref,
                       w2_ref, s2_ref, b2_ref,
                       w3_ref, s3_ref, b3_ref,
                       o_ref, o1p_ref, *, M, W, dilation, pad_rows):
    f32 = jnp.float32
    bf16 = jnp.bfloat16
    d = dilation
    width = w1_ref.shape[1]

    # ---- conv1 (1x1) + bn1 + relu -----------------------------------------
    x2d = x_ref[0]                                              # (M, Cin) bf16
    a1 = jnp.dot(x2d, w1_ref[...], preferred_element_type=f32)
    o1 = jnp.maximum(a1 * s1_ref[...] + b1_ref[...], 0.0)       # (M, width) f32

    # Stage o1 in a zero-padded f32 VMEM scratch.  The zero rows above / below
    # the interior implement the 3x3 conv's zero padding in H.  Only the pad
    # rows are zeroed; all stores are sublane aligned (pad_rows % 8 == 0).
    pad_zeros = jnp.zeros((pad_rows, width), f32)
    o1p_ref[pl.ds(0, pad_rows), :] = pad_zeros
    o1p_ref[pl.ds(pad_rows + M, pad_rows), :] = pad_zeros
    o1p_ref[pl.ds(pad_rows, M), :] = o1

    # ---- conv2 (3x3, stride 1, padding = dilation) --------------------------
    # Nine shifted matmuls over the flattened (H*W, width) activation; shifts
    # in the W direction additionally need a per-row validity mask so values
    # do not wrap across image-row boundaries.
    colx = lax.broadcasted_iota(jnp.int32, (M, width), 0) % W   # x coordinate
    mask_r = colx < (W - d)        # rows still valid after a +d shift in x
    mask_l = colx >= d             # rows still valid after a -d shift in x
    zero_bf = jnp.zeros((M, width), bf16)

    acc = None
    for k in range(9):
        oy = (k // 3 - 1) * d
        ox = (k % 3 - 1) * d
        start = pad_rows + oy * W + ox
        slab = o1p_ref[pl.ds(start, M), :].astype(bf16)         # (M, width)
        if ox > 0:
            slab = jnp.where(mask_r, slab, zero_bf)
        elif ox < 0:
            slab = jnp.where(mask_l, slab, zero_bf)
        contrib = jnp.dot(slab, w2_ref[k], preferred_element_type=f32)
        acc = contrib if acc is None else acc + contrib
    o2 = jnp.maximum(acc * s2_ref[...] + b2_ref[...], 0.0)

    # ---- conv3 (1x1) + bn3 + residual + relu --------------------------------
    a3 = jnp.dot(o2.astype(bf16), w3_ref[...], preferred_element_type=f32)
    out = a3 * s3_ref[...] + b3_ref[...] + x2d.astype(f32)
    o_ref[0] = jnp.maximum(out, 0.0).astype(o_ref.dtype)


# ---------------------------------------------------------------------------
# BottleNeck module (inference forward)
# ---------------------------------------------------------------------------
class BottleNeckPallas:
    expansion = 4

    def __init__(self, inplanes, planes, stride=1, groups=1, base_width=64,
                 dilation=1, key=None):
        assert stride == 1 and inplanes == planes * self.expansion, \
            "downsample=None path requires stride=1 and inplanes == planes*4"
        assert groups == 1  # TODO(synk): grouped 3x3 conv not implemented
        width = int(planes * (base_width / 64.0)) * groups
        self.width = width
        self.cout = planes * self.expansion
        self.inplanes = inplanes
        self.stride, self.dilation = stride, dilation

        ks = jax.random.split(key, 12)
        f32 = jnp.float32

        def winit(k, shape, fan_in):
            return (jax.random.normal(k, shape, f32) / jnp.sqrt(fan_in)) * 0.5

        def bninit(k0, k1, k2, c):
            gamma = jax.random.uniform(k0, (c,), f32, 0.5, 1.5)
            beta = jax.random.normal(k1, (c,), f32) * 0.1
            mean = jax.random.normal(k2, (c,), f32) * 0.1
            var = jnp.ones((c,), f32)
            return gamma, beta, mean, var

        # f32 master weights (PyTorch OIHW layout), eval-mode BN folded.
        self.w1_oihw = winit(ks[0], (width, inplanes, 1, 1), inplanes)
        self.s1, self.b1 = fold_bn(*bninit(ks[1], ks[2], ks[3], width))
        self.w2_oihw = winit(ks[4], (width, width, 3, 3), width * 9)
        self.s2, self.b2 = fold_bn(*bninit(ks[5], ks[6], ks[7], width))
        self.w3_oihw = winit(ks[8], (self.cout, width, 1, 1), width)
        self.s3, self.b3 = fold_bn(*bninit(ks[9], ks[10], ks[11], self.cout))

        # bf16 matmul-layout copies used by the Pallas kernel.
        bf16 = jnp.bfloat16
        self.w1_mm = self.w1_oihw[:, :, 0, 0].T.astype(bf16)          # (Cin, width)
        self.w2_mm = jnp.transpose(self.w2_oihw, (2, 3, 1, 0)).reshape(
            9, width, width).astype(bf16)                             # (9, in, out)
        self.w3_mm = self.w3_oihw[:, :, 0, 0].T.astype(bf16)          # (width, Cout)

    def __call__(self, x_nchw):
        N, C, H, W = x_nchw.shape
        assert C == self.inplanes
        M = H * W
        d = self.dilation
        # Padding rows >= max |flat shift| (d*W + d), rounded up to the f32
        # sublane tile (8) so the interior scratch store stays aligned.
        pad_rows = _round_up(d * W + d, 8)

        # NCHW -> flattened channel-last (N, H*W, C).
        # TODO(synk): in a full NHWC network these transposes disappear.
        x_flat = jnp.transpose(x_nchw, (0, 2, 3, 1)).reshape(N, M, C)
        x_bf16 = x_flat.astype(jnp.bfloat16)

        width, cout = self.width, self.cout
        kernel = functools.partial(_bottleneck_kernel, M=M, W=W,
                                   dilation=d, pad_rows=pad_rows)
        const2 = lambda b: (0, 0)

        out = pl.pallas_call(
            kernel,
            out_shape=jax.ShapeDtypeStruct((N, M, cout), jnp.float32),
            grid=(N,),
            in_specs=[
                pl.BlockSpec((1, M, C), lambda b: (b, 0, 0)),          # x
                pl.BlockSpec((C, width), const2),                      # w1
                pl.BlockSpec((1, width), const2),                      # s1
                pl.BlockSpec((1, width), const2),                      # b1
                pl.BlockSpec((9, width, width), lambda b: (0, 0, 0)),  # w2 taps
                pl.BlockSpec((1, width), const2),                      # s2
                pl.BlockSpec((1, width), const2),                      # b2
                pl.BlockSpec((width, cout), const2),                   # w3
                pl.BlockSpec((1, cout), const2),                       # s3
                pl.BlockSpec((1, cout), const2),                       # b3
            ],
            out_specs=pl.BlockSpec((1, M, cout), lambda b: (b, 0, 0)),
            scratch_shapes=[
                pltpu.VMEM((M + 2 * pad_rows, width), jnp.float32)],
            compiler_params=pltpu.CompilerParams(
                dimension_semantics=("parallel",),
                vmem_limit_bytes=32 * 1024 * 1024),
        )(x_bf16, self.w1_mm, self.s1, self.b1,
          self.w2_mm, self.s2, self.b2,
          self.w3_mm, self.s3, self.b3)

        return jnp.transpose(out.reshape(N, H, W, cout), (0, 3, 1, 2))  # NCHW


# ---------------------------------------------------------------------------
# Pure-JAX reference (lax.conv) with the SAME bf16 quantization points, so the
# only differences vs. the kernel are f32 accumulation order (~1e-5 level).
# ---------------------------------------------------------------------------
def reference_forward(blk, x_nchw):
    f32 = jnp.float32
    q = lambda a: a.astype(jnp.bfloat16).astype(f32)
    dn = ("NCHW", "OIHW", "NCHW")

    def bn(y, scale, bias):
        return y * scale.reshape(1, -1, 1, 1) + bias.reshape(1, -1, 1, 1)

    xq = q(x_nchw)
    y = lax.conv_general_dilated(xq, q(blk.w1_oihw), (1, 1), "VALID",
                                 dimension_numbers=dn)
    y = q(jax.nn.relu(bn(y, blk.s1, blk.b1)))
    p = blk.dilation
    y = lax.conv_general_dilated(y, q(blk.w2_oihw), (blk.stride, blk.stride),
                                 [(p, p), (p, p)], rhs_dilation=(p, p),
                                 dimension_numbers=dn)
    y = q(jax.nn.relu(bn(y, blk.s2, blk.b2)))
    y = lax.conv_general_dilated(y, q(blk.w3_oihw), (1, 1), "VALID",
                                 dimension_numbers=dn)
    y = bn(y, blk.s3, blk.b3) + xq
    return jax.nn.relu(y)


if __name__ == "__main__":
    key = jax.random.PRNGKey(0)
    k_x, k_p = jax.random.split(key)

    # identity (no-downsample) path requires inplanes == planes * expansion;
    # Cout = 128 keeps the output stores lane-dense.
    inplanes, planes = 128, 32
    N, H, W = 2, 16, 16
    x = jax.random.normal(k_x, (N, inplanes, H, W), jnp.float32)

    block = BottleNeckPallas(inplanes, planes, stride=1, key=k_p)

    out = jax.block_until_ready(block(x))
    ref = jax.block_until_ready(reference_forward(block, x))

    assert out.shape == (N, planes * BottleNeckPallas.expansion, H, W)
    err = float(jnp.max(jnp.abs(out - ref)))
    assert jnp.allclose(out, ref, atol=1e-2, rtol=1e-2), err
    print("KERNEL_OK")
</pallas_src>

<mosaic_0001>
module attributes {stable_mosaic.version = 11 : i64} {
  func.func @_bottleneck_kernel(%arg0: i32, %arg1: memref<1x256x128xbf16, #tpu.memory_space<vmem>>, %arg2: memref<128x32xbf16, #tpu.memory_space<vmem>>, %arg3: memref<1x32xf32, #tpu.memory_space<vmem>>, %arg4: memref<1x32xf32, #tpu.memory_space<vmem>>, %arg5: memref<9x32x32xbf16, #tpu.memory_space<vmem>>, %arg6: memref<1x32xf32, #tpu.memory_space<vmem>>, %arg7: memref<1x32xf32, #tpu.memory_space<vmem>>, %arg8: memref<32x128xbf16, #tpu.memory_space<vmem>>, %arg9: memref<1x128xf32, #tpu.memory_space<vmem>>, %arg10: memref<1x128xf32, #tpu.memory_space<vmem>>, %arg11: memref<1x256x128xf32, #tpu.memory_space<vmem>>, %arg12: memref<304x32xf32, #tpu.memory_space<vmem>>) attributes {dimension_semantics = [#tpu.dimension_semantics<parallel>], iteration_bounds = array<i64: 2>, scalar_prefetch = 0 : i64, scratch_operands = 1 : i64, tpu.core_type = #tpu.core_type<tc>, window_params = [{transform_indices = @transform_0, window_bounds = array<i64: 1, 256, 128>}, {pipeline_mode = #tpu.pipeline_mode<synchronous>, transform_indices = @transform_1, window_bounds = array<i64: 128, 32>}, {pipeline_mode = #tpu.pipeline_mode<synchronous>, transform_indices = @transform_2, window_bounds = array<i64: 1, 32>}, {pipeline_mode = #tpu.pipeline_mode<synchronous>, transform_indices = @transform_3, window_bounds = array<i64: 1, 32>}, {pipeline_mode = #tpu.pipeline_mode<synchronous>, transform_indices = @transform_4, window_bounds = array<i64: 9, 32, 32>}, {pipeline_mode = #tpu.pipeline_mode<synchronous>, transform_indices = @transform_5, window_bounds = array<i64: 1, 32>}, {pipeline_mode = #tpu.pipeline_mode<synchronous>, transform_indices = @transform_6, window_bounds = array<i64: 1, 32>}, {pipeline_mode = #tpu.pipeline_mode<synchronous>, transform_indices = @transform_7, window_bounds = array<i64: 32, 128>}, {pipeline_mode = #tpu.pipeline_mode<synchronous>, transform_indices = @transform_8, window_bounds = array<i64: 1, 128>}, {pipeline_mode = #tpu.pipeline_mode<synchronous>, transform_indices = @transform_9, window_bounds = array<i64: 1, 128>}, {transform_indices = @transform_10, window_bounds = array<i64: 1, 256, 128>}]} {
    %c0 = arith.constant 0 : index
    %c0_0 = arith.constant 0 : index
    %c0_1 = arith.constant 0 : index
    %0 = vector.load %arg1[%c0, %c0_0, %c0_1] : memref<1x256x128xbf16, #tpu.memory_space<vmem>>, vector<1x256x128xbf16>
    %1 = vector.shape_cast %0 : vector<1x256x128xbf16> to vector<256x128xbf16>
    %c0_2 = arith.constant 0 : index
    %c0_3 = arith.constant 0 : index
    %2 = vector.load %arg2[%c0_2, %c0_3] : memref<128x32xbf16, #tpu.memory_space<vmem>>, vector<128x32xbf16>
    %cst = arith.constant dense<0.000000e+00> : vector<256x32xf32>
    %3 = tpu.matmul %1, %2, %cst {dimension_numbers = #tpu.dot_dimension_numbers<[1], [0], [0], [1], [0, 0, 1, 1], [], []>} : vector<256x128xbf16>, vector<128x32xbf16>, vector<256x32xf32> -> vector<256x32xf32>
    %c0_4 = arith.constant 0 : index
    %c0_5 = arith.constant 0 : index
    %4 = vector.load %arg3[%c0_4, %c0_5] : memref<1x32xf32, #tpu.memory_space<vmem>>, vector<1x32xf32>
    %5 = vector.broadcast %4 : vector<1x32xf32> to vector<256x32xf32>
    %6 = arith.mulf %3, %5 : vector<256x32xf32>
    %c0_6 = arith.constant 0 : index
    %c0_7 = arith.constant 0 : index
    %7 = vector.load %arg4[%c0_6, %c0_7] : memref<1x32xf32, #tpu.memory_space<vmem>>, vector<1x32xf32>
    %8 = vector.broadcast %7 : vector<1x32xf32> to vector<256x32xf32>
    %9 = arith.addf %6, %8 : vector<256x32xf32>
    %cst_8 = arith.constant 0.000000e+00 : f32
    %10 = vector.broadcast %cst_8 : f32 to vector<256x32xf32>
    %11 = arith.maximumf %9, %10 : vector<256x32xf32>
    %cst_9 = arith.constant 0.000000e+00 : f32
    %12 = vector.broadcast %cst_9 : f32 to vector<24x32xf32>
    %c0_10 = arith.constant 0 : index
    %c0_11 = arith.constant 0 : index
    %13 = vector.load %arg12[%c0_10, %c0_11] : memref<304x32xf32, #tpu.memory_space<vmem>>, vector<24x32xf32>
    tpu.vector_store %arg12[%c0_10, %c0_11], %12 {strides = array<i32>} : memref<304x32xf32, #tpu.memory_space<vmem>>, vector<24x32xf32>,
    %c280 = arith.constant 280 : index
    %c0_12 = arith.constant 0 : index
    %14 = vector.load %arg12[%c280, %c0_12] : memref<304x32xf32, #tpu.memory_space<vmem>>, vector<24x32xf32>
    tpu.vector_store %arg12[%c280, %c0_12], %12 {strides = array<i32>} : memref<304x32xf32, #tpu.memory_space<vmem>>, vector<24x32xf32>,
    %c24 = arith.constant 24 : index
    %c0_13 = arith.constant 0 : index
    %15 = vector.load %arg12[%c24, %c0_13] : memref<304x32xf32, #tpu.memory_space<vmem>>, vector<256x32xf32>
    tpu.vector_store %arg12[%c24, %c0_13], %11 {strides = array<i32>} : memref<304x32xf32, #tpu.memory_space<vmem>>, vector<256x32xf32>,
    %16 = tpu.iota {dimensions = array<i32: 0>} : vector<256x32xi32>
    %c16_i32 = arith.constant 16 : i32
    %c0_i32 = arith.constant 0 : i32
    %17 = arith.cmpi eq, %c16_i32, %c0_i32 : i32
    %c1_i32 = arith.constant 1 : i32
    %18 = arith.select %17, %c1_i32, %c16_i32 : i32
    %19 = vector.broadcast %18 : i32 to vector<256x32xi32>
    %20 = arith.remsi %16, %19 : vector<256x32xi32>
    %c0_i32_14 = arith.constant 0 : i32
    %21 = vector.broadcast %c0_i32_14 : i32 to vector<256x32xi32>
    %22 = arith.cmpi ne, %20, %21 : vector<256x32xi32>
    %c0_i32_15 = arith.constant 0 : i32
    %23 = vector.broadcast %c0_i32_15 : i32 to vector<256x32xi32>
    %24 = arith.cmpi slt, %20, %23 : vector<256x32xi32>
    %c0_i32_16 = arith.constant 0 : i32
    %25 = arith.cmpi slt, %18, %c0_i32_16 : i32
    %26 = vector.broadcast %25 : i1 to vector<256x32xi1>
    %27 = vector.broadcast %26 : vector<256x32xi1> to vector<256x32xi1>
    %28 = arith.xori %24, %27 : vector<256x32xi1>
    %29 = arith.andi %28, %22 : vector<256x32xi1>
    %30 = vector.broadcast %18 : i32 to vector<256x32xi32>
    %31 = arith.addi %20, %30 : vector<256x32xi32>
    %32 = arith.select %29, %31, %20 : vector<256x32xi1>, vector<256x32xi32>
    %c15_i32 = arith.constant 15 : i32
    %33 = vector.broadcast %c15_i32 : i32 to vector<256x32xi32>
    %34 = arith.cmpi slt, %32, %33 : vector<256x32xi32>
    %c1_i32_17 = arith.constant 1 : i32
    %35 = vector.broadcast %c1_i32_17 : i32 to vector<256x32xi32>
    %36 = arith.cmpi sge, %32, %35 : vector<256x32xi32>
    %cst_18 = arith.constant 0.000000e+00 : bf16
    %37 = vector.broadcast %cst_18 : bf16 to vector<256x32xbf16>
    %c7 = arith.constant 7 : index
    %c0_19 = arith.constant 0 : index
    %38 = vector.load %arg12[%c7, %c0_19] : memref<304x32xf32, #tpu.memory_space<vmem>>, vector<256x32xf32>
    %39 = arith.truncf %38 : vector<256x32xf32> to vector<256x32xbf16>
    %40 = arith.select %36, %39, %37 : vector<256x32xi1>, vector<256x32xbf16>
    %c0_20 = arith.constant 0 : index
    %c0_21 = arith.constant 0 : index
    %c0_22 = arith.constant 0 : index
    %41 = vector.load %arg5[%c0_20, %c0_21, %c0_22] : memref<9x32x32xbf16, #tpu.memory_space<vmem>>, vector<1x32x32xbf16>
    %42 = vector.shape_cast %41 : vector<1x32x32xbf16> to vector<32x32xbf16>
    %cst_23 = arith.constant dense<0.000000e+00> : vector<256x32xf32>
    %43 = tpu.matmul %40, %42, %cst_23 {dimension_numbers = #tpu.dot_dimension_numbers<[1], [0], [0], [1], [0, 0, 1, 1], [], []>} : vector<256x32xbf16>, vector<32x32xbf16>, vector<256x32xf32> -> vector<256x32xf32>
    %c8 = arith.constant 8 : index
    %c0_24 = arith.constant 0 : index
    %44 = vector.load %arg12[%c8, %c0_24] : memref<304x32xf32, #tpu.memory_space<vmem>>, vector<256x32xf32>
    %45 = arith.truncf %44 : vector<256x32xf32> to vector<256x32xbf16>
    %c1 = arith.constant 1 : index
    %c0_25 = arith.constant 0 : index
    %c0_26 = arith.constant 0 : index
    %46 = vector.load %arg5[%c1, %c0_25, %c0_26] : memref<9x32x32xbf16, #tpu.memory_space<vmem>>, vector<1x32x32xbf16>
    %47 = vector.shape_cast %46 : vector<1x32x32xbf16> to vector<32x32xbf16>
    %cst_27 = arith.constant dense<0.000000e+00> : vector<256x32xf32>
    %48 = tpu.matmul %45, %47, %cst_27 {dimension_numbers = #tpu.dot_dimension_numbers<[1], [0], [0], [1], [0, 0, 1, 1], [], []>} : vector<256x32xbf16>, vector<32x32xbf16>, vector<256x32xf32> -> vector<256x32xf32>
    %49 = arith.addf %43, %48 : vector<256x32xf32>
    %c9 = arith.constant 9 : index
    %c0_28 = arith.constant 0 : index
    %50 = vector.load %arg12[%c9, %c0_28] : memref<304x32xf32, #tpu.memory_space<vmem>>, vector<256x32xf32>
    %51 = arith.truncf %50 : vector<256x32xf32> to vector<256x32xbf16>
    %52 = arith.select %34, %51, %37 : vector<256x32xi1>, vector<256x32xbf16>
    %c2 = arith.constant 2 : index
    %c0_29 = arith.constant 0 : index
    %c0_30 = arith.constant 0 : index
    %53 = vector.load %arg5[%c2, %c0_29, %c0_30] : memref<9x32x32xbf16, #tpu.memory_space<vmem>>, vector<1x32x32xbf16>
    %54 = vector.shape_cast %53 : vector<1x32x32xbf16> to vector<32x32xbf16>
    %cst_31 = arith.constant dense<0.000000e+00> : vector<256x32xf32>
    %55 = tpu.matmul %52, %54, %cst_31 {dimension_numbers = #tpu.dot_dimension_numbers<[1], [0], [0], [1], [0, 0, 1, 1], [], []>} : vector<256x32xbf16>, vector<32x32xbf16>, vector<256x32xf32> -> vector<256x32xf32>
    %56 = arith.addf %49, %55 : vector<256x32xf32>
    %c23 = arith.constant 23 : index
    %c0_32 = arith.constant 0 : index
    %57 = vector.load %arg12[%c23, %c0_32] : memref<304x32xf32, #tpu.memory_space<vmem>>, vector<256x32xf32>
    %58 = arith.truncf %57 : vector<256x32xf32> to vector<256x32xbf16>
    %59 = arith.select %36, %58, %37 : vector<256x32xi1>, vector<256x32xbf16>
    %c3 = arith.constant 3 : index
    %c0_33 = arith.constant 0 : index
    %c0_34 = arith.constant 0 : index
    %60 = vector.load %arg5[%c3, %c0_33, %c0_34] : memref<9x32x32xbf16, #tpu.memory_space<vmem>>, vector<1x32x32xbf16>
    %61 = vector.shape_cast %60 : vector<1x32x32xbf16> to vector<32x32xbf16>
    %cst_35 = arith.constant dense<0.000000e+00> : vector<256x32xf32>
    %62 = tpu.matmul %59, %61, %cst_35 {dimension_numbers = #tpu.dot_dimension_numbers<[1], [0], [0], [1], [0, 0, 1, 1], [], []>} : vector<256x32xbf16>, vector<32x32xbf16>, vector<256x32xf32> -> vector<256x32xf32>
    %63 = arith.addf %56, %62 : vector<256x32xf32>
    %c24_36 = arith.constant 24 : index
    %c0_37 = arith.constant 0 : index
    %64 = vector.load %arg12[%c24_36, %c0_37] : memref<304x32xf32, #tpu.memory_space<vmem>>, vector<256x32xf32>
    %65 = arith.truncf %64 : vector<256x32xf32> to vector<256x32xbf16>
    %c4 = arith.constant 4 : index
    %c0_38 = arith.constant 0 : index
    %c0_39 = arith.constant 0 : index
    %66 = vector.load %arg5[%c4, %c0_38, %c0_39] : memref<9x32x32xbf16, #tpu.memory_space<vmem>>, vector<1x32x32xbf16>
    %67 = vector.shape_cast %66 : vector<1x32x32xbf16> to vector<32x32xbf16>
    %cst_40 = arith.constant dense<0.000000e+00> : vector<256x32xf32>
    %68 = tpu.matmul %65, %67, %cst_40 {dimension_numbers = #tpu.dot_dimension_numbers<[1], [0], [0], [1], [0, 0, 1, 1], [], []>} : vector<256x32xbf16>, vector<32x32xbf16>, vector<256x32xf32> -> vector<256x32xf32>
    %69 = arith.addf %63, %68 : vector<256x32xf32>
    %c25 = arith.constant 25 : index
    %c0_41 = arith.constant 0 : index
    %70 = vector.load %arg12[%c25, %c0_41] : memref<304x32xf32, #tpu.memory_space<vmem>>, vector<256x32xf32>
    %71 = arith.truncf %70 : vector<256x32xf32> to vector<256x32xbf16>
    %72 = arith.select %34, %71, %37 : vector<256x32xi1>, vector<256x32xbf16>
    %c5 = arith.constant 5 : index
    %c0_42 = arith.constant 0 : index
    %c0_43 = arith.constant 0 : index
    %73 = vector.load %arg5[%c5, %c0_42, %c0_43] : memref<9x32x32xbf16, #tpu.memory_space<vmem>>, vector<1x32x32xbf16>
    %74 = vector.shape_cast %73 : vector<1x32x32xbf16> to vector<32x32xbf16>
    %cst_44 = arith.constant dense<0.000000e+00> : vector<256x32xf32>
    %75 = tpu.matmul %72, %74, %cst_44 {dimension_numbers = #tpu.dot_dimension_numbers<[1], [0], [0], [1], [0, 0, 1, 1], [], []>} : vector<256x32xbf16>, vector<32x32xbf16>, vector<256x32xf32> -> vector<256x32xf32>
    %76 = arith.addf %69, %75 : vector<256x32xf32>
    %c39 = arith.constant 39 : index
    %c0_45 = arith.constant 0 : index
    %77 = vector.load %arg12[%c39, %c0_45] : memref<304x32xf32, #tpu.memory_space<vmem>>, vector<256x32xf32>
    %78 = arith.truncf %77 : vector<256x32xf32> to vector<256x32xbf16>
    %79 = arith.select %36, %78, %37 : vector<256x32xi1>, vector<256x32xbf16>
    %c6 = arith.constant 6 : index
    %c0_46 = arith.constant 0 : index
    %c0_47 = arith.constant 0 : index
    %80 = vector.load %arg5[%c6, %c0_46, %c0_47] : memref<9x32x32xbf16, #tpu.memory_space<vmem>>, vector<1x32x32xbf16>
    %81 = vector.shape_cast %80 : vector<1x32x32xbf16> to vector<32x32xbf16>
    %cst_48 = arith.constant dense<0.000000e+00> : vector<256x32xf32>
    %82 = tpu.matmul %79, %81, %cst_48 {dimension_numbers = #tpu.dot_dimension_numbers<[1], [0], [0], [1], [0, 0, 1, 1], [], []>} : vector<256x32xbf16>, vector<32x32xbf16>, vector<256x32xf32> -> vector<256x32xf32>
    %83 = arith.addf %76, %82 : vector<256x32xf32>
    %c40 = arith.constant 40 : index
    %c0_49 = arith.constant 0 : index
    %84 = vector.load %arg12[%c40, %c0_49] : memref<304x32xf32, #tpu.memory_space<vmem>>, vector<256x32xf32>
    %85 = arith.truncf %84 : vector<256x32xf32> to vector<256x32xbf16>
    %c7_50 = arith.constant 7 : index
    %c0_51 = arith.constant 0 : index
    %c0_52 = arith.constant 0 : index
    %86 = vector.load %arg5[%c7_50, %c0_51, %c0_52] : memref<9x32x32xbf16, #tpu.memory_space<vmem>>, vector<1x32x32xbf16>
    %87 = vector.shape_cast %86 : vector<1x32x32xbf16> to vector<32x32xbf16>
    %cst_53 = arith.constant dense<0.000000e+00> : vector<256x32xf32>
    %88 = tpu.matmul %85, %87, %cst_53 {dimension_numbers = #tpu.dot_dimension_numbers<[1], [0], [0], [1], [0, 0, 1, 1], [], []>} : vector<256x32xbf16>, vector<32x32xbf16>, vector<256x32xf32> -> vector<256x32xf32>
    %89 = arith.addf %83, %88 : vector<256x32xf32>
    %c41 = arith.constant 41 : index
    %c0_54 = arith.constant 0 : index
    %90 = vector.load %arg12[%c41, %c0_54] : memref<304x32xf32, #tpu.memory_space<vmem>>, vector<256x32xf32>
    %91 = arith.truncf %90 : vector<256x32xf32> to vector<256x32xbf16>
    %92 = arith.select %34, %91, %37 : vector<256x32xi1>, vector<256x32xbf16>
    %c8_55 = arith.constant 8 : index
    %c0_56 = arith.constant 0 : index
    %c0_57 = arith.constant 0 : index
    %93 = vector.load %arg5[%c8_55, %c0_56, %c0_57] : memref<9x32x32xbf16, #tpu.memory_space<vmem>>, vector<1x32x32xbf16>
    %94 = vector.shape_cast %93 : vector<1x32x32xbf16> to vector<32x32xbf16>
    %cst_58 = arith.constant dense<0.000000e+00> : vector<256x32xf32>
    %95 = tpu.matmul %92, %94, %cst_58 {dimension_numbers = #tpu.dot_dimension_numbers<[1], [0], [0], [1], [0, 0, 1, 1], [], []>} : vector<256x32xbf16>, vector<32x32xbf16>, vector<256x32xf32> -> vector<256x32xf32>
    %96 = arith.addf %89, %95 : vector<256x32xf32>
    %c0_59 = arith.constant 0 : index
    %c0_60 = arith.constant 0 : index
    %97 = vector.load %arg6[%c0_59, %c0_60] : memref<1x32xf32, #tpu.memory_space<vmem>>, vector<1x32xf32>
    %98 = vector.broadcast %97 : vector<1x32xf32> to vector<256x32xf32>
    %99 = arith.mulf %96, %98 : vector<256x32xf32>
    %c0_61 = arith.constant 0 : index
    %c0_62 = arith.constant 0 : index
    %100 = vector.load %arg7[%c0_61, %c0_62] : memref<1x32xf32, #tpu.memory_space<vmem>>, vector<1x32xf32>
    %101 = vector.broadcast %100 : vector<1x32xf32> to vector<256x32xf32>
    %102 = arith.addf %99, %101 : vector<256x32xf32>
    %cst_63 = arith.constant 0.000000e+00 : f32
    %103 = vector.broadcast %cst_63 : f32 to vector<256x32xf32>
    %104 = arith.maximumf %102, %103 : vector<256x32xf32>
    %105 = arith.truncf %104 : vector<256x32xf32> to vector<256x32xbf16>
    %c0_64 = arith.constant 0 : index
    %c0_65 = arith.constant 0 : index
    %106 = vector.load %arg8[%c0_64, %c0_65] : memref<32x128xbf16, #tpu.memory_space<vmem>>, vector<32x128xbf16>
    %cst_66 = arith.constant dense<0.000000e+00> : vector<256x128xf32>
    %107 = tpu.matmul %105, %106, %cst_66 {dimension_numbers = #tpu.dot_dimension_numbers<[1], [0], [0], [1], [0, 0, 1, 1], [], []>} : vector<256x32xbf16>, vector<32x128xbf16>, vector<256x128xf32> -> vector<256x128xf32>
    %c0_67 = arith.constant 0 : index
    %c0_68 = arith.constant 0 : index
    %108 = vector.load %arg9[%c0_67, %c0_68] : memref<1x128xf32, #tpu.memory_space<vmem>>, vector<1x128xf32>
    %109 = vector.broadcast %108 : vector<1x128xf32> to vector<256x128xf32>
    %110 = arith.mulf %107, %109 : vector<256x128xf32>
    %c0_69 = arith.constant 0 : index
    %c0_70 = arith.constant 0 : index
    %111 = vector.load %arg10[%c0_69, %c0_70] : memref<1x128xf32, #tpu.memory_space<vmem>>, vector<1x128xf32>
    %112 = vector.broadcast %111 : vector<1x128xf32> to vector<256x128xf32>
    %113 = arith.addf %110, %112 : vector<256x128xf32>
    %114 = arith.extf %1 : vector<256x128xbf16> to vector<256x128xf32>
    %115 = arith.addf %113, %114 : vector<256x128xf32>
    %cst_71 = arith.constant 0.000000e+00 : f32
    %116 = vector.broadcast %cst_71 : f32 to vector<256x128xf32>
    %117 = arith.maximumf %115, %116 : vector<256x128xf32>
    %c0_72 = arith.constant 0 : index
    %c0_73 = arith.constant 0 : index
    %c0_74 = arith.constant 0 : index
    %118 = vector.load %arg11[%c0_72, %c0_73, %c0_74] : memref<1x256x128xf32, #tpu.memory_space<vmem>>, vector<1x256x128xf32>
    %119 = vector.shape_cast %118 : vector<1x256x128xf32> to vector<256x128xf32>
    %120 = vector.shape_cast %117 : vector<256x128xf32> to vector<1x256x128xf32>
    tpu.vector_store %arg11[%c0_72, %c0_73, %c0_74], %120 {strides = array<i32>} : memref<1x256x128xf32, #tpu.memory_space<vmem>>, vector<1x256x128xf32>,
    return
  }
  func.func @transform_0(%arg0: i32) -> (i32, i32, i32) {
    %c0_i32 = arith.constant 0 : i32
    %c0_i32_0 = arith.constant 0 : i32
    %c0_i32_1 = arith.constant 0 : i32
    return %arg0, %c0_i32, %c0_i32_0 : i32, i32, i32
  }
  func.func @transform_1(%arg0: i32) -> (i32, i32) {
    %c0_i32 = arith.constant 0 : i32
    %c0_i32_0 = arith.constant 0 : i32
    %c0_i32_1 = arith.constant 0 : i32
    return %c0_i32, %c0_i32_0 : i32, i32
  }
  func.func @transform_2(%arg0: i32) -> (i32, i32) {
    %c0_i32 = arith.constant 0 : i32
    %c0_i32_0 = arith.constant 0 : i32
    %c0_i32_1 = arith.constant 0 : i32
    return %c0_i32, %c0_i32_0 : i32, i32
  }
  func.func @transform_3(%arg0: i32) -> (i32, i32) {
    %c0_i32 = arith.constant 0 : i32
    %c0_i32_0 = arith.constant 0 : i32
    %c0_i32_1 = arith.constant 0 : i32
    return %c0_i32, %c0_i32_0 : i32, i32
  }
  func.func @transform_4(%arg0: i32) -> (i32, i32, i32) {
    %c0_i32 = arith.constant 0 : i32
    %c0_i32_0 = arith.constant 0 : i32
    %c0_i32_1 = arith.constant 0 : i32
    %c0_i32_2 = arith.constant 0 : i32
    return %c0_i32, %c0_i32_0, %c0_i32_1 : i32, i32, i32
  }
  func.func @transform_5(%arg0: i32) -> (i32, i32) {
    %c0_i32 = arith.constant 0 : i32
    %c0_i32_0 = arith.constant 0 : i32
    %c0_i32_1 = arith.constant 0 : i32
    return %c0_i32, %c0_i32_0 : i32, i32
  }
  func.func @transform_6(%arg0: i32) -> (i32, i32) {
    %c0_i32 = arith.constant 0 : i32
    %c0_i32_0 = arith.constant 0 : i32
    %c0_i32_1 = arith.constant 0 : i32
    return %c0_i32, %c0_i32_0 : i32, i32
  }
  func.func @transform_7(%arg0: i32) -> (i32, i32) {
    %c0_i32 = arith.constant 0 : i32
    %c0_i32_0 = arith.constant 0 : i32
    %c0_i32_1 = arith.constant 0 : i32
    return %c0_i32, %c0_i32_0 : i32, i32
  }
  func.func @transform_8(%arg0: i32) -> (i32, i32) {
    %c0_i32 = arith.constant 0 : i32
    %c0_i32_0 = arith.constant 0 : i32
    %c0_i32_1 = arith.constant 0 : i32
    return %c0_i32, %c0_i32_0 : i32, i32
  }
  func.func @transform_9(%arg0: i32) -> (i32, i32) {
    %c0_i32 = arith.constant 0 : i32
    %c0_i32_0 = arith.constant 0 : i32
    %c0_i32_1 = arith.constant 0 : i32
    return %c0_i32, %c0_i32_0 : i32, i32
  }
  func.func @transform_10(%arg0: i32) -> (i32, i32, i32) {
    %c0_i32 = arith.constant 0 : i32
    %c0_i32_0 = arith.constant 0 : i32
    %c0_i32_1 = arith.constant 0 : i32
    return %arg0, %c0_i32, %c0_i32_0 : i32, i32, i32
  }
}

</mosaic_0001>

<bundles_post_ra>
// kernel: tpu_custom_call.1
= control target key start
LH: loop header
LB: loop body
LE: loop exit
PB: predicated region body
PF: predicated region fallthrough
CT: control target
= control target key end

     0   :  { %s8727_s0 = inlined_call_operand.hbm [shape: bf16[2,256,128], index: 0, kind: input, shape index: {}]   ;;  %s8728_s1 = inlined_call_operand.vmem [shape: bf16[128,32], index: 1, kind: input, shape index: {}]   ;;  %s8729_s2 = inlined_call_operand.vmem [shape: f32[1,32], index: 2, kind: input, shape index: {}]   ;;  %s8730_s3 = inlined_call_operand.vmem [shape: f32[1,32], index: 3, kind: input, shape index: {}]   ;;  %s8731_s4 = inlined_call_operand.hbm [shape: bf16[9,32,32], index: 4, kind: input, shape index: {}]   ;;  %s8732_s5 = inlined_call_operand.vmem [shape: f32[1,32], index: 5, kind: input, shape index: {}]   ;;  %s8733_s6 = inlined_call_operand.vmem [shape: f32[1,32], index: 6, kind: input, shape index: {}]   ;;  %s8734_s7 = inlined_call_operand.vmem [shape: bf16[32,128], index: 7, kind: input, shape index: {}]   ;;  %s8735_s8 = inlined_call_operand.vmem [shape: f32[1,128], index: 8, kind: input, shape index: {}]   ;;  %s8736_s9 = inlined_call_operand.vmem [shape: f32[1,128], index: 9, kind: input, shape index: {}]   ;;  %s8737_s10 = inlined_call_operand.hbm [shape: f32[2,256,128], index: 10, kind: output, shape index: {}]  }
   0x1   :  { %8822 = sst [smem:[#allocation30_spill]] %s8731_s4 }
   0x2   :  { %15 = vsyncpa [#allocation4], 0 }
   0x3   :  { %17 = vsyncpa [#allocation4 + $0x1], 0 }
   0x4   :  { %18 = vsyncpa [#allocation7], 0 }
   0x5   :  { %19 = vsyncpa [#allocation5], 0 }
   0x6   :  { %21 = vsyncpa [#allocation5 + $0x1], 0  ;;  %s6279_s13 = smov 0   ;;  %s6281_s14 = smov 0  }
   0x7   :  { %s6283_s15 = smov 0   ;;  %s6285_s16 = smov 0  }
   0x8 LB: > { %8823 = sst [smem:[#allocation12_spill]] %s6200_s13  ;;  %s6300_s17 = sadd.s32 4294967295, %s6212_s16   ;;  %s6212_s16 = sphi %s6285_s16, %s9236_s16   ;;  %s6208_s15 = sphi %s6283_s15, %s9239_s15   ;;  %s6204_s14 = sphi %s6281_s14, %s9238_s14   ;;  %s6200_s13 = sphi %s6279_s13, %s9237_s13  }
   0x9   : > { %s5074_s18 = sadd.s32 4294967294, %s6212_s16   ;;  %p47_p0 = scmp.ne.s32.totalorder %s6204_s14, %s6200_s13 }
   0xa   : > { %p8743_p1 = scmp.eq.s32.totalorder %s6300_s17, 0  ;;  %p266_p3 = scmp.eq.s32.totalorder %s5074_s18, 1 }
   0xb   : > { %p5075_p5 = scmp.ge.s32.totalorder %s6212_s16, 1  ;;  %p273_p7 = scmp.lt.s32.totalorder %s6212_s16, 3 }
   0xc   : > { %p6309_p4 = por %p8743_p1, %p47_p0  ;;  %p6314_p6 = por %p266_p3, %p47_p0 }
   0xd   : > { %p6319_p8 = pnand %p5075_p5, %p273_p7  ;;  %s6214_s22 = smov [#allocation6]  }
   0xe   : > { %s8824_s19 = scalar_select %p6309_p4, 1, 0 }
   0xf   : > { %s8825_s20 = scalar_select %p6314_p6, 1, 0 }
  0x10   : > { %s8827_s21 = scalar_select %p6319_p8, 1, 0 }
  0x11   : > { %8826 = sst [smem:[#allocation13_spill]] %s8825_s20  ;;  %s294_s23 = sshll.u32 %s6214_s22, 4  ;;  %s295_s23 = int_to_ptr.vmem [resolvable:$true] %s294_s23 }
  0x12   : > { %p5958_p9 = pneg %p6319_p8  ;;  %s6333_s25 = sadd.s32 1, %s6212_s16  }
  0x13   : > { %8829 = sst [smem:[#allocation14_spill]] %s6333_s25  ;;  %s34_s26 = sadd.s32 1, %s6208_s15 }
  0x14   : > { %p6328_p11 = pnand %p5958_p9, %p8743_p1  ;;  %s31_s27 = ssub.s32 %s6212_s16, %s6333_s25 }
  0x15   : > { %s6101_s28 = scalar_lea.vmem %s295_s23, 2304  ;;  %p6109_p5 = scmp.lt.s32.totalorder %s295_s23, %s295_s23 }
  0x16   : > { %p6092_p12 = pneg %p6328_p11  ;;  %p6102_p13 = scmp.ne.s32.totalorder %s295_s23, %s6101_s28 }
  0x17   : > { %p6110_p7 = scmp.lt.s32.totalorder %s6101_s28, %s6101_s28 }
  0x18   : > { %p6104_p0 = pnand %p6102_p13, %p6092_p12 }
  0x19   : > { %p6111_p10 = por %p6110_p7, %p6109_p5 }
  0x1a   : > { %p6105_p3 = pneg %p6104_p0 }
  0x1c   : > { %p6112_p2 = pnand %p6111_p10, %p6105_p3 }
  0x1e   : > { %6115 = shalt.err (!%p6112_p2)
}
  0x1f   : > { %s8742_s29 = smov 64   ;;  %s8744_s30 = smov 4  }
  0x20   : > { %s8830_s4 = sld [smem:[#allocation30_spill]]  ;;  %p32_p2 = scmp.eq.s32.totalorder %s31_s27, 0 }
  0x21   : > { %p41_p9 = scmp.ne.s32.totalorder %s6208_s15, %s6204_s14  ;;  %p42_p10 = scmp.eq.s32.totalorder %s6212_s16, 0 }
  0x22   : > { %p5971_p12 = scmp.lt.s32.totalorder %s6212_s16, 2  ;;  %p8831_p0 = scmp.eq.s32.totalorder %s6300_s17, 1 }
  0x23   : > { %s6353_s18 = scalar_select %p32_p2, %s6208_s15, %s34_s26  }
  0x24   : > { %p43_p13 = por %p42_p10, %p41_p9  ;;  %p6357_p3 = por %p8831_p0, %p41_p9 }
  0x25   : > { %s323_s24 = sand.u32 1, %s6208_s15   ;;  %s5332_s28 = sshll.u32 %s6212_s16, 11 }
  0x26   : > { %5961 = dma.hbm_to_vmem [thread:$0]  (!%p6328_p11), %s8830_s4, 2304, %s295_s23, [#allocation7], %s8742_s29, %s8742_s29, %s8744_s30  }
  0x27   : > { %s8832_s22 = scalar_select %p6357_p3, 1, 0 }
  0x28   : > { %s5078_s25 = sshll.u32 %s323_s24, 7  ;;  %s6366_s11 = scalar_lea.hbm %s8727_s0, %s5332_s28 }
  0x29   : > { %s327_s23 = scalar_lea.vmem [#allocation3], %s5078_s25  ;;  %p6368_p11 = pnand %p5971_p12, %p43_p13 }
  0x2a   : > { %s334_s26 = sshll.u32 %s327_s23, 4  ;;  %s6374_s12 = scalar_lea.sflag [#allocation4], %s323_s24  ;;  %s6372_s26 = int_to_ptr.vmem [resolvable:$true] %s334_s26 }
  0x2b   : > { %s6116_s29 = scalar_lea.hbm %s6366_s11, 2048  ;;  %p6118_p7 = pneg %p6368_p11 }
  0x2c   : > { %p6117_p5 = scmp.ne.s32.totalorder %s6366_s11, %s6116_s29  ;;  %s6121_s25 = scalar_lea.hbm %s8727_s0, 4096 }
  0x2d   : > { %p6122_p10 = scmp.lt.s32.totalorder %s6366_s11, %s8727_s0  ;;  %p6123_p12 = scmp.lt.s32.totalorder %s6121_s25, %s6116_s29 }
  0x2e   : > { %p6119_p2 = pnand %p6118_p7, %p6117_p5 }
  0x2f   : > { %p6124_p13 = por %p6123_p12, %p6122_p10 }
  0x30   : > { %p6120_p9 = pneg %p6119_p2 }
  0x32   : > { %p6125_p0 = pnand %p6124_p13, %p6120_p9 }
  0x34   : > { %6128 = shalt.err (!%p6125_p0)
}
  0x35   : > { %s6129_s24 = scalar_lea.vmem %s6372_s26, 2048  ;;  %s6217_s30 = smov [#allocation3]  }
  0x36   : > { %p6130_p1 = scmp.ne.s32.totalorder %s6372_s26, %s6129_s24  ;;  %s6134_s4 = sshll.u32 %s6217_s30, 4  ;;  %s6135_s4 = int_to_ptr.vmem [resolvable:$false] %s6134_s4 }
  0x37   : > { %s6136_s13 = scalar_lea.vmem %s6135_s4, 4096  ;;  %p6137_p2 = scmp.lt.s32.totalorder %s6372_s26, %s6135_s4 }
  0x38   : > { %p6132_p6 = pnand %p6130_p1, %p6118_p7  ;;  %p6138_p3 = scmp.lt.s32.totalorder %s6136_s13, %s6129_s24 }
  0x3a   : > { %p6133_p5 = pneg %p6132_p6  ;;  %p6139_p4 = por %p6138_p3, %p6137_p2 }
  0x3c   : > { %p6140_p8 = pnand %p6139_p4, %p6133_p5 }
  0x3e   : > { %6143 = shalt.err (!%p6140_p8)
}
  0x3f   : > { %s8834_s29 = smov 4   ;;  %s8835_s20 = smov 64  }
  0x40   : > { %5965 = dma.hbm_to_vmem [thread:$0]  (!%p6368_p11), %s6366_s11, 2048, %s6372_s26, %s6374_s12, %s8835_s20, %s8835_s20, %s8834_s29  }
  0x41   : > { %p8836_p1 = scmp.ne.s32.totalorder %s8827_s21, 0 }
  0x43   : > { %346 = sbr.rel (%p8836_p1) target bundleno = 1078 (0x436), region = 60 }
  0x48   : > { %s6401_s30 = sand.u32 1, %s6204_s14   ;;  %p8837_p4 = scmp.ne.s32.totalorder %s8824_s19, 0 }
  0x49   : > { %s5082_s4 = sshll.u32 %s6401_s30, 7  ;;  %s349_s25 = scalar_lea.sflag [#allocation4], %s6401_s30 }
  0x4a   : > { %s6405_s28 = scalar_lea.vmem [#allocation3], %s5082_s4 }
  0x4b   : > { %6187 = dma.done.wait (%p8837_p4), %s349_s25, 2048  }
  0x4c   : > { %6189 = vsyncadd (%p8837_p4), %s349_s25, 4294965248  ;;  %p8838_p6 = scmp.eq.s32.totalorder %s6300_s17, 0 }
  0x4e   : > { %6191 = dma.done.wait (%p8838_p6), [#allocation7], 2304   ;;  %p8839_p8 = pmov %p8838_p6 }
  0x4f   : > { %v6014_v0 = vld [vmem:[%s8728_s1 + $0x38] sm:$0xff]   ;;  %v6015_v1 = vld [vmem:[%s8728_s1 + $0x30] sm:$0xff]   ;;  %v6016_v2 = vld [vmem:[%s8728_s1 + $0x28] sm:$0xff]   ;;  %vm8762_vm0 = vcmask 261120   ;;  %v6218_v24 = vmov 0.0   ;;  %v898_v29 = vlaneseq  ;;  %vm6219_vm1 = vmmov 1  }
  0x50   : > { %6193 = vsyncadd (%p8839_p8), [#allocation7], 4294964992  ;;  %5538 = vmatprep.subr.bf16.mxu0 %v6014_v0  ;;  %v6017_v3 = vld [vmem:[%s8728_s1 + $0x20] sm:$0xff]   ;;  %v396_v4 = vld [vmem:[%s6405_s28] sm:$0xff]   ;;  %861 = vst.msk [vmem:[#allocation2 + $0x8] sm:$0xff] %vm8762_vm0, %v6218_v24  ;;  %v8748_v36 = vmov 0  }
  0x51   : > { %5539 = vmatpush3.bf16.msra.mxu0 %v6014_v0  ;;  %5554 = vmatprep.mubr.bf16.mxu0 %v396_v4  ;;  %v6018_v5 = vld [vmem:[%s8728_s1 + $0x18] sm:$0xff]   ;;  %v6019_v6 = vld [vmem:[%s8728_s1 + $0x10] sm:$0xff]   ;;  %v6020_v7 = vld [vmem:[%s8728_s1 + $0x8] sm:$0xff]   ;;  %862 = vst.msk [vmem:[#allocation2 + $0x10] sm:$0xff] %vm8762_vm0, %v6218_v24  ;;  %v6462_v31 = vshrl.u32 %v898_v29, 7  ;;  %s5084_s23 = sshll.u32 %s6401_s30, 8 }
  0x52   : > { %5540 = vmatprep.subr.bf16.mxu0 %v6015_v1  ;;  %v6021_v8 = vld [vmem:[%s8728_s1] sm:$0xff]   ;;  %v398_v9 = vld [vmem:[%s6405_s28 + $0x8] sm:$0xff]   ;;  %v402_v11 = vld [vmem:[%s6405_s28 + $0x18] sm:$0xff]   ;;  %860 = vst.msk [vmem:[#allocation2] sm:$0xff] %vm8762_vm0, %v6218_v24  ;;  %s8572_s24 = scalar_lea.vmem [#allocation8], %s5084_s23  ;;  %s4978_s25 = scalar_lea.sflag [#allocation5], %s6401_s30 }
  0x53   : > { %v400_v10 = vld [vmem:[%s6405_s28 + $0x10] sm:$0xff]   ;;  %v404_v12 = vld [vmem:[%s6405_s28 + $0x20] sm:$0xff]   ;;  %v406_v13 = vld [vmem:[%s6405_s28 + $0x28] sm:$0xff]   ;;  %863 = vst.msk [vmem:[#allocation2 + $0x118] sm:$0xff] %vm8762_vm0, %v6218_v24  ;;  %v907_v32 = vadd.s32 64, %v6462_v31  ;;  %v909_v35 = vadd.s32 80, %v6462_v31 }
  0x54   : > { %v408_v14 = vld [vmem:[%s6405_s28 + $0x30] sm:$0xff]   ;;  %v410_v15 = vld [vmem:[%s6405_s28 + $0x38] sm:$0xff]   ;;  %v412_v16 = vld [vmem:[%s6405_s28 + $0x40] sm:$0xff]   ;;  %864 = vst.msk [vmem:[#allocation2 + $0x120] sm:$0xff] %vm8762_vm0, %v6218_v24  ;;  %v911_v39 = vadd.s32 96, %v6462_v31  ;;  %v913_v47 = vadd.s32 112, %v6462_v31 }
  0x55   : > { %5541 = vmatpush3.bf16.msra.mxu0 %v6015_v1  ;;  %v414_v17 = vld [vmem:[%s6405_s28 + $0x48] sm:$0xff]   ;;  %v416_v18 = vld [vmem:[%s6405_s28 + $0x50] sm:$0xff]   ;;  %v418_v19 = vld [vmem:[%s6405_s28 + $0x58] sm:$0xff]   ;;  %865 = vst.msk [vmem:[#allocation2 + $0x128] sm:$0xff] %vm8762_vm0, %v6218_v24  ;;  %v991_v33 = vand.u32 15, %v907_v32  ;;  %v1005_v41 = vand.u32 15, %v909_v35 }
  0x56   : > { %5542 = vmatprep.subr.bf16.mxu0 %v6016_v2  ;;  %v420_v20 = vld [vmem:[%s6405_s28 + $0x60] sm:$0xff]   ;;  %v422_v21 = vld [vmem:[%s6405_s28 + $0x68] sm:$0xff]   ;;  %v424_v22 = vld [vmem:[%s6405_s28 + $0x70] sm:$0xff]   ;;  %v1019_v42 = vand.u32 15, %v911_v39  ;;  %v915_v48 = vadd.s32 128, %v6462_v31  ;;  %v1033_v49 = vand.u32 15, %v913_v47 }
  0x57   : > { %v426_v23 = vld [vmem:[%s6405_s28 + $0x78] sm:$0xff]   ;;  %v6039_v26 = vld [vmem:[#allocation6 + $0x10] sm:$0xff]   ;;  %vm1428_vm2 = vmpackc.low %vm6219_vm1, %vm6219_vm1  ;;  %vm1355_vm3 = vcmp.ge.s32.totalorder %v991_v33, 1  ;;  %vm1357_vm5 = vcmp.ge.s32.totalorder %v1005_v41, 1  ;;  %v917_v56 = vadd.s32 144, %v6462_v31  ;;  %v919_v57 = vadd.s32 160, %v6462_v31 }
  0x58   : > { %v6038_v25 = vld [vmem:[#allocation6 + $0x18] sm:$0xff]   ;;  %v1576_v28 = vld [vmem:[#allocation2 + $0x10] sm:$0xff]  ;;  %v6465_v34 = vld [vmem:[#allocation6 + $0x28] sm:$0xff]   ;;  %v6470_v37 = vsel %vm1428_vm2, 65537, %v8748_v36  ;;  %vm1359_vm6 = vcmp.ge.s32.totalorder %v1019_v42, 1  ;;  %v1047_v50 = vand.u32 15, %v915_v48 }
  0x59   : > { %5543 = vmatpush3.bf16.msra.mxu0 %v6016_v2  ;;  %5946 = vmatprep.subr.bf16.mxu1 %v6038_v25  ;;  %v1575_v27 = vld [vmem:[#allocation2 + $0x8] sm:$0xff]  ;;  %vm1435_vm4 = vmpackc.low %vm1355_vm3, %vm1355_vm3  ;;  %vm1361_vm9 = vcmp.ge.s32.totalorder %v1033_v49, 1  ;;  %v6490_v51 = vld [vmem:[#allocation6 + $0x8] sm:$0xff]   ;;  %v1061_v58 = vand.u32 15, %v917_v56  ;;  %v1075_v59 = vand.u32 15, %v919_v57  ;;  %v921_v0 = vadd.s32 176, %v6462_v31 }
  0x5a   : > { %5544 = vmatprep.subr.bf16.mxu0 %v6017_v3  ;;  %5948 = vmatpush3.bf16.msra.mxu1 %v6038_v25  ;;  %v1607_v30 = vpack.c.bf16 %v1576_v28, %v1575_v27  ;;  %v6473_v38 = vsel %vm1435_vm4, 65537, %v8748_v36  ;;  %vm1437_vm7 = vmpackc.low %vm1357_vm5, %vm1357_vm5  ;;  %vm1363_vm10 = vcmp.ge.s32.totalorder %v1047_v50, 1  ;;  %v923_v1 = vadd.s32 192, %v6462_v31  ;;  %v6555_v24 = vld [vmem:[%s8730_s3] ss:$0 sm:$0xff]  ;;  %v6846_v63 = vld [vmem:[#allocation6] sm:$0xff]  }
  0x5b   : > { %5947 = vmatprep.subr.bf16.mxu1 %v6039_v26  ;;  %v5115_v40 = vcombine.low %v6473_v38, %v6470_v37  ;;  %v6479_v43 = vsel %vm1437_vm7, 65537, %v8748_v36  ;;  %vm1439_vm8 = vmpackc.low %vm1359_vm6, %vm1359_vm6  ;;  %vm1365_vm13 = vcmp.ge.s32.totalorder %v1061_v58, 1  ;;  %vm1367_vm14 = vcmp.ge.s32.totalorder %v1075_v59, 1  ;;  %s4991_s13 = sshll.u32 %s8572_s24, 4  ;;  %p9231_p11 = scmp.ne.s32.totalorder %s8832_s22, 0  ;;  %s8682_s13 = int_to_ptr.vmem [resolvable:$true] %s4991_s13 }
  0x5c   : > { %v5116_v44 = vcombine.low %v6479_v43, %v6470_v37  ;;  %v6484_v45 = vsel %vm1439_vm8, 65537, %v8748_v36  ;;  %vm1441_vm11 = vmpackc.low %vm1361_vm9, %vm1361_vm9  ;;  %v1089_v2 = vand.u32 15, %v921_v0  ;;  %v903_v29 = vadd.s32 32, %v6462_v31  ;;  %s6144_s21 = scalar_lea.vmem %s8682_s13, 4096 }
  0x5d   : > { %5545 = vmatpush3.bf16.msra.mxu0 %v6017_v3  ;;  %v6493_v52 = vsel %vm1441_vm11, 65537, %v8748_v36  ;;  %vm1443_vm12 = vmpackc.low %vm1363_vm10, %vm1363_vm10  ;;  %v1103_v3 = vand.u32 15, %v923_v1  ;;  %v904_v39 = vadd.s32 40, %v6462_v31  ;;  %v905_v57 = vadd.s32 48, %v6462_v31  ;;  %p6145_p3 = scmp.ne.s32.totalorder %s8682_s13, %s6144_s21 }
  0x5e   : > { %5546 = vmatprep.subr.bf16.mxu0 %v6018_v5  ;;  %5949 = vmatpush3.bf16.msra.mxu1 %v6039_v26  ;;  %v5118_v53 = vcombine.low %v6493_v52, %v6470_v37  ;;  %v6498_v54 = vsel %vm1443_vm12, 65537, %v8748_v36  ;;  %vm1445_vm15 = vmpackc.low %vm1365_vm13, %vm1365_vm13  ;;  %vm1369_vm2 = vcmp.ge.s32.totalorder %v1089_v2, 1  ;;  %v963_v56 = vand.u32 15, %v903_v29 }
  0x5f   : > { %5622 = vmatprep.subr.bf16.mxu1 %v6490_v51  ;;  %v6506_v60 = vsel %vm1445_vm15, 65537, %v8748_v36  ;;  %vm1447_vm1 = vmpackc.low %vm1367_vm14, %vm1367_vm14  ;;  %vm1371_vm3 = vcmp.ge.s32.totalorder %v1103_v3, 1  ;;  %v970_v3 = vand.u32 15, %v904_v39  ;;  %p6146_p7 = pnand %p6145_p3, %p9231_p11 }
  0x60   : > { %v6511_v62 = vsel %vm1447_vm1, 65537, %v8748_v36  ;;  %vm1449_vm4 = vmpackc.low %vm1369_vm2, %vm1369_vm2  ;;  %vm6590_vm2 = vcmp.ge.s32.totalorder %v963_v56, 1 }
  0x61   : > { %5547 = vmatpush3.bf16.msra.mxu0 %v6018_v5  ;;  %v6518_v4 = vsel %vm1449_vm4, 65537, %v8748_v36  ;;  %vm1451_vm5 = vmpackc.low %vm1371_vm3, %vm1371_vm3  ;;  %vm6601_vm4 = vcmp.lt.s32.totalorder %v970_v3, 15  ;;  %p6147_p9 = pneg %p6146_p7 }
  0x62   : > { %5548 = vmatprep.subr.bf16.mxu0 %v6019_v6 }
  0x65   : > { %5549 = vmatpush3.bf16.msra.mxu0 %v6019_v6  ;;  %v6523_v6 = vsel %vm1451_vm5, 65537, %v8748_v36  ;;  %vm1431_vm5 = vmpackc.low %vm6590_vm2, %vm6590_vm2 }
  0x66   : > { %5550 = vmatprep.subr.bf16.mxu0 %v6020_v7 }
  0x69   : > { %5551 = vmatpush3.bf16.msra.mxu0 %v6020_v7 }
  0x6a   : > { %5552 = vmatprep.subr.bf16.mxu0 %v6021_v8 }
  0x6d   : > { %5553 = vmatpush3.bf16.msra.mxu0 %v6021_v8  ;;  %v925_v8 = vadd.s32 208, %v6462_v31 }
  0x6e   : > { %5586 = vmatprep.subr.bf16.mxu0 %v6038_v25 }
  0x70   : > { %5555 = vmatmul.mubr.bf16.vlgmr.msra.gmra.mxu0 %v398_v9  ;;  %v927_v9 = vadd.s32 224, %v6462_v31 }
  0x71   : > { %5558 = vmatprep.mubr.bf16.mxu0 %v400_v10  ;;  %5587 = vmatpush3.bf16.msra.mxu0 %v6038_v25  ;;  %v1117_v10 = vand.u32 15, %v925_v8  ;;  %v901_v25 = vadd.s32 16, %v6462_v31  ;;  %v6652_v8 = vsel %vm1431_vm5, 65537, %v8748_v36 }
  0x72   : > { %5588 = vmatprep.subr.bf16.mxu0 %v6039_v26 }
  0x73   : > { %vm1373_vm6 = vcmp.ge.s32.totalorder %v1117_v10, 1  ;;  %v949_v41 = vand.u32 15, %v901_v25 }
  0x74   : > { %vm1453_vm8 = vmpackc.low %vm1373_vm6, %vm1373_vm6 }
  0x75   : > { %5589 = vmatpush3.bf16.msra.mxu0 %v6039_v26  ;;  %vm6577_vm14 = vcmp.ge.s32.totalorder %v949_v41, 1  ;;  %v908_v41 = vadd.s32 72, %v6462_v31 }
  0x76   : > { %5658 = vmatprep.subr.bf16.mxu0 %v6465_v34  ;;  %vm1429_vm3 = vmpackc.low %vm6577_vm14, %vm6577_vm14 }
  0x78   : > { %5559 = vmatmul.mubr.bf16.gmra.mxu0 %v402_v11  ;;  %v1131_v11 = vand.u32 15, %v927_v9 }
  0x79   : > { %5562 = vmatprep.mubr.bf16.mxu0 %v404_v12  ;;  %v929_v12 = vadd.s32 240, %v6462_v31 }
  0x7a   : > { %vm1375_vm7 = vcmp.ge.s32.totalorder %v1131_v11, 1 }
  0x7b   : > { %vm1455_vm9 = vmpackc.low %vm1375_vm7, %vm1375_vm7 }
  0x7c   : > { %vm2123_vm7 = vmpackc.low %vm6601_vm4, %vm6601_vm4 }
  0x80   : > { %5563 = vmatmul.mubr.bf16.gmra.mxu0 %v406_v13  ;;  %v6531_v13 = vsel %vm1453_vm8, 65537, %v8748_v36 }
  0x81   : > { %5566 = vmatprep.mubr.bf16.mxu0 %v408_v14  ;;  %v8879_v14 = vmov 0 }
  0x88   : > { %5567 = vmatmul.mubr.bf16.gmra.mxu0 %v410_v15  ;;  %v6536_v15 = vsel %vm1455_vm9, 65537, %v8748_v36 }
  0x89   : > { %5570 = vmatprep.mubr.bf16.mxu0 %v412_v16  ;;  %8840 = vst [vmem:[#allocation15_spill] sm:$0xff] %v6536_v15 }
  0x90   : > { %5571 = vmatmul.mubr.bf16.gmra.mxu0 %v414_v17  ;;  %v1145_v17 = vand.u32 15, %v929_v12 }
  0x91   : > { %5574 = vmatprep.mubr.bf16.mxu0 %v416_v18 }
  0x92   : > { %vm1377_vm10 = vcmp.ge.s32.totalorder %v1145_v17, 1 }
  0x93   : > { %vm1457_vm11 = vmpackc.low %vm1377_vm10, %vm1377_vm10 }
  0x94   : > { %v6541_v18 = vsel %vm1457_vm11, 65537, %v8748_v36 }
  0x95   : > { %8841 = vst [vmem:[#allocation16_spill] sm:$0xff] %v6541_v18 }
  0x98   : > { %5575 = vmatmul.mubr.bf16.gmra.mxu0 %v418_v19 }
  0x99   : > { %5578 = vmatprep.mubr.bf16.mxu0 %v420_v20  ;;  %v6548_v20 = vld [vmem:[%s8729_s2] ss:$0 sm:$0xff] }
  0xa0   : > { %5579 = vmatmul.mubr.bf16.gmra.mxu0 %v422_v21  ;;  %v900_v21 = vadd.s32 8, %v6462_v31 }
  0xa1   : > { %5582 = vmatprep.mubr.bf16.mxu0 %v424_v22  ;;  %v902_v22 = vadd.s32 24, %v6462_v31 }
  0xa2   : > { %v942_v28 = vand.u32 15, %v900_v21  ;;  %v977_v21 = vand.u32 15, %v905_v57 }
  0xa3   : > { %v956_v33 = vand.u32 15, %v902_v22 }
  0xa4   : > { %vm6565_vm12 = vcmp.lt.s32.totalorder %v942_v28, 15  ;;  %vm6629_vm6 = vcmp.ge.s32.totalorder %v977_v21, 1 }
  0xa5   : > { %vm6573_vm13 = vcmp.lt.s32.totalorder %v956_v33, 15  ;;  %vm2119_vm15 = vmpackc.low %vm6565_vm12, %vm6565_vm12 }
  0xa6   : > { %vm2121_vm1 = vmpackc.low %vm6573_vm13, %vm6573_vm13  ;;  %v6614_v33 = vsel %vm2119_vm15, 65537, %v8748_v36 }
  0xa7   : > { %v6622_v39 = vsel %vm2121_vm1, 65537, %v8748_v36  ;;  %vm1433_vm8 = vmpackc.low %vm6629_vm6, %vm6629_vm6 }
  0xa8   : > { %5583 = vmatmul.mubr.bf16.gmra.mxu0 %v426_v23 }
  0xa9   : > { %5590 = vmatprep.mubr.msk.bf16.mxu0 %vm8762_vm0, %v1607_v30 }
 0x130   : > { %v5556_v23 = vpop.f32.mrf.mxu0 }
 0x131   : > { %v758_v26 = vmul.f32 %v5556_v23, %v6548_v20 }
 0x132   : > { %v622_v27 = vpop.f32.mrf.mxu0 }
 0x133   : > { %v797_v30 = vadd.f32 %v6555_v24, %v758_v26  ;;  %v756_v32 = vmul.f32 %v6548_v20, %v622_v27  ;;  %v906_v26 = vadd.s32 56, %v6462_v31 }
 0x134   : > { %v5557_v35 = vpop.f32.mrf.mxu0 }
 0x135   : > { %v829_v42 = vmax.f32 %v797_v30, 0.0  ;;  %v795_v47 = vadd.f32 %v6555_v24, %v756_v32  ;;  %v759_v48 = vmul.f32 %v5557_v35, %v6548_v20  ;;  %v984_v56 = vand.u32 15, %v906_v26 }
 0x136   : > { %v625_v49 = vpop.f32.mrf.mxu0 }
 0x137   : > { %868 = vst.msk [vmem:[#allocation2 + $0x28] sm:$0xff] %vm8762_vm0, %v829_v42  ;;  %v827_v58 = vmax.f32 %v795_v47, 0.0  ;;  %v798_v59 = vadd.f32 %v6555_v24, %v759_v48  ;;  %v757_v0 = vmul.f32 %v6548_v20, %v625_v49  ;;  %v1461_v42 = vsel %vm1429_vm3, 65537, %v8748_v36 }
 0x138   : > { %v5560_v2 = vpop.f32.mrf.mxu0  ;;  %v5112_v21 = vcombine.low %v1461_v42, %v6470_v37  ;;  %vm6666_vm9 = vcmp.lt.s32.totalorder %v984_v56, 15 }
 0x139   : > { %866 = vst.msk [vmem:[#allocation2 + $0x18] sm:$0xff] %vm8762_vm0, %v827_v58  ;;  %v830_v9 = vmax.f32 %v798_v59, 0.0  ;;  %v796_v10 = vadd.f32 %v6555_v24, %v757_v0  ;;  %v762_v11 = vmul.f32 %v5560_v2, %v6548_v20  ;;  %v5163_v58 = vcombine.low %v6470_v37, %v6614_v33  ;;  %vm2125_vm10 = vmpackc.low %vm6666_vm9, %vm6666_vm9 }
 0x13a   : > { %v638_v12 = vpop.f32.mrf.mxu0  ;;  %v910_v59 = vadd.s32 88, %v6462_v31  ;;  %v912_v33 = vadd.s32 104, %v6462_v31  ;;  %vm6703_vm12 = vcmp.ne.s16.totalorder %v5112_v21, 0 }
 0x13b   : > { %869 = vst.msk [vmem:[#allocation2 + $0x30] sm:$0xff] %vm8762_vm0, %v830_v9  ;;  %v828_v22 = vmax.f32 %v796_v10, 0.0  ;;  %v801_v23 = vadd.f32 %v6555_v24, %v762_v11  ;;  %v760_v25 = vmul.f32 %v6548_v20, %v638_v12  ;;  %v5164_v10 = vcombine.low %v6470_v37, %v6622_v39 }
 0x13c   : > { %v5561_v27 = vpop.f32.mrf.mxu0  ;;  %v6660_v11 = vsel %vm2123_vm7, 65537, %v8748_v36  ;;  %v998_v12 = vand.u32 15, %v908_v41  ;;  %v1465_v41 = vsel %vm1433_vm8, 65537, %v8748_v36  ;;  %vm6710_vm13 = vcmp.ne.s16.totalorder %v5163_v58, 0  ;;  %v6733_v58 = vld [vmem:[#allocation6 + $0x48] sm:$0xff]  }
 0x13d   : > { %867 = vst.msk [vmem:[#allocation2 + $0x20] sm:$0xff] %vm8762_vm0, %v828_v22  ;;  %v833_v29 = vmax.f32 %v801_v23, 0.0  ;;  %v799_v30 = vadd.f32 %v6555_v24, %v760_v25  ;;  %v763_v32 = vmul.f32 %v5561_v27, %v6548_v20  ;;  %v5114_v21 = vcombine.low %v1465_v41, %v6470_v37 }
 0x13e   : > { %v641_v35 = vpop.f32.mrf.mxu0  ;;  %v1579_v56 = vld [vmem:[#allocation2 + $0x28] sm:$0xff]  ;;  %vm6689_vm11 = vcmp.lt.s32.totalorder %v998_v12, 15  ;;  %vm6749_vm1 = vcmp.ne.s16.totalorder %v5164_v10, 0 }
 0x13f   : > { %872 = vst.msk [vmem:[#allocation2 + $0x48] sm:$0xff] %vm8762_vm0, %v833_v29  ;;  %v831_v48 = vmax.f32 %v799_v30, 0.0  ;;  %v802_v49 = vadd.f32 %v6555_v24, %v763_v32  ;;  %v761_v50 = vmul.f32 %v6548_v20, %v641_v35  ;;  %v6041_v30 = vld [vmem:[#allocation6 + $0x20] sm:$0xff]   ;;  %v1012_v32 = vand.u32 15, %v910_v59  ;;  %vm2127_vm15 = vmpackc.low %vm6689_vm11, %vm6689_vm11 }
 0x140   : > { %v5564_v57 = vpop.f32.mrf.mxu0  ;;  %v1577_v28 = vld [vmem:[#allocation2 + $0x18] sm:$0xff]  ;;  %v5113_v35 = vcombine.low %v6652_v8, %v6470_v37  ;;  %v2159_v39 = vsel %vm2127_vm15, 65537, %v8748_v36  ;;  %vm6772_vm5 = vcmp.ne.s16.totalorder %v5114_v21, 0  ;;  %vm6851_vm11 = vcmp.ne.s16.totalorder %v5115_v40, 0 }
 0x141   : > { %870 = vst.msk [vmem:[#allocation2 + $0x38] sm:$0xff] %vm8762_vm0, %v831_v48  ;;  %v834_v1 = vmax.f32 %v802_v49, 0.0  ;;  %v800_v2 = vadd.f32 %v6555_v24, %v761_v50  ;;  %v766_v3 = vmul.f32 %v5564_v57, %v6548_v20  ;;  %v2071_v12 = vld [vmem:[#allocation2 + $0x11] sm:$0xff]  ;;  %vm6714_vm14 = vcmp.lt.s32.totalorder %v1012_v32, 15 }
 0x142   : > { %v654_v9 = vpop.f32.mrf.mxu0  ;;  %v1580_v25 = vld [vmem:[#allocation2 + $0x30] sm:$0xff]  ;;  %vm2129_vm2 = vmpackc.low %vm6714_vm14, %vm6714_vm14  ;;  %vm6756_vm3 = vcmp.ne.s16.totalorder %v5113_v35, 0  ;;  %vm6858_vm14 = vcmp.ne.s16.totalorder %v5116_v44, 0 }
 0x143   : > { %873 = vst.msk [vmem:[#allocation2 + $0x50] sm:$0xff] %vm8762_vm0, %v834_v1  ;;  %v832_v17 = vmax.f32 %v800_v2, 0.0  ;;  %v805_v22 = vadd.f32 %v6555_v24, %v766_v3  ;;  %v764_v23 = vmul.f32 %v6548_v20, %v654_v9  ;;  %v1384_v59 = vld [vmem:[#allocation2 + $0x2f] sm:$0xff]  ;;  %v6684_v2 = vpack.c.bf16 %v1580_v25, %v1579_v56 }
 0x144   : > { %v5565_v27 = vpop.f32.mrf.mxu0  ;;  %v1578_v29 = vld [vmem:[#allocation2 + $0x20] sm:$0xff]  ;;  %v914_v3 = vadd.s32 120, %v6462_v31  ;;  %v2074_v7 = vld [vmem:[#allocation2 + $0x29] sm:$0xff] }
 0x145   : > { %871 = vst.msk [vmem:[#allocation2 + $0x40] sm:$0xff] %vm8762_vm0, %v832_v17  ;;  %v837_v42 = vmax.f32 %v805_v22, 0.0  ;;  %v803_v48 = vadd.f32 %v6555_v24, %v764_v23  ;;  %v767_v49 = vmul.f32 %v5565_v27, %v6548_v20  ;;  %v6682_v50 = vpack.c.bf16 %v1578_v29, %v1577_v28  ;;  %v1383_v57 = vld [vmem:[#allocation2 + $0x27] sm:$0xff] }
 0x146   : > { %v657_v1 = vpop.f32.mrf.mxu0  ;;  %v6694_v8 = vpack.c.bf16 %v1384_v59, %v1383_v57  ;;  %v6701_v23 = vld [vmem:[#allocation2 + $0x9] sm:$0xff]  ;;  %v8860_v28 = vmov 0  ;;  %v5165_v59 = vcombine.low %v6470_v37, %v6660_v11  ;;  %v2073_v19 = vld [vmem:[#allocation2 + $0x21] sm:$0xff] }
 0x147   : > { %876 = vst.msk [vmem:[#allocation2 + $0x68] sm:$0xff] %vm8762_vm0, %v837_v42  ;;  %v835_v9 = vmax.f32 %v803_v48, 0.0  ;;  %v806_v17 = vadd.f32 %v6555_v24, %v767_v49  ;;  %v765_v22 = vmul.f32 %v6548_v20, %v657_v1  ;;  %5591 = vmatmul.mubr.msk.bf16.vlgmr.msra.gmra.mxu0 %vm8762_vm0, %v6682_v50  ;;  %v8861_v28 = vsel %vm6710_vm13, 4294967295, %v8860_v28 }
 0x148   : > { %v5568_v27 = vpop.f32.mrf.mxu0  ;;  %5594 = vmatprep.mubr.msk.bf16.mxu0 %vm8762_vm0, %v6684_v2  ;;  %5659 = vmatpush3.bf16.msra.mxu0 %v6465_v34  ;;  %8862 = vst [vmem:[#allocation17_spill] sm:$0xff] %v8861_v28  ;;  %v1026_v42 = vand.u32 15, %v912_v33  ;;  %v6728_v34 = vsel %vm2125_vm10, 65537, %v8748_v36  ;;  %v1583_v33 = vld [vmem:[#allocation2 + $0x48] sm:$0xff]  ;;  %v2102_v57 = vpack.c.bf16 %v2071_v12, %v6701_v23  ;;  %v1040_v1 = vand.u32 15, %v914_v3  ;;  %v1581_v12 = vld [vmem:[#allocation2 + $0x38] sm:$0xff] }
 0x149   : > { %874 = vst.msk [vmem:[#allocation2 + $0x58] sm:$0xff] %vm8762_vm0, %v835_v9  ;;  %v838_v48 = vmax.f32 %v806_v17, 0.0  ;;  %v804_v49 = vadd.f32 %v6555_v24, %v765_v22  ;;  %v770_v56 = vmul.f32 %v5568_v27, %v6548_v20  ;;  %5660 = vmatprep.subr.bf16.mxu0 %v6041_v30  ;;  %v8865_v23 = vmov 0  ;;  %v1385_v35 = vld [vmem:[#allocation2 + $0x37] sm:$0xff] }
 0x14a   : > { %v670_v32 = vpop.f32.mrf.mxu0  ;;  %v1584_v41 = vld [vmem:[#allocation2 + $0x50] sm:$0xff]  ;;  %v8866_v23 = vsel %vm6749_vm1, 4294967295, %v8865_v23  ;;  %vm6768_vm4 = vcmp.lt.s32.totalorder %v1026_v42, 15  ;;  %vm6792_vm6 = vcmp.lt.s32.totalorder %v1040_v1, 15  ;;  %v2246_v29 = vsel %vm6710_vm13, %v2102_v57, 0  ;;  %v2072_v1 = vld [vmem:[#allocation2 + $0x19] sm:$0xff] }
 0x14b   : > { %877 = vst.msk [vmem:[#allocation2 + $0x70] sm:$0xff] %vm8762_vm0, %v838_v48  ;;  %v836_v9 = vmax.f32 %v804_v49, 0.0  ;;  %v809_v17 = vadd.f32 %v6555_v24, %v770_v56  ;;  %v768_v22 = vmul.f32 %v6548_v20, %v670_v32  ;;  %v6744_v27 = vpack.c.bf16 %v1584_v41, %v1583_v33  ;;  %8867 = vst [vmem:[#allocation18_spill] sm:$0xff] %v8866_v23  ;;  %v1388_v21 = vld [vmem:[#allocation2 + $0x4f] sm:$0xff] }
 0x14c   : > { %v5569_v3 = vpop.f32.mrf.mxu0  ;;  %v1582_v48 = vld [vmem:[#allocation2 + $0x40] sm:$0xff]  ;;  %5661 = vmatpush3.bf16.msra.mxu0 %v6041_v30  ;;  %v5166_v49 = vcombine.low %v6470_v37, %v6728_v34  ;;  %v8872_v56 = vmov 0  ;;  %vm2131_vm7 = vmpackc.low %vm6768_vm4, %vm6768_vm4  ;;  %vm6811_vm8 = vcmp.ne.s16.totalorder %v5165_v59, 0  ;;  %v6820_v57 = vadd.s32 152, %v6462_v31 }
 0x14d   : > { %v8873_v56 = vsel %vm6772_vm5, 4294967295, %v8872_v56  ;;  %875 = vst.msk [vmem:[#allocation2 + $0x60] sm:$0xff] %vm8762_vm0, %v836_v9  ;;  %v841_v30 = vmax.f32 %v809_v17, 0.0  ;;  %v807_v34 = vadd.f32 %v6555_v24, %v768_v22  ;;  %v771_v32 = vmul.f32 %v5569_v3, %v6548_v20  ;;  %5598 = vmatprep.mubr.msk.bf16.mxu1 %vm8762_vm0, %v6744_v27  ;;  %5730 = vmatprep.subr.bf16.mxu0 %v6733_v58  ;;  %v1386_v42 = vld [vmem:[#allocation2 + $0x3f] sm:$0xff]  ;;  %v1387_v33 = vld [vmem:[#allocation2 + $0x47] sm:$0xff]  ;;  %vm2133_vm9 = vmpackc.low %vm6792_vm6, %vm6792_vm6 }
 0x14e   : > { %v6781_v47 = vpack.c.bf16 %v1582_v48, %v1581_v12  ;;  %v673_v41 = vpop.f32.mrf.mxu0  ;;  %v6790_v9 = vsel %vm2129_vm2, 65537, %v8748_v36  ;;  %v6796_v22 = vpack.c.bf16 %v1386_v42, %v1385_v35  ;;  %v6798_v3 = vpack.c.bf16 %v1388_v21, %v1387_v33  ;;  %v2075_v21 = vld [vmem:[#allocation2 + $0x31] sm:$0xff]  ;;  %v6917_v17 = vld [vmem:[#allocation6 + $0x38] sm:$0xff]  }
 0x14f   : > { %880 = vst.msk [vmem:[#allocation2 + $0x88] sm:$0xff] %vm8762_vm0, %v841_v30  ;;  %v839_v12 = vmax.f32 %v807_v34, 0.0  ;;  %v810_v48 = vadd.f32 %v6555_v24, %v771_v32  ;;  %v769_v26 = vmul.f32 %v6548_v20, %v673_v41  ;;  %v8876_v30 = vmov 0 }
 0x150   : > { %5595 = vmatmul.mubr.msk.bf16.gmra.mxu0 %vm8762_vm0, %v6781_v47  ;;  %v5572_v35 = vpop.f32.mrf.mxu0  ;;  %v8877_v30 = vsel %vm6811_vm8, 4294967295, %v8876_v30  ;;  %v5167_v34 = vcombine.low %v6470_v37, %v2159_v39  ;;  %v6817_v32 = vadd.s32 136, %v6462_v31  ;;  %v6828_v39 = vsel %vm2131_vm7, 65537, %v8748_v36  ;;  %v1389_v5 = vld [vmem:[#allocation2 + $0x57] sm:$0xff] }
 0x151   : > { %5662 = vmatprep.mubr.msk.bf16.mxu0 %vm8762_vm0, %v2246_v29  ;;  %8878 = vst [vmem:[#allocation19_spill] sm:$0xff] %v8877_v30  ;;  %878 = vst.msk [vmem:[#allocation2 + $0x78] sm:$0xff] %vm8762_vm0, %v839_v12  ;;  %v842_v10 = vmax.f32 %v810_v48, 0.0  ;;  %v808_v42 = vadd.f32 %v6555_v24, %v769_v26  ;;  %v774_v33 = vmul.f32 %v5572_v35, %v6548_v20  ;;  %v1587_v35 = vld [vmem:[#allocation2 + $0x68] sm:$0xff]  ;;  %vm6842_vm10 = vcmp.ne.s16.totalorder %v5166_v49, 0 }
 0x152   : > { %v686_v41 = vpop.f32.mrf.mxu0  ;;  %v2103_v29 = vpack.c.bf16 %v2073_v19, %v2072_v1  ;;  %v1588_v16 = vld [vmem:[#allocation2 + $0x70] sm:$0xff]  ;;  %v8880_v14 = vsel %vm6842_vm10, 4294967295, %v8879_v14  ;;  %vm6862_vm15 = vcmp.ne.s16.totalorder %v5167_v34, 0  ;;  %v8886_v12 = vmov 0 }
 0x153   : > { %881 = vst.msk [vmem:[#allocation2 + $0x90] sm:$0xff] %vm8762_vm0, %v842_v10  ;;  %v840_v48 = vmax.f32 %v808_v42, 0.0  ;;  %v813_v19 = vadd.f32 %v6555_v24, %v774_v33  ;;  %v772_v1 = vmul.f32 %v6548_v20, %v686_v41  ;;  %8881 = vst [vmem:[#allocation20_spill] sm:$0xff] %v8880_v14  ;;  %v8884_v10 = vmov 0  ;;  %v1585_v42 = vld [vmem:[#allocation2 + $0x58] sm:$0xff]  ;;  %v1392_v61 = vld [vmem:[#allocation2 + $0x6f] sm:$0xff] }
 0x154   : > { %v8885_v10 = vsel %vm6858_vm14, 4294967295, %v8884_v10  ;;  %v5573_v49 = vpop.f32.mrf.mxu0  ;;  %v1586_v33 = vld [vmem:[#allocation2 + $0x60] sm:$0xff]  ;;  %v2104_v41 = vpack.c.bf16 %v2075_v21, %v2074_v7  ;;  %v8887_v12 = vsel %vm6862_vm15, 4294967295, %v8886_v12  ;;  %v1054_v38 = vand.u32 15, %v6817_v32 }
 0x155   : > { %8888 = vst [vmem:[#allocation21_spill] sm:$0xff] %v8887_v12  ;;  %v1068_v40 = vand.u32 15, %v6820_v57  ;;  %879 = vst.msk [vmem:[#allocation2 + $0x80] sm:$0xff] %vm8762_vm0, %v840_v48  ;;  %v845_v44 = vmax.f32 %v813_v19, 0.0  ;;  %v811_v55 = vadd.f32 %v6555_v24, %v772_v1  ;;  %v775_v7 = vmul.f32 %v5573_v49, %v6548_v20  ;;  %v1390_v21 = vld [vmem:[#allocation2 + $0x5f] sm:$0xff]  ;;  %v1391_v0 = vld [vmem:[#allocation2 + $0x67] sm:$0xff] }
 0x156   : > { %v6874_v34 = vpack.c.bf16 %v1586_v33, %v1585_v42  ;;  %v689_v32 = vpop.f32.mrf.mxu0  ;;  %v2247_v57 = vsel %vm6749_vm1, %v2103_v29, 0  ;;  %v6878_v46 = vpack.c.bf16 %v1588_v16, %v1587_v35  ;;  %v6880_v59 = vpack.c.bf16 %v1390_v21, %v1389_v5  ;;  %v2076_v49 = vld [vmem:[#allocation2 + $0x39] sm:$0xff]  ;;  %v2077_v29 = vld [vmem:[#allocation2 + $0x41] sm:$0xff]  ;;  %v6046_v16 = vld [vmem:[#allocation6 + $0x40] sm:$0xff]  }
 0x157   : > { %v6882_v43 = vpack.c.bf16 %v1392_v61, %v1391_v0  ;;  %884 = vst.msk [vmem:[#allocation2 + $0xa8] sm:$0xff] %vm8762_vm0, %v845_v44  ;;  %v843_v48 = vmax.f32 %v811_v55, 0.0  ;;  %v814_v19 = vadd.f32 %v6555_v24, %v775_v7  ;;  %v773_v1 = vmul.f32 %v6548_v20, %v689_v32  ;;  %v2079_v0 = vld [vmem:[#allocation2 + $0x51] sm:$0xff]  ;;  %v2078_v32 = vld [vmem:[#allocation2 + $0x49] sm:$0xff] }
 0x158   : > { %8889 = vst [vmem:[#allocation22_spill] sm:$0xff] %v6878_v46  ;;  %5599 = vmatmul.mubr.msk.bf16.vlgmr.msra.gmra.mxu1 %vm8762_vm0, %v6874_v34  ;;  %5663 = vmatmul.mubr.msk.bf16.vlgmr.msra.gmra.mxu0 %vm8762_vm0, %v2247_v57  ;;  %v5576_v61 = vpop.f32.mrf.mxu0  ;;  %v2248_v55 = vsel %vm6811_vm8, %v2104_v41, 0  ;;  %v6903_v35 = vsel %vm2133_vm9, 65537, %v8748_v36  ;;  %vm6905_vm2 = vcmp.lt.s32.totalorder %v1054_v38, 15  ;;  %vm6922_vm4 = vcmp.ne.s16.totalorder %v5118_v53, 0 }
 0x159   : > { %5623 = vmatpush3.bf16.msra.mxu1 %v6490_v51  ;;  %5602 = vmatprep.mubr.msk.bf16.mxu1 %vm8762_vm0, %v6878_v46  ;;  %v6910_v51 = vadd.s32 168, %v6462_v31  ;;  %882 = vst.msk [vmem:[#allocation2 + $0x98] sm:$0xff] %vm8762_vm0, %v843_v48  ;;  %v846_v33 = vmax.f32 %v814_v19, 0.0  ;;  %v812_v41 = vadd.f32 %v6555_v24, %v773_v1  ;;  %v778_v44 = vmul.f32 %v5576_v61, %v6548_v20  ;;  %v1591_v1 = vld [vmem:[#allocation2 + $0x88] sm:$0xff]  ;;  %vm8912_vm8 = vmpackc.low %vm6905_vm2, %vm6905_vm2 }
 0x15a   : > { %5666 = vmatprep.mubr.msk.bf16.mxu0 %vm8762_vm0, %v2248_v55  ;;  %5624 = vmatprep.subr.bf16.mxu1 %v6846_v63  ;;  %v8892_v38 = vmov 0  ;;  %v702_v7 = vpop.f32.mrf.mxu0  ;;  %v2105_v21 = vpack.c.bf16 %v2077_v29, %v2076_v49  ;;  %vm6926_vm6 = vcmp.lt.s32.totalorder %v1068_v40, 15  ;;  %v1592_v49 = vld [vmem:[#allocation2 + $0x90] sm:$0xff]  ;;  %v2106_v29 = vpack.c.bf16 %v2079_v0, %v2078_v32  ;;  %v6947_v55 = vld [vmem:[#allocation6 + $0x68] sm:$0xff]  }
 0x15b   : > { %v8893_v38 = vsel %vm6922_vm4, 4294967295, %v8892_v38  ;;  %5731 = vmatpush3.bf16.msra.mxu0 %v6733_v58  ;;  %885 = vst.msk [vmem:[#allocation2 + $0xb0] sm:$0xff] %vm8762_vm0, %v846_v33  ;;  %v844_v53 = vmax.f32 %v812_v41, 0.0  ;;  %v817_v19 = vadd.f32 %v6555_v24, %v778_v44  ;;  %v776_v40 = vmul.f32 %v6548_v20, %v702_v7  ;;  %v1589_v33 = vld [vmem:[#allocation2 + $0x78] sm:$0xff]  ;;  %v1396_v5 = vld [vmem:[#allocation2 + $0x8f] sm:$0xff] }
 0x15c   : > { %v8896_v58 = vcombine.low %v6470_v37, %v6790_v9  ;;  %v8897_v61 = vmov 0  ;;  %5732 = vmatprep.subr.bf16.mxu0 %v6046_v16  ;;  %v5577_v52 = vpop.f32.mrf.mxu0  ;;  %v1590_v41 = vld [vmem:[#allocation2 + $0x80] sm:$0xff]  ;;  %v5170_v44 = vcombine.low %v6470_v37, %v6903_v35  ;;  %v1082_v0 = vand.u32 15, %v6910_v51  ;;  %v1393_v9 = vld [vmem:[#allocation2 + $0x77] sm:$0xff] }
 0x15d   : > { %5625 = vmatpush3.bf16.msra.mxu1 %v6846_v63  ;;  %v6954_v7 = vadd.s32 184, %v6462_v31  ;;  %883 = vst.msk [vmem:[#allocation2 + $0xa0] sm:$0xff] %vm8762_vm0, %v844_v53  ;;  %v815_v48 = vadd.f32 %v6555_v24, %v776_v40  ;;  %v779_v63 = vmul.f32 %v5577_v52, %v6548_v20  ;;  %v6962_v36 = vpack.c.bf16 %v1590_v41, %v1589_v33  ;;  %v1394_v35 = vld [vmem:[#allocation2 + $0x7f] sm:$0xff]  ;;  %v1395_v51 = vld [vmem:[#allocation2 + $0x87] sm:$0xff] }
 0x15e   : > { %vm6943_vm7 = vcmp.ne.s16.totalorder %v8896_v58, 0  ;;  %v849_v58 = vmax.f32 %v817_v19, 0.0  ;;  %5694 = vmatprep.subr.bf16.mxu1 %v6917_v17  ;;  %v705_v30 = vpop.f32.mrf.mxu0  ;;  %v2249_v23 = vsel %vm6842_vm10, %v2105_v21, 0  ;;  %v6967_v28 = vpack.c.bf16 %v1592_v49, %v1591_v1  ;;  %v2081_v1 = vld [vmem:[#allocation2 + $0x61] sm:$0xff] }
 0x15f   : > { %v8898_v61 = vsel %vm6943_vm7, 4294967295, %v8897_v61  ;;  %8900 = vst [vmem:[#allocation24_spill] sm:$0xff] %v6962_v36  ;;  %5733 = vmatpush3.bf16.msra.mxu0 %v6046_v16  ;;  %v6972_v53 = vpack.c.bf16 %v1394_v35, %v1393_v9  ;;  %v6974_v52 = vpack.c.bf16 %v1396_v5, %v1395_v51  ;;  %v847_v19 = vmax.f32 %v815_v48, 0.0  ;;  %v2080_v16 = vld [vmem:[#allocation2 + $0x59] sm:$0xff]  ;;  %v2083_v5 = vld [vmem:[#allocation2 + $0x71] sm:$0xff] }
 0x160   : > { %8899 = vst [vmem:[#allocation23_spill] sm:$0xff] %v8898_v61  ;;  %8901 = vst [vmem:[#allocation25_spill] sm:$0xff] %v6967_v28  ;;  %v818_v40 = vadd.f32 %v6555_v24, %v779_v63  ;;  %v777_v33 = vmul.f32 %v6548_v20, %v705_v30  ;;  %5603 = vmatmul.mubr.msk.bf16.gmra.mxu1 %vm8762_vm0, %v6962_v36  ;;  %5667 = vmatmul.mubr.msk.bf16.gmra.mxu0 %vm8762_vm0, %v2249_v23  ;;  %v2250_v21 = vsel %vm6862_vm15, %v2106_v29, 0  ;;  %v5580_v49 = vpop.f32.mrf.mxu0  ;;  %v8903_v48 = vmov 0  ;;  %v1593_v42 = vld [vmem:[#allocation2 + $0x98] sm:$0xff] }
 0x161   : > { %888 = vst.msk [vmem:[#allocation2 + $0xc8] sm:$0xff] %vm8762_vm0, %v849_v58  ;;  %5606 = vmatprep.mubr.msk.bf16.mxu1 %vm8762_vm0, %v6967_v28  ;;  %5670 = vmatprep.mubr.msk.bf16.mxu0 %vm8762_vm0, %v2250_v21  ;;  %v8902_v30 = vcombine.low %v6470_v37, %v6828_v39  ;;  %vm6994_vm10 = vcmp.lt.s32.totalorder %v1082_v0, 15  ;;  %v6999_v29 = vadd.s32 200, %v6462_v31  ;;  %v8908_v41 = vcombine.low %v6484_v45, %v6470_v37  ;;  %v2082_v21 = vld [vmem:[#allocation2 + $0x69] sm:$0xff] }
 0x162   : > { %v8909_v9 = vmov 0  ;;  %886 = vst.msk [vmem:[#allocation2 + $0xb8] sm:$0xff] %vm8762_vm0, %v847_v19  ;;  %v850_v39 = vmax.f32 %v818_v40, 0.0  ;;  %v816_v58 = vadd.f32 %v6555_v24, %v777_v33  ;;  %v782_v0 = vmul.f32 %v5580_v49, %v6548_v20  ;;  %5802 = vmatprep.subr.bf16.mxu0 %v6947_v55  ;;  %v718_v45 = vpop.f32.mrf.mxu0  ;;  %v1595_v49 = vld [vmem:[#allocation2 + $0xa8] sm:$0xff] }
 0x163   : > { %vm6990_vm9 = vcmp.ne.s16.totalorder %v8902_v30, 0  ;;  %vm7004_vm15 = vcmp.ne.s16.totalorder %v8908_v41, 0  ;;  %v8911_v63 = vmov 0   ;;  %v2107_v51 = vpack.c.bf16 %v2081_v1, %v2080_v16  ;;  %v1596_v30 = vld [vmem:[#allocation2 + $0xb0] sm:$0xff] }
 0x164   : > { %v8904_v48 = vsel %vm6990_vm9, 4294967295, %v8903_v48  ;;  %v8910_v9 = vsel %vm7004_vm15, 4294967295, %v8909_v9  ;;  %v2167_v35 = vsel %vm8912_vm8, 65537, %v8911_v63  ;;  %v1096_v19 = vand.u32 15, %v6954_v7  ;;  %v5581_v32 = vpop.f32.mrf.mxu0  ;;  %v1594_v40 = vld [vmem:[#allocation2 + $0xa0] sm:$0xff]  ;;  %v1400_v15 = vld [vmem:[#allocation2 + $0xaf] sm:$0xff] }
 0x165   : > { %8905 = vst [vmem:[#allocation26_spill] sm:$0xff] %v8904_v48  ;;  %vm8913_vm8 = vcmask 261120   ;;  %v848_v33 = vmax.f32 %v816_v58, 0.0  ;;  %v821_v16 = vadd.f32 %v6555_v24, %v782_v0  ;;  %v780_v1 = vmul.f32 %v6548_v20, %v718_v45  ;;  %v1397_v0 = vld [vmem:[#allocation2 + $0x97] sm:$0xff]  ;;  %v1399_v18 = vld [vmem:[#allocation2 + $0xa7] sm:$0xff] }
 0x166   : > { %889 = vst.msk [vmem:[#allocation2 + $0xd0] sm:$0xff] %vm8913_vm8, %v850_v39  ;;  %v2108_v41 = vpack.c.bf16 %v2083_v5, %v2082_v21  ;;  %vm7031_vm2 = vcmp.ne.s16.totalorder %v5170_v44, 0  ;;  %v8914_v7 = vmov 0  ;;  %v5171_v39 = vcombine.low %v6470_v37, %v2167_v35  ;;  %v721_v28 = vpop.f32.mrf.mxu0 }
 0x167   : > { %v8915_v7 = vsel %vm7031_vm2, 4294967295, %v8914_v7  ;;  %v1110_v58 = vand.u32 15, %v6999_v29  ;;  %v8916_v45 = vcombine.low %v6506_v60, %v6470_v37  ;;  %v8917_v44 = vmov 0 }
 0x168   : > { %vm8919_vm0 = vcmask 261120   ;;  %v853_v21 = vmax.f32 %v821_v16, 0.0  ;;  %v819_v12 = vadd.f32 %v6555_v24, %v780_v1  ;;  %v783_v35 = vmul.f32 %v5581_v32, %v6548_v20 }
 0x169   : > { %vm7043_vm8 = vcmp.ne.s16.totalorder %v8916_v45, 0  ;;  %887 = vst.msk [vmem:[#allocation2 + $0xc0] sm:$0xff] %vm8919_vm0, %v848_v33  ;;  %v7053_v29 = vpack.c.bf16 %v1594_v40, %v1593_v42  ;;  %v8921_v14 = vand.u32 15, %v6462_v31  ;;  %v1398_v45 = vld [vmem:[#allocation2 + $0x9f] sm:$0xff]  ;;  %v2251_v33 = vsel %vm6943_vm7, %v2107_v51, 0  ;;  %vm8926_vm13 = vmmov %vm8919_vm0 }
 0x16a   : > { %v8918_v44 = vsel %vm7043_vm8, 4294967295, %v8917_v44  ;;  %v7063_v16 = vpack.c.bf16 %v1596_v30, %v1595_v49  ;;  %v7065_v1 = vpack.c.bf16 %v1398_v45, %v1397_v0  ;;  %v7067_v32 = vpack.c.bf16 %v1400_v15, %v1399_v18  ;;  %892 = vst.msk [vmem:[#allocation2 + $0xe8] sm:$0xff] %vm8919_vm0, %v853_v21  ;;  %vm8927_vm15 = vmmov %vm8919_vm0  ;;  %v2084_v49 = vld [vmem:[#allocation2 + $0x79] sm:$0xff]  ;;  %v2085_v30 = vld [vmem:[#allocation2 + $0x81] sm:$0xff]  ;;  %v5584_v0 = vpop.f32.mrf.mxu0 }
 0x16b   : > { %8920 = vst [vmem:[#allocation27_spill] sm:$0xff] %v7053_v29  ;;  %vm7057_vm1 = vcmp.ge.s32.totalorder %v8921_v14, 1  ;;  %v851_v40 = vmax.f32 %v819_v12, 0.0  ;;  %v822_v14 = vadd.f32 %v6555_v24, %v783_v35  ;;  %v781_v42 = vmul.f32 %v6548_v20, %v721_v28  ;;  %5607 = vmatmul.mubr.msk.bf16.gmra.mxu1 %vm8926_vm13, %v7053_v29  ;;  %5671 = vmatmul.mubr.msk.bf16.gmra.mxu0 %vm8927_vm15, %v2251_v33  ;;  %vm8928_vm7 = vmmov %vm8919_vm0  ;;  %v2087_v15 = vld [vmem:[#allocation2 + $0x91] sm:$0xff] }
 0x16c   : > { %8924 = vst [vmem:[#allocation28_spill] sm:$0xff] %v7063_v16  ;;  %8925 = vst [vmem:[#allocation29_spill] sm:$0xff] %v7065_v1  ;;  %v2252_v51 = vsel %vm6990_vm9, %v2108_v41, 0  ;;  %5610 = vmatprep.mubr.msk.bf16.mxu1 %vm8928_vm7, %v7063_v16  ;;  %vm7080_vm14 = vcmp.ne.s16.totalorder %v5171_v39, 0  ;;  %v8929_v18 = vmov 0  ;;  %v8933_v41 = vcombine.low %v6498_v54, %v6470_v37  ;;  %v734_v23 = vpop.f32.mrf.mxu0  ;;  %v1597_v5 = vld [vmem:[#allocation2 + $0xb8] sm:$0xff] }
 0x16d   : > { %5674 = vmatprep.mubr.msk.bf16.mxu0 %vm8919_vm0, %v2252_v51  ;;  %v8930_v18 = vsel %vm7080_vm14, 4294967295, %v8929_v18  ;;  %vm8931_vm13 = vmpackc.low %vm6926_vm6, %vm6926_vm6  ;;  %v8934_v39 = vmov 0  ;;  %890 = vst.msk [vmem:[#allocation2 + $0xd8] sm:$0xff] %vm8919_vm0, %v851_v40  ;;  %v854_v57 = vmax.f32 %v822_v14, 0.0  ;;  %v820_v21 = vadd.f32 %v6555_v24, %v781_v42  ;;  %v2086_v51 = vld [vmem:[#allocation2 + $0x89] sm:$0xff]  ;;  %v1401_v16 = vld [vmem:[#allocation2 + $0xb7] sm:$0xff] }
 0x16e   : > { %v7090_v28 = vsel %vm8931_vm13, 65537, %v8911_v63  ;;  %vm8932_vm15 = vmpackc.low %vm6994_vm10, %vm6994_vm10  ;;  %vm7103_vm7 = vcmp.ne.s16.totalorder %v8933_v41, 0  ;;  %v786_v35 = vmul.f32 %v5584_v0, %v6548_v20  ;;  %vm7110_vm6 = vcmp.lt.s32.totalorder %v1096_v19, 15  ;;  %v5585_v41 = vpop.f32.mrf.mxu0 }
 0x16f   : > { %v7098_v12 = vsel %vm8932_vm15, 65537, %v8911_v63  ;;  %v8935_v39 = vsel %vm7103_vm7, 4294967295, %v8934_v39  ;;  %v2109_v33 = vpack.c.bf16 %v2085_v30, %v2084_v49  ;;  %vm7114_vm10 = vcmp.lt.s32.totalorder %v1110_v58, 15  ;;  %vm8940_vm13 = vmmov %vm8919_vm0  ;;  %v1599_v30 = vld [vmem:[#allocation2 + $0xc8] sm:$0xff]  ;;  %v1600_v58 = vld [vmem:[#allocation2 + $0xd0] sm:$0xff] }
 0x170   : > { %893 = vst.msk [vmem:[#allocation2 + $0xf0] sm:$0xff] %vm8940_vm13, %v854_v57  ;;  %v852_v19 = vmax.f32 %v820_v21, 0.0  ;;  %v825_v42 = vadd.f32 %v6555_v24, %v786_v35  ;;  %v784_v49 = vmul.f32 %v6548_v20, %v734_v23  ;;  %v2110_v0 = vpack.c.bf16 %v2087_v15, %v2086_v51  ;;  %v1598_v48 = vld [vmem:[#allocation2 + $0xc0] sm:$0xff]  ;;  %vm8944_vm13 = vmmov %vm8919_vm0 }
 0x171   : > { %v5172_v40 = vcombine.low %v6470_v37, %v7090_v28  ;;  %v926_v61 = vadd.s32 216, %v6462_v31  ;;  %v8941_v57 = vcombine.low %v6518_v4, %v6470_v37  ;;  %v787_v28 = vmul.f32 %v5585_v41, %v6548_v20  ;;  %v1402_v14 = vld [vmem:[#allocation2 + $0xbf] sm:$0xff]  ;;  %v1403_v29 = vld [vmem:[#allocation2 + $0xc7] sm:$0xff]  ;;  %v1404_v4 = vld [vmem:[#allocation2 + $0xcf] sm:$0xff] }
 0x172   : > { %891 = vst.msk [vmem:[#allocation2 + $0xe0] sm:$0xff] %vm8919_vm0, %v852_v19  ;;  %v857_v35 = vmax.f32 %v825_v42, 0.0  ;;  %v823_v23 = vadd.f32 %v6555_v24, %v784_v49  ;;  %v7143_v51 = vpack.c.bf16 %v1598_v48, %v1597_v5  ;;  %v2253_v36 = vsel %vm7031_vm2, %v2109_v33, 0  ;;  %vm8945_vm9 = vmmov %vm8919_vm0  ;;  %v2088_v33 = vld [vmem:[#allocation2 + $0x99] sm:$0xff]  ;;  %v2090_v41 = vld [vmem:[#allocation2 + $0xa9] sm:$0xff] }
 0x173   : > { %vm7133_vm15 = vcmp.ne.s16.totalorder %v8941_v57, 0  ;;  %v737_v57 = vpop.f32.mrf.mxu0  ;;  %v7147_v46 = vpack.c.bf16 %v1600_v58, %v1599_v30  ;;  %v7149_v1 = vpack.c.bf16 %v1402_v14, %v1401_v16  ;;  %v7151_v15 = vpack.c.bf16 %v1404_v4, %v1403_v29  ;;  %5675 = vmatmul.mubr.msk.bf16.gmra.mxu0 %vm8945_vm9, %v2253_v36  ;;  %v2089_v16 = vld [vmem:[#allocation2 + $0xa1] sm:$0xff]  ;;  %vm8946_vm2 = vmmov %vm8919_vm0  ;;  %v2091_v29 = vld [vmem:[#allocation2 + $0xb1] sm:$0xff] }
 0x174   : > { %896 = vst.msk [vmem:[#allocation2 + $0x108] sm:$0xff] %vm8944_vm13, %v857_v35  ;;  %v855_v19 = vmax.f32 %v823_v23, 0.0  ;;  %v826_v42 = vadd.f32 %v6555_v24, %v787_v28  ;;  %v785_v48 = vmul.f32 %v6548_v20, %v737_v57  ;;  %5611 = vmatmul.mubr.msk.bf16.gmra.mxu1 %vm8919_vm0, %v7143_v51  ;;  %v2254_v5 = vsel %vm7080_vm14, %v2110_v0, 0  ;;  %vm8947_vm7 = vmmov %vm8919_vm0  ;;  %v1603_v28 = vld [vmem:[#allocation2 + $0xe8] sm:$0xff] }
 0x175   : > { %5614 = vmatprep.mubr.msk.bf16.mxu1 %vm8946_vm2, %v7147_v46  ;;  %5678 = vmatprep.mubr.msk.bf16.mxu0 %vm8947_vm7, %v2254_v5  ;;  %v5173_v14 = vcombine.low %v6470_v37, %v7098_v12  ;;  %vm1427_vm13 = vmpackc.low %vm7057_vm1, %vm7057_vm1  ;;  %v928_v36 = vadd.s32 232, %v6462_v31  ;;  %v1124_v30 = vand.u32 15, %v926_v61  ;;  %v8949_v58 = vcombine.low %v6511_v62, %v6470_v37  ;;  %v2093_v62 = vld [vmem:[#allocation2 + $0xc1] sm:$0xff]  ;;  %v9084_v12 = vld [vmem:[#allocation17_spill] sm:$0xff] }
 0x176   : > { %vm8948_vm9 = vmmov %vm8919_vm0  ;;  %v858_v20 = vmax.f32 %v826_v42, 0.0  ;;  %v824_v49 = vadd.f32 %v6555_v24, %v785_v48  ;;  %v2111_v0 = vpack.c.bf16 %v2089_v16, %v2088_v33  ;;  %v2579_v24 = vsel %vm7133_vm15, %v7151_v15, 0  ;;  %v1601_v42 = vld [vmem:[#allocation2 + $0xd8] sm:$0xff] }
 0x177   : > { %894 = vst.msk [vmem:[#allocation2 + $0xf8] sm:$0xff] %vm8948_vm9, %v855_v19  ;;  %vm7178_vm7 = vcmp.ne.s16.totalorder %v8949_v58, 0  ;;  %vm8952_vm9 = vmmov %vm8919_vm0  ;;  %vm7195_vm2 = vcmp.ne.s16.totalorder %v5172_v40, 0  ;;  %v8953_v23 = vmov 0  ;;  %v1604_v4 = vld [vmem:[#allocation2 + $0xf0] sm:$0xff]  ;;  %v2112_v57 = vpack.c.bf16 %v2091_v29, %v2090_v41 }
 0x178   : > { %897 = vst.msk [vmem:[#allocation2 + $0x110] sm:$0xff] %vm8952_vm9, %v858_v20  ;;  %v856_v35 = vmax.f32 %v824_v49, 0.0  ;;  %v8954_v23 = vsel %vm7195_vm2, 4294967295, %v8953_v23  ;;  %v1459_v19 = vsel %vm1427_vm13, 65537, %v8911_v63  ;;  %vm7205_vm0 = vcmp.ne.s16.totalorder %v5173_v14, 0  ;;  %vm8957_vm9 = vmpackc.low %vm7110_vm6, %vm7110_vm6  ;;  %v1405_v16 = vld [vmem:[#allocation2 + $0xd7] sm:$0xff] }
 0x179   : > { %v1602_v48 = vld [vmem:[#allocation2 + $0xe0] sm:$0xff]  ;;  %v8955_v5 = vmov 0  ;;  %v2173_v40 = vsel %vm8957_vm9, 65537, %v8911_v63  ;;  %v1138_v33 = vand.u32 15, %v928_v36  ;;  %vm8958_vm14 = vcmask 261120   ;;  %vm8959_vm1 = vmpackc.low %vm7114_vm10, %vm7114_vm10  ;;  %v1408_v58 = vld [vmem:[#allocation2 + $0xef] sm:$0xff] }
 0x17a   : > { %v8956_v5 = vsel %vm7205_vm0, 4294967295, %v8955_v5  ;;  %895 = vst.msk [vmem:[#allocation2 + $0x100] sm:$0xff] %vm8958_vm14, %v856_v35  ;;  %v7216_v60 = vpack.c.bf16 %v1602_v48, %v1601_v42  ;;  %v2175_v29 = vsel %vm8959_vm1, 65537, %v8911_v63  ;;  %vm7224_vm13 = vcmp.lt.s32.totalorder %v1124_v30, 15  ;;  %v1406_v45 = vld [vmem:[#allocation2 + $0xdf] sm:$0xff]  ;;  %v1407_v49 = vld [vmem:[#allocation2 + $0xe7] sm:$0xff]  ;;  %vm8965_vm10 = vmmov %vm8958_vm14 }
 0x17b   : > { %v8962_v36 = vcombine.low %v6531_v13, %v6470_v37  ;;  %v2255_v41 = vsel %vm7195_vm2, %v2111_v0, 0  ;;  %v7237_v54 = vpack.c.bf16 %v1604_v4, %v1603_v28  ;;  %v1379_v35 = vld [vmem:[#allocation2 + $0x7] sm:$0xff]  ;;  %v1380_v30 = vld [vmem:[#allocation2 + $0xf] sm:$0xff]  ;;  %v7239_v42 = vpack.c.bf16 %v1406_v45, %v1405_v16  ;;  %vm8966_vm9 = vmmov %vm8965_vm10 }
 0x17c   : > { %v7241_v48 = vpack.c.bf16 %v1408_v58, %v1407_v49  ;;  %5615 = vmatmul.mubr.msk.bf16.gmra.mxu1 %vm8958_vm14, %v7216_v60  ;;  %5679 = vmatmul.mubr.msk.bf16.gmra.mxu0 %vm8965_vm10, %v2255_v41  ;;  %v2256_v13 = vsel %vm7205_vm0, %v2112_v57, 0  ;;  %v5174_v0 = vcombine.low %v6470_v37, %v2173_v40  ;;  %v5111_v28 = vcombine.low %v1459_v19, %v6470_v37  ;;  %vm8967_vm1 = vmmov %vm8966_vm9  ;;  %v2095_v4 = vld [vmem:[#allocation2 + $0xd1] sm:$0xff]  ;;  %v2094_v58 = vld [vmem:[#allocation2 + $0xc9] sm:$0xff] }
 0x17d   : > { %vm7231_vm6 = vcmp.ne.s16.totalorder %v8962_v36, 0  ;;  %v2092_v36 = vld [vmem:[#allocation2 + $0xb9] sm:$0xff]  ;;  %5618 = vmatprep.mubr.msk.bf16.mxu1 %vm8966_vm9, %v7237_v54  ;;  %5682 = vmatprep.mubr.msk.bf16.mxu0 %vm8967_vm1, %v2256_v13  ;;  %v5175_v16 = vcombine.low %v6470_v37, %v2175_v29  ;;  %vm7254_vm14 = vcmp.lt.s32.totalorder %v1138_v33, 15  ;;  %v930_v57 = vadd.s32 248, %v6462_v31  ;;  %vm2145_vm9 = vmpackc.low %vm7224_vm13, %vm7224_vm13 }
 0x17e   : > { %v8970_v49 = vcombine.low %v6523_v6, %v6470_v37  ;;  %v8971_v40 = vmov 0  ;;  %v1411_v19 = vpack.c.bf16 %v1380_v30, %v1379_v35  ;;  %v2113_v29 = vpack.c.bf16 %v2093_v62, %v2092_v36  ;;  %vm2147_vm13 = vmpackc.low %vm7254_vm14, %vm7254_vm14  ;;  %v1605_v35 = vld [vmem:[#allocation2 + $0xf8] sm:$0xff] }
 0x17f   : > { %vm7278_vm1 = vcmp.ne.s16.totalorder %v5174_v0, 0  ;;  %v8973_v41 = vmov 0  ;;  %v2114_v14 = vpack.c.bf16 %v2095_v4, %v2094_v58  ;;  %vm7285_vm0 = vcmp.ne.s16.totalorder %v5175_v16, 0  ;;  %v1409_v45 = vld [vmem:[#allocation2 + $0xf7] sm:$0xff] }
 0x180   : > { %vm7262_vm10 = vcmp.ne.s16.totalorder %v8970_v49, 0  ;;  %v8974_v41 = vsel %vm7278_vm1, 4294967295, %v8973_v41  ;;  %v8975_v13 = vmov 0  ;;  %vm7289_vm2 = vcmp.ne.s16.totalorder %v5111_v28, 0 }
 0x181   : > { %v8972_v40 = vsel %vm7262_vm10, 4294967295, %v8971_v40  ;;  %v1606_v30 = vld [vmem:[#allocation2 + $0x100] sm:$0xff]  ;;  %v8976_v13 = vsel %vm7285_vm0, 4294967295, %v8975_v13  ;;  %v2177_v62 = vsel %vm2145_vm9, 65537, %v8911_v63  ;;  %v1152_v36 = vand.u32 15, %v930_v57 }
 0x182   : > { %v7294_v0 = vpack.c.bf16 %v1606_v30, %v1605_v35  ;;  %v1555_v4 = vsel %vm7289_vm2, %v1411_v19, 0  ;;  %v1410_v58 = vld [vmem:[#allocation2 + $0xff] sm:$0xff]  ;;  %v2257_v16 = vsel %vm7278_vm1, %v2113_v29, 0  ;;  %v2179_v6 = vsel %vm2147_vm13, 65537, %v8911_v63 }
 0x183   : > { %v7301_v31 = vpack.c.bf16 %v1410_v58, %v1409_v45  ;;  %vm8979_vm14 = vcmask 261120   ;;  %v2258_v28 = vsel %vm7285_vm0, %v2114_v14, 0  ;;  %v1382_v57 = vld [vmem:[#allocation2 + $0x1f] sm:$0xff]  ;;  %v5176_v30 = vcombine.low %v6470_v37, %v2177_v62  ;;  %v1381_v58 = vld [vmem:[#allocation2 + $0x17] sm:$0xff] }
 0x184   : > { %5619 = vmatmul.mubr.msk.bf16.gmra.mxu1 %vm8979_vm14, %v7294_v0  ;;  %vm8980_vm10 = vmmov %vm8979_vm14  ;;  %v2096_v35 = vld [vmem:[#allocation2 + $0xd9] sm:$0xff]  ;;  %v2097_v19 = vld [vmem:[#allocation2 + $0xe1] sm:$0xff]  ;;  %vm7311_vm13 = vcmp.lt.s32.totalorder %v1152_v36, 15  ;;  %v5177_v14 = vcombine.low %v6470_v37, %v2179_v6  ;;  %v7319_v61 = vpack.c.bf16 %v1382_v57, %v1381_v58  ;;  %v8985_v62 = vmov 0 }
 0x185   : > { %5683 = vmatmul.mubr.msk.bf16.gmra.mxu0 %vm8980_vm10, %v2257_v16  ;;  %vm8981_vm9 = vmmov %vm8980_vm10  ;;  %v2099_v16 = vld [vmem:[#allocation2 + $0xf1] sm:$0xff]  ;;  %v2115_v33 = vpack.c.bf16 %v2097_v19, %v2096_v35  ;;  %vm7321_vm10 = vcmp.ne.s16.totalorder %v5176_v30, 0  ;;  %v6047_v45 = vld [vmem:[#allocation6 + $0x30] sm:$0xff]   ;;  %v1557_v19 = vsel %vm6756_vm3, %v6694_v8, 0  ;;  %v9049_v49 = vsel %vm6756_vm3, %v6798_v3, 0 }
 0x186   : > { %5686 = vmatprep.mubr.msk.bf16.mxu0 %vm8981_vm9, %v2258_v28  ;;  %vm8982_vm1 = vmmov %vm8981_vm9  ;;  %v8986_v62 = vsel %vm7321_vm10, 4294967295, %v8985_v62  ;;  %vm7328_vm14 = vcmp.ne.s16.totalorder %v5177_v14, 0  ;;  %v8987_v28 = vmov 0  ;;  %v1556_v6 = vsel %vm6703_vm12, %v7319_v61, 0  ;;  %v2100_v30 = vld [vmem:[#allocation2 + $0xf9] sm:$0xff]  ;;  %v2101_v29 = vld [vmem:[#allocation2 + $0x101] sm:$0xff] }
 0x187   : > { %5626 = vmatprep.mubr.msk.bf16.mxu1 %vm8982_vm1, %v1555_v4  ;;  %v2098_v4 = vld [vmem:[#allocation2 + $0xe9] sm:$0xff]  ;;  %vm2149_vm1 = vmpackc.low %vm7311_vm13, %vm7311_vm13  ;;  %v8988_v28 = vsel %vm7328_vm14, 4294967295, %v8987_v28  ;;  %v2259_v57 = vsel %vm7321_vm10, %v2115_v33, 0  ;;  %v8992_v14 = vmov 0  ;;  %v2578_v26 = vsel %vm7178_vm7, %v7149_v1, 0 }
 0x188   : > { %v2116_v36 = vpack.c.bf16 %v2099_v16, %v2098_v4  ;;  %v2181_v35 = vsel %vm2149_vm1, 65537, %v8911_v63  ;;  %vm8989_vm0 = vmmov %vm8981_vm9  ;;  %v6048_v33 = vld [vmem:[#allocation6 + $0x58] sm:$0xff]   ;;  %v2117_v16 = vpack.c.bf16 %v2101_v29, %v2100_v30  ;;  %v9014_v29 = vld [vmem:[#allocation25_spill] sm:$0xff] }
 0x189   : > { %vm8990_vm13 = vmmov %vm8989_vm0  ;;  %v5178_v63 = vcombine.low %v6470_v37, %v2181_v35  ;;  %v1562_v35 = vsel %vm6922_vm4, %v6972_v53, 0  ;;  %v9012_v30 = vld [vmem:[#allocation24_spill] sm:$0xff] }
 0x18a   : > { %v2260_v58 = vsel %vm7328_vm14, %v2116_v36, 0  ;;  %vm8991_vm10 = vmmov %vm8989_vm0  ;;  %vm8998_vm14 = vnez %v8885_v10 }
 0x18b   : > { %vm8994_vm1 = vmmov %vm8981_vm9  ;;  %v1560_v36 = vsel %vm8998_vm14, %v6880_v59, 0 }
 0x18c   : > { %5627 = vmatmul.mubr.msk.bf16.vlgmr.msra.gmra.mxu1 %vm8981_vm9, %v1556_v6  ;;  %vm8996_vm9 = vmmov %vm8994_vm1  ;;  %v6050_v6 = vld [vmem:[#allocation6 + $0x60] sm:$0xff]  }
 0x18d   : > { %5687 = vmatmul.mubr.msk.bf16.gmra.mxu0 %vm8989_vm0, %v2259_v57  ;;  %5695 = vmatpush3.bf16.msra.mxu1 %v6917_v17  ;;  %vm7349_vm0 = vcmp.ne.s16.totalorder %v5178_v63, 0  ;;  %v1558_v17 = vsel %vm6772_vm5, %v6796_v22, 0  ;;  %vm8999_vm5 = vmmov %vm8994_vm1  ;;  %v9018_v63 = vld [vmem:[#allocation27_spill] sm:$0xff] }
 0x18e   : > { %5630 = vmatprep.mubr.msk.bf16.mxu1 %vm8990_vm13, %v1557_v19  ;;  %5690 = vmatprep.mubr.msk.bf16.mxu0 %vm8991_vm10, %v2260_v58  ;;  %v8993_v14 = vsel %vm7349_vm0, 4294967295, %v8992_v14  ;;  %v2261_v4 = vsel %vm7349_vm0, %v2117_v16, 0  ;;  %vm8995_vm10 = vmmov %vm8994_vm1  ;;  %v9009_v19 = vld [vmem:[#allocation22_spill] sm:$0xff]  ;;  %v9020_v16 = vld [vmem:[#allocation15_spill] sm:$0xff] }
 0x18f   : > { %5696 = vmatprep.subr.bf16.mxu1 %v6047_v45  ;;  %vm8997_vm13 = vmmov %vm8994_vm1 }
 0x190   : > { %vm9001_vm0 = vmmov %vm8994_vm1 }
 0x191   : > { %5697 = vmatpush3.bf16.msra.mxu1 %v6047_v45  ;;  %v1559_v45 = vsel %vm6851_vm11, %v6798_v3, 0  ;;  %vm9008_vm4 = vmmov %vm8994_vm1 }
 0x192   : > { %5766 = vmatprep.subr.bf16.mxu1 %v6048_v33 }
 0x194   : > { %5631 = vmatmul.mubr.msk.bf16.gmra.mxu1 %vm8994_vm1, %v1558_v17  ;;  %v9021_v17 = vcombine.low %v9020_v16, %v6470_v37 }
 0x195   : > { %5691 = vmatmul.mubr.msk.bf16.gmra.mxu0 %vm8995_vm10, %v2261_v4  ;;  %5634 = vmatprep.mubr.msk.bf16.mxu1 %vm8996_vm9, %v1559_v45  ;;  %vm9000_vm10 = vnez %v8910_v9  ;;  %vm9002_vm9 = vmmov %vm9001_vm0  ;;  %v1568_v45 = vsel %vm7231_vm6, %v7239_v42, 0 }
 0x196   : > { %5734 = vmatprep.mubr.msk.bf16.mxu0 %vm8997_vm13, %v6682_v50  ;;  %v1561_v57 = vsel %vm9000_vm10, %v6882_v43, 0  ;;  %v6053_v50 = vld [vmem:[#allocation6 + $0x88] sm:$0xff]   ;;  %vm9004_vm13 = vmmov %vm9001_vm0 }
 0x19c   : > { %5635 = vmatmul.mubr.msk.bf16.gmra.mxu1 %vm8999_vm5, %v1560_v36  ;;  %vm9003_vm5 = vmmov %vm9001_vm0  ;;  %v9025_v36 = vld [vmem:[#allocation28_spill] sm:$0xff] }
 0x19d   : > { %5735 = vmatmul.mubr.msk.bf16.vlgmr.msra.gmra.mxu0 %vm8994_vm1, %v6684_v2  ;;  %5638 = vmatprep.mubr.msk.bf16.mxu1 %vm9001_vm0, %v1561_v57  ;;  %vm9005_vm0 = vnez %v8935_v39  ;;  %v9028_v57 = vld [vmem:[#allocation16_spill] sm:$0xff] }
 0x19e   : > { %5738 = vmatprep.mubr.msk.bf16.mxu0 %vm9002_vm9, %v6781_v47  ;;  %5803 = vmatpush3.bf16.msra.mxu0 %v6947_v55  ;;  %v1563_v2 = vsel %vm9005_vm0, %v6974_v52, 0  ;;  %vm9006_vm9 = vmmov %vm8994_vm1  ;;  %v9007_v47 = vld [vmem:[#allocation29_spill] sm:$0xff] }
 0x19f   : > { %5804 = vmatprep.subr.bf16.mxu0 %v6050_v6  ;;  %v1564_v55 = vsel %vm7043_vm8, %v9007_v47, 0  ;;  %vm9017_vm8 = vmmov %vm8994_vm1  ;;  %v2576_v11 = vsel %vm9005_vm0, %v9007_v47, 0 }
 0x1a2   : > { %5805 = vmatpush3.bf16.msra.mxu0 %v6050_v6 }
 0x1a3   : > { %5874 = vmatprep.subr.bf16.mxu0 %v6053_v50 }
 0x1a4   : > { %5639 = vmatmul.mubr.msk.bf16.gmra.mxu1 %vm9003_vm5, %v1562_v35  ;;  %vm9010_vm5 = vmmov %vm8994_vm1  ;;  %v9029_v35 = vcombine.low %v9028_v57, %v6470_v37  ;;  %v6051_v37 = vld [vmem:[#allocation6 + $0x50] sm:$0xff]  }
 0x1a5   : > { %5739 = vmatmul.mubr.msk.bf16.gmra.mxu0 %vm9004_vm13, %v6744_v27  ;;  %5642 = vmatprep.mubr.msk.bf16.mxu1 %vm8994_vm1, %v1563_v2  ;;  %v1565_v27 = vsel %vm7178_vm7, %v7067_v32, 0  ;;  %vm9011_vm13 = vmmov %vm8994_vm1  ;;  %v9030_v2 = vmov 0  ;;  %v3153_v57 = vld [vmem:[#allocation2 + $0x41] sm:$0xff] }
 0x1a6   : > { %5742 = vmatprep.mubr.msk.bf16.mxu0 %vm9006_vm9, %v6874_v34  ;;  %v1566_v34 = vsel %vm7133_vm15, %v7149_v1, 0  ;;  %vm9013_vm9 = vmmov %vm8994_vm1 }
 0x1ac   : > { %5643 = vmatmul.mubr.msk.bf16.gmra.mxu1 %vm9008_vm4, %v1564_v55  ;;  %vm9015_vm4 = vmmov %vm8994_vm1 }
 0x1ad   : > { %5743 = vmatmul.mubr.msk.bf16.gmra.mxu0 %vm9010_vm5, %v9009_v19  ;;  %5646 = vmatprep.mubr.msk.bf16.mxu1 %vm9011_vm13, %v1565_v27  ;;  %vm9016_vm5 = vnez %v8972_v40  ;;  %vm9019_vm13 = vmmov %vm8994_vm1  ;;  %v9035_v19 = vsel %vm6703_vm12, %v6694_v8, 0  ;;  %v2872_v27 = vld [vmem:[#allocation2 + $0x108] sm:$0xff] }
 0x1ae   : > { %5746 = vmatprep.mubr.msk.bf16.mxu0 %vm8994_vm1, %v9012_v30  ;;  %v1567_v58 = vsel %vm9016_vm5, %v7151_v15, 0  ;;  %vm7418_vm1 = vcmp.ne.s16.totalorder %v9021_v17, 0  ;;  %vm7437_vm5 = vcmp.ne.s16.totalorder %v9029_v35, 0  ;;  %v9082_v17 = vsel %vm7133_vm15, %v7239_v42, 0  ;;  %v3150_v35 = vld [vmem:[#allocation2 + $0x29] sm:$0xff] }
 0x1af   : > { %v1569_v6 = vsel %vm7418_vm1, %v7241_v48, 0  ;;  %v9031_v2 = vsel %vm7437_vm5, 4294967295, %v9030_v2  ;;  %v1570_v55 = vsel %vm7437_vm5, %v7301_v31, 0  ;;  %vm9036_vm5 = vmmov %vm9015_vm4  ;;  %v2582_v39 = vsel %vm7418_vm1, %v7301_v31, 0 }
 0x1b4   : > { %5647 = vmatmul.mubr.msk.bf16.gmra.mxu1 %vm9013_vm9, %v1566_v34  ;;  %vm9024_vm9 = vmmov %vm9015_vm4  ;;  %v6054_v34 = vld [vmem:[#allocation6 + $0x80] sm:$0xff]  }
 0x1b5   : > { %5747 = vmatmul.mubr.msk.bf16.gmra.mxu0 %vm9015_vm4, %v9014_v29  ;;  %5650 = vmatprep.mubr.msk.bf16.mxu1 %vm9017_vm8, %v1567_v58  ;;  %vm9026_vm8 = vmmov %vm9015_vm4  ;;  %v9044_v29 = vsel %vm8998_vm14, %v6882_v43, 0  ;;  %v9046_v58 = vsel %vm6703_vm12, %v6796_v22, 0 }
 0x1b6   : > { %5750 = vmatprep.mubr.msk.bf16.mxu0 %vm9019_vm13, %v9018_v63  ;;  %vm9027_vm13 = vmmov %vm9015_vm4 }
 0x1bc   : > { %5651 = vmatmul.mubr.msk.bf16.gmra.mxu1 %vm9024_vm9, %v1568_v45  ;;  %vm9032_vm9 = vmmov %vm9015_vm4  ;;  %v3151_v45 = vld [vmem:[#allocation2 + $0x31] sm:$0xff] }
 0x1bd   : > { %5751 = vmatmul.mubr.msk.bf16.gmra.mxu0 %vm9015_vm4, %v9025_v36  ;;  %5654 = vmatprep.mubr.msk.bf16.mxu1 %vm9026_vm8, %v1569_v6  ;;  %vm9033_vm8 = vmmov %vm9015_vm4  ;;  %v3152_v6 = vld [vmem:[#allocation2 + $0x39] sm:$0xff]  ;;  %v3181_v21 = vpack.c.bf16 %v3151_v45, %v3150_v35 }
 0x1be   : > { %5754 = vmatprep.mubr.msk.bf16.mxu0 %vm9027_vm13, %v7143_v51  ;;  %v2568_v51 = vsel %vm7289_vm2, %v7319_v61, 0  ;;  %vm9034_vm13 = vmmov %vm9015_vm4  ;;  %v7466_v61 = vld [vmem:[#allocation6 + $0x78] sm:$0xff]  }
 0x1c4   : > { %5655 = vmatmul.mubr.msk.bf16.gmra.mxu1 %vm9032_vm9, %v1570_v55  ;;  %vm9037_vm9 = vmmov %vm9015_vm4  ;;  %v3182_v55 = vpack.c.bf16 %v3153_v57, %v3152_v6 }
 0x1c5   : > { %5755 = vmatmul.mubr.msk.bf16.gmra.mxu0 %vm9015_vm4, %v7147_v46  ;;  %5698 = vmatprep.mubr.msk.bf16.mxu1 %vm9033_vm8, %v2568_v51  ;;  %v2570_v46 = vsel %vm6756_vm3, %v6796_v22, 0  ;;  %vm9038_vm8 = vmmov %vm9015_vm4  ;;  %v9089_v51 = vld [vmem:[#allocation18_spill] sm:$0xff] }
 0x1c6   : > { %5758 = vmatprep.mubr.msk.bf16.mxu0 %vm9034_vm13, %v7216_v60  ;;  %v2873_v60 = vld [vmem:[#allocation2 + $0x110] sm:$0xff]  ;;  %vm9041_vm13 = vmmov %vm9015_vm4  ;;  %vm9090_vm15 = vnez %v9089_v51 }
 0x1c7   : > { %v2889_v30 = vpack.c.bf16 %v2873_v60, %v2872_v27  ;;  %v3155_v60 = vld [vmem:[#allocation2 + $0x51] sm:$0xff] }
 0x1c8   : > { %v3500_v27 = vld [vmem:[#allocation2 + $0x117] sm:$0xff] }
 0x1cc   : > { %5699 = vmatmul.mubr.msk.bf16.vlgmr.msra.gmra.mxu1 %vm9036_vm5, %v9035_v19  ;;  %vm9039_vm5 = vnez %v8873_v56 }
 0x1cd   : > { %5759 = vmatmul.mubr.msk.bf16.gmra.mxu0 %vm9037_vm9, %v7237_v54  ;;  %5767 = vmatpush3.bf16.msra.mxu1 %v6048_v33  ;;  %v9040_v54 = vsel %vm9039_vm5, %v6798_v3, 0  ;;  %vm9042_vm9 = vmmov %vm9015_vm4  ;;  %v3518_v33 = vsel %vm7289_vm2, %v6694_v8, 0  ;;  %v2574_v8 = vsel %vm9000_vm10, %v6972_v53, 0  ;;  %v9054_v22 = vsel %vm9039_vm5, %v6880_v59, 0 }
 0x1ce   : > { %5702 = vmatprep.mubr.msk.bf16.mxu1 %vm9015_vm4, %v2570_v46  ;;  %5762 = vmatprep.mubr.msk.bf16.mxu0 %vm9038_vm8, %v7294_v0  ;;  %v2572_v0 = vsel %vm6851_vm11, %v6880_v59, 0  ;;  %vm9043_vm8 = vmmov %vm9015_vm4  ;;  %v9057_v3 = vsel %vm6851_vm11, %v6882_v43, 0  ;;  %v9062_v59 = vsel %vm8998_vm14, %v6972_v53, 0  ;;  %v9065_v43 = vsel %vm9000_vm10, %v6974_v52, 0 }
 0x1cf   : > { %5768 = vmatprep.subr.bf16.mxu1 %v6051_v37  ;;  %vm9048_vm2 = vmmov %vm9015_vm4 }
 0x1d0   : > { %vm9053_vm12 = vmmov %vm9048_vm2 }
 0x1d1   : > { %5769 = vmatpush3.bf16.msra.mxu1 %v6051_v37  ;;  %vm9056_vm3 = vmmov %vm9048_vm2  ;;  %v3197_v37 = vsel %vm9090_vm15, %v3181_v21, 0 }
 0x1d2   : > { %5838 = vmatprep.subr.bf16.mxu1 %v7466_v61  ;;  %vm9063_vm5 = vmmov %vm9056_vm3 }
 0x1d3   : > { %vm9066_vm11 = vmmov %vm9056_vm3 }
 0x1d4   : > { %5703 = vmatmul.mubr.msk.bf16.gmra.mxu1 %vm9041_vm13, %v9040_v54  ;;  %vm9045_vm13 = vmmov %vm9015_vm4 }
 0x1d5   : > { %5763 = vmatmul.mubr.msk.bf16.gmra.mxu0 %vm9042_vm9, %v2889_v30  ;;  %5706 = vmatprep.mubr.msk.bf16.mxu1 %vm9015_vm4, %v2572_v0  ;;  %vm9047_vm9 = vmmov %vm9015_vm4  ;;  %v3501_v30 = vld [vmem:[#allocation2 + $0x11f] sm:$0xff] }
 0x1d6   : > { %5806 = vmatprep.mubr.msk.bf16.mxu0 %vm9043_vm8, %v3518_v33  ;;  %vm9050_vm4 = vmmov %vm9048_vm2  ;;  %vm9051_vm8 = vnez %v8893_v38  ;;  %v9074_v38 = vsel %vm7231_vm6, %v7241_v48, 0  ;;  %v3156_v0 = vld [vmem:[#allocation2 + $0x59] sm:$0xff]  ;;  %v3157_v33 = vld [vmem:[#allocation2 + $0x61] sm:$0xff] }
 0x1d7   : > { %v9052_v25 = vsel %vm9051_vm8, %v6974_v52, 0  ;;  %v9068_v10 = vsel %vm9051_vm8, %v9007_v47, 0  ;;  %vm9069_vm14 = vmmov %vm9056_vm3  ;;  %v9072_v52 = vsel %vm9005_vm0, %v7067_v32, 0  ;;  %v3149_v47 = vld [vmem:[#allocation2 + $0x21] sm:$0xff] }
 0x1dc   : > { %5707 = vmatmul.mubr.msk.bf16.gmra.mxu1 %vm9045_vm13, %v9044_v29  ;;  %vm9055_vm13 = vmmov %vm9048_vm2  ;;  %v3517_v29 = vpack.c.bf16 %v3501_v30, %v3500_v27  ;;  %v3167_v27 = vld [vmem:[#allocation2 + $0xb1] sm:$0xff]  ;;  %v3168_v30 = vld [vmem:[#allocation2 + $0xb9] sm:$0xff] }
 0x1dd   : > { %5807 = vmatmul.mubr.msk.bf16.vlgmr.msra.gmra.mxu0 %vm9047_vm9, %v9046_v58  ;;  %5710 = vmatprep.mubr.msk.bf16.mxu1 %vm9048_vm2, %v2574_v8  ;;  %vm9058_vm9 = vmmov %vm9048_vm2  ;;  %vm9059_vm2 = vnez %v8918_v44  ;;  %v2551_v44 = vld [vmem:[#allocation2 + $0x10f] sm:$0xff]  ;;  %v3184_v8 = vpack.c.bf16 %v3157_v33, %v3156_v0 }
 0x1de   : > { %5810 = vmatprep.mubr.msk.bf16.mxu0 %vm9050_vm4, %v9049_v49  ;;  %5875 = vmatpush3.bf16.msra.mxu0 %v6053_v50  ;;  %v9060_v56 = vsel %vm9059_vm2, %v7067_v32, 0  ;;  %vm9061_vm4 = vmmov %vm9056_vm3  ;;  %v9075_v9 = vsel %vm9059_vm2, %v7149_v1, 0  ;;  %v9078_v32 = vsel %vm7178_vm7, %v7151_v15, 0  ;;  %v3148_v50 = vld [vmem:[#allocation2 + $0x19] sm:$0xff]  ;;  %vm9080_vm2 = vnez %v9031_v2  ;;  %v9098_v49 = vld [vmem:[#allocation20_spill] sm:$0xff] }
 0x1df   : > { %5876 = vmatprep.subr.bf16.mxu0 %v6054_v34  ;;  %vm9073_vm10 = vmmov %vm9061_vm4  ;;  %v3180_v1 = vpack.c.bf16 %v3149_v47, %v3148_v50  ;;  %vm9085_vm7 = vnez %v9084_v12  ;;  %v3161_v2 = vld [vmem:[#allocation2 + $0x81] sm:$0xff] }
 0x1e0   : > { %vm9076_vm8 = vmmov %vm9061_vm4  ;;  %v3165_v12 = vld [vmem:[#allocation2 + $0xa1] sm:$0xff] }
 0x1e1   : > { %vm9077_vm0 = vmmov %vm9061_vm4  ;;  %v3196_v15 = vsel %vm9085_vm7, %v3180_v1, 0 }
 0x1e2   : > { %5877 = vmatpush3.bf16.msra.mxu0 %v6054_v34 }
 0x1e4   : > { %5711 = vmatmul.mubr.msk.bf16.gmra.mxu1 %vm9053_vm12, %v9052_v25  ;;  %vm9064_vm12 = vmmov %vm9056_vm3  ;;  %v3533_v25 = vsel %vm9080_vm2, %v3517_v29, 0 }
 0x1e5   : > { %5811 = vmatmul.mubr.msk.bf16.gmra.mxu0 %vm9055_vm13, %v9054_v22  ;;  %5714 = vmatprep.mubr.msk.bf16.mxu1 %vm9056_vm3, %v2576_v11  ;;  %vm9067_vm13 = vmmov %vm9056_vm3  ;;  %vm9070_vm3 = vnez %v8972_v40  ;;  %v9092_v40 = vsel %vm7231_vm6, %v7301_v31, 0  ;;  %v3154_v31 = vld [vmem:[#allocation2 + $0x49] sm:$0xff]  ;;  %vm9099_vm6 = vnez %v9098_v49 }
 0x1e6   : > { %5814 = vmatprep.mubr.msk.bf16.mxu0 %vm9058_vm9, %v9057_v3  ;;  %v2580_v53 = vsel %vm9070_vm3, %v7239_v42, 0  ;;  %vm9071_vm9 = vmmov %vm9061_vm4  ;;  %v9087_v36 = vsel %vm9070_vm3, %v7241_v48, 0  ;;  %v6055_v42 = vld [vmem:[#allocation6 + $0x70] sm:$0xff]   ;;  %v3183_v34 = vpack.c.bf16 %v3155_v60, %v3154_v31  ;;  %v9101_v11 = vld [vmem:[#allocation21_spill] sm:$0xff] }
 0x1e7   : > { %vm9093_vm3 = vmmov %vm9077_vm0  ;;  %v9094_v48 = vld [vmem:[#allocation19_spill] sm:$0xff]  ;;  %v3166_v31 = vld [vmem:[#allocation2 + $0xa9] sm:$0xff] }
 0x1e8   : > { %v3199_v4 = vsel %vm9099_vm6, %v3183_v34, 0 }
 0x1ec   : > { %5715 = vmatmul.mubr.msk.bf16.gmra.mxu1 %vm9061_vm4, %v9060_v56  ;;  %v4146_v56 = vsel %vm9085_vm7, %v3181_v21, 0  ;;  %vm9107_vm7 = vmmov %vm9077_vm0 }
 0x1ed   : > { %5815 = vmatmul.mubr.msk.bf16.gmra.mxu0 %vm9063_vm5, %v9062_v59  ;;  %5718 = vmatprep.mubr.msk.bf16.mxu1 %vm9064_vm12, %v2578_v26  ;;  %vm9079_vm5 = vmmov %vm9077_vm0  ;;  %v3159_v59 = vld [vmem:[#allocation2 + $0x71] sm:$0xff]  ;;  %v3160_v26 = vld [vmem:[#allocation2 + $0x79] sm:$0xff] }
 0x1ee   : > { %5818 = vmatprep.mubr.msk.bf16.mxu0 %vm9066_vm11, %v9065_v43  ;;  %vm9081_vm12 = vmmov %vm9077_vm0 }
 0x1ef   : > { %vm9083_vm11 = vmmov %vm9077_vm0 }
 0x1f4   : > { %5719 = vmatmul.mubr.msk.bf16.gmra.mxu1 %vm9067_vm13, %v2579_v24  ;;  %v2550_v24 = vld [vmem:[#allocation2 + $0x107] sm:$0xff]  ;;  %vm9086_vm13 = vmmov %vm9077_vm0 }
 0x1f5   : > { %5819 = vmatmul.mubr.msk.bf16.gmra.mxu0 %vm9069_vm14, %v9068_v10  ;;  %5722 = vmatprep.mubr.msk.bf16.mxu1 %vm9071_vm9, %v2580_v53  ;;  %v2567_v63 = vpack.c.bf16 %v2551_v44, %v2550_v24  ;;  %vm9088_vm14 = vmmov %vm9077_vm0  ;;  %v3158_v10 = vld [vmem:[#allocation2 + $0x69] sm:$0xff]  ;;  %v9109_v44 = vld [vmem:[#allocation26_spill] sm:$0xff] }
 0x1f6   : > { %5822 = vmatprep.mubr.msk.bf16.mxu0 %vm9073_vm10, %v9072_v52  ;;  %vm9091_vm9 = vmmov %vm9077_vm0  ;;  %vm9095_vm10 = vnez %v9094_v48  ;;  %v3185_v53 = vpack.c.bf16 %v3159_v59, %v3158_v10  ;;  %v3171_v10 = vld [vmem:[#allocation2 + $0xd1] sm:$0xff] }
 0x1f7   : > { %v2583_v16 = vsel %vm9080_vm2, %v2567_v63, 0  ;;  %v3198_v46 = vsel %vm9095_vm10, %v3182_v55, 0  ;;  %v3532_v54 = vsel %vm7418_vm1, %v2567_v63, 0  ;;  %vm9100_vm1 = vmmov %vm9077_vm0  ;;  %v4148_v1 = vsel %vm9095_vm10, %v3183_v34, 0 }
 0x1f8   : > { %vm9114_vm10 = vmmov %vm9077_vm0  ;;  %v3189_v34 = vpack.c.bf16 %v3167_v27, %v3166_v31  ;;  %v3175_v27 = vld [vmem:[#allocation2 + $0xf1] sm:$0xff]  ;;  %v3174_v31 = vld [vmem:[#allocation2 + $0xe9] sm:$0xff] }
 0x1fc   : > { %5723 = vmatmul.mubr.msk.bf16.gmra.mxu1 %vm9061_vm4, %v9074_v38  ;;  %vm9096_vm4 = vmmov %vm9077_vm0  ;;  %v3186_v38 = vpack.c.bf16 %v3161_v2, %v3160_v26 }
 0x1fd   : > { %5823 = vmatmul.mubr.msk.bf16.gmra.mxu0 %vm9076_vm8, %v9075_v9  ;;  %5726 = vmatprep.mubr.msk.bf16.mxu1 %vm9077_vm0, %v2582_v39  ;;  %vm9097_vm8 = vmmov %vm9077_vm0  ;;  %v9105_v39 = vld [vmem:[#allocation23_spill] sm:$0xff] }
 0x1fe   : > { %5826 = vmatprep.mubr.msk.bf16.mxu0 %vm9079_vm5, %v9078_v32  ;;  %vm9102_vm5 = vnez %v9101_v11  ;;  %vm9106_vm2 = vnez %v9105_v39  ;;  %v4147_v32 = vsel %vm9090_vm15, %v3182_v55, 0  ;;  %vm9113_vm15 = vnez %v8915_v7  ;;  %v3176_v7 = vld [vmem:[#allocation2 + $0xf9] sm:$0xff] }
 0x1ff   : > { %v3200_v3 = vsel %vm9102_vm5, %v3184_v8, 0  ;;  %v3201_v24 = vsel %vm9106_vm2, %v3185_v53, 0  ;;  %v4150_v60 = vsel %vm9102_vm5, %v3185_v53, 0  ;;  %vm9119_vm5 = vmmov %vm9077_vm0  ;;  %v3172_v53 = vld [vmem:[#allocation2 + $0xd9] sm:$0xff] }
 0x204   : > { %5727 = vmatmul.mubr.msk.bf16.gmra.mxu1 %vm9081_vm12, %v2583_v16  ;;  %vm9103_vm12 = vmmov %vm9077_vm0  ;;  %v3163_v16 = vld [vmem:[#allocation2 + $0x91] sm:$0xff] }
 0x205   : > { %5827 = vmatmul.mubr.msk.bf16.gmra.mxu0 %vm9083_vm11, %v9082_v17  ;;  %5770 = vmatprep.mubr.msk.bf16.mxu1 %vm9086_vm13, %v3196_v15  ;;  %vm9104_vm11 = vmmov %vm9077_vm0  ;;  %v3164_v17 = vld [vmem:[#allocation2 + $0x99] sm:$0xff] }
 0x206   : > { %5830 = vmatprep.mubr.msk.bf16.mxu0 %vm9088_vm14, %v9087_v36  ;;  %vm9108_vm13 = vmmov %vm9077_vm0  ;;  %vm9110_vm14 = vnez %v9109_v44  ;;  %v3162_v36 = vld [vmem:[#allocation2 + $0x89] sm:$0xff]  ;;  %v3188_v21 = vpack.c.bf16 %v3165_v12, %v3164_v17 }
 0x207   : > { %v7596_v19 = vpop.f32.mrf.mxu0  ;;  %v3202_v63 = vsel %vm9110_vm14, %v3186_v38, 0  ;;  %v3187_v6 = vpack.c.bf16 %v3163_v16, %v3162_v36 }
 0x209   : > { %v7611_v20 = vpop.f32.mrf.mxu0  ;;  %v3203_v51 = vsel %vm9113_vm15, %v3187_v6, 0  ;;  %v4152_v2 = vsel %vm9110_vm14, %v3187_v6, 0  ;;  %v4153_v6 = vsel %vm9113_vm15, %v3188_v21, 0  ;;  %vm9125_vm14 = vmmov %vm9077_vm0  ;;  %vm9131_vm15 = vnez %v8986_v62 }
 0x20b   : > { %v7613_v58 = vpop.f32.mrf.mxu0 }
 0x20c   : > { %5771 = vmatmul.mubr.msk.bf16.vlgmr.msra.gmra.mxu1 %vm9091_vm9, %v3197_v37  ;;  %vm9111_vm9 = vmmov %vm9077_vm0  ;;  %v4149_v37 = vsel %vm9099_vm6, %v3184_v8, 0  ;;  %vm9118_vm6 = vnez %v8954_v23 }
 0x20d   : > { %5831 = vmatmul.mubr.msk.bf16.gmra.mxu0 %vm9093_vm3, %v9092_v40  ;;  %5839 = vmatpush3.bf16.msra.mxu1 %v7466_v61  ;;  %v7615_v61 = vpop.f32.mrf.mxu0  ;;  %vm9112_vm3 = vmmov %vm9077_vm0  ;;  %v3205_v11 = vsel %vm9118_vm6, %v3189_v34, 0 }
 0x20e   : > { %5774 = vmatprep.mubr.msk.bf16.mxu1 %vm9096_vm4, %v3198_v46  ;;  %5834 = vmatprep.mubr.msk.bf16.mxu0 %vm9097_vm8, %v3532_v54  ;;  %vm9115_vm4 = vmmov %vm9077_vm0  ;;  %vm9116_vm8 = vnez %v8930_v18  ;;  %v3169_v54 = vld [vmem:[#allocation2 + $0xc1] sm:$0xff] }
 0x20f   : > { %5840 = vmatprep.subr.bf16.mxu1 %v6055_v42  ;;  %v3204_v46 = vsel %vm9116_vm8, %v3188_v21, 0  ;;  %v3190_v49 = vpack.c.bf16 %v3169_v54, %v3168_v30  ;;  %v3177_v21 = vld [vmem:[#allocation2 + $0x101] sm:$0xff] }
 0x210   : > { %v7621_v22 = vpop.f32.mrf.mxu0 }
 0x211   : > { %5841 = vmatpush3.bf16.msra.mxu1 %v6055_v42 }
 0x212   : > { %v7631_v43 = vpop.f32.mrf.mxu0 }
 0x214   : > { %5775 = vmatmul.mubr.msk.bf16.gmra.mxu1 %vm9100_vm1, %v3199_v4  ;;  %v7633_v52 = vpop.f32.mrf.mxu0  ;;  %vm9117_vm1 = vmmov %vm9077_vm0 }
 0x215   : > { %5835 = vmatmul.mubr.msk.bf16.gmra.mxu0 %vm9077_vm0, %v3533_v25  ;;  %5778 = vmatprep.mubr.msk.bf16.mxu1 %vm9103_vm12, %v3200_v3  ;;  %v4151_v3 = vsel %vm9106_vm2, %v3186_v38, 0  ;;  %vm9120_vm12 = vmmov %vm9077_vm0  ;;  %v3173_v38 = vld [vmem:[#allocation2 + $0xe1] sm:$0xff]  ;;  %vm9124_vm2 = vnez %v8974_v41 }
 0x216   : > { %5878 = vmatprep.mubr.msk.bf16.mxu0 %vm9104_vm11, %v4146_v56  ;;  %v7635_v9 = vpop.f32.mrf.mxu0  ;;  %vm9121_vm11 = vnez %v8956_v5  ;;  %v3192_v17 = vpack.c.bf16 %v3173_v38, %v3172_v53  ;;  %v4155_v53 = vsel %vm9118_vm6, %v3190_v49, 0  ;;  %vm9141_vm6 = vnez %v8993_v14 }
 0x217   : > { %v3206_v26 = vsel %vm9121_vm11, %v3190_v49, 0 }
 0x218   : > { %v7641_v50 = vpop.f32.mrf.mxu1  ;;  %v7643_v47 = vpop.f32.mrf.mxu0 }
 0x21a   : > { %v7653_v15 = vpop.f32.mrf.mxu1  ;;  %v7655_v45 = vpop.f32.mrf.mxu0 }
 0x21c   : > { %5779 = vmatmul.mubr.msk.bf16.gmra.mxu1 %vm9107_vm7, %v3201_v24  ;;  %v7657_v57 = vpop.f32.mrf.mxu1  ;;  %v7659_v35 = vpop.f32.mrf.mxu0  ;;  %vm9122_vm7 = vmmov %vm9077_vm0 }
 0x21d   : > { %5879 = vmatmul.mubr.msk.bf16.vlgmr.msra.gmra.mxu0 %vm9108_vm13, %v4147_v32  ;;  %5782 = vmatprep.mubr.msk.bf16.mxu1 %vm9111_vm9, %v3202_v63  ;;  %vm9123_vm13 = vmmov %vm9077_vm0  ;;  %v3170_v32 = vld [vmem:[#allocation2 + $0xc9] sm:$0xff] }
 0x21e   : > { %5882 = vmatprep.mubr.msk.bf16.mxu0 %vm9112_vm3, %v4148_v1  ;;  %v7661_v55 = vpop.f32.mrf.mxu1  ;;  %v7663_v42 = vpop.f32.mrf.mxu0  ;;  %v3191_v63 = vpack.c.bf16 %v3171_v10, %v3170_v32  ;;  %vm9126_vm9 = vmmov %vm9077_vm0  ;;  %vm9127_vm3 = vnez %v8976_v13 }
 0x220   : > { %v7669_v40 = vpop.f32.mrf.mxu1  ;;  %v7671_v48 = vpop.f32.mrf.mxu0  ;;  %v3207_v36 = vsel %vm9124_vm2, %v3191_v63, 0 }
 0x222   : > { %v7681_v0 = vpop.f32.mrf.mxu1  ;;  %v7683_v33 = vpop.f32.mrf.mxu0 }
 0x224   : > { %5783 = vmatmul.mubr.msk.bf16.gmra.mxu1 %vm9114_vm10, %v3203_v51  ;;  %v7685_v29 = vpop.f32.mrf.mxu1  ;;  %v7687_v8 = vpop.f32.mrf.mxu0  ;;  %vm9128_vm10 = vmmov %vm9077_vm0 }
 0x225   : > { %5883 = vmatmul.mubr.msk.bf16.gmra.mxu0 %vm9115_vm4, %v4149_v37  ;;  %5786 = vmatprep.mubr.msk.bf16.mxu1 %vm9117_vm1, %v3204_v46  ;;  %v3208_v46 = vsel %vm9127_vm3, %v3192_v17, 0  ;;  %vm9129_vm4 = vmmov %vm9077_vm0 }
 0x226   : > { %5886 = vmatprep.mubr.msk.bf16.mxu0 %vm9077_vm0, %v4150_v60  ;;  %v7689_v4 = vpop.f32.mrf.mxu1  ;;  %v7691_v25 = vpop.f32.mrf.mxu0  ;;  %v4154_v60 = vsel %vm9116_vm8, %v3189_v34, 0  ;;  %vm9133_vm8 = vmmov %vm9077_vm0 }
 0x227   : > { %vm9134_vm1 = vmmov %vm9077_vm0  ;;  %vm9135_vm0 = vnez %v8988_v28  ;;  %v3801_v28 = vld [vmem:[#allocation2 + $0x70] sm:$0xff] }
 0x22b   : > { %v7697_v56 = vpop.f32.mrf.mxu1  ;;  %v7699_v59 = vpop.f32.mrf.mxu0 }
 0x22c   : > { %5787 = vmatmul.mubr.msk.bf16.gmra.mxu1 %vm9119_vm5, %v3205_v11  ;;  %v3193_v11 = vpack.c.bf16 %v3175_v27, %v3174_v31  ;;  %vm9136_vm5 = vmmov %vm9134_vm1  ;;  %v3793_v31 = vld [vmem:[#allocation2 + $0x30] sm:$0xff] }
 0x22d   : > { %5887 = vmatmul.mubr.msk.bf16.gmra.mxu0 %vm9120_vm12, %v4151_v3  ;;  %5790 = vmatprep.mubr.msk.bf16.mxu1 %vm9122_vm7, %v3206_v26  ;;  %v7709_v39 = vpop.f32.mrf.mxu1  ;;  %v7711_v24 = vpop.f32.mrf.mxu0  ;;  %vm9137_vm12 = vmmov %vm9134_vm1 }
 0x22e   : > { %5890 = vmatprep.mubr.msk.bf16.mxu0 %vm9123_vm13, %v4152_v2  ;;  %v3194_v2 = vpack.c.bf16 %v3177_v21, %v3176_v7  ;;  %v3209_v10 = vsel %vm9131_vm15, %v3193_v11, 0  ;;  %vm9144_vm7 = vmmov %vm9134_vm1 }
 0x22f   : > { %v7713_v1 = vpop.f32.mrf.mxu1  ;;  %v7715_v16 = vpop.f32.mrf.mxu0  ;;  %vm9145_vm13 = vmmov %vm9134_vm1 }
 0x231   : > { %v7717_v44 = vpop.f32.mrf.mxu1  ;;  %v7719_v12 = vpop.f32.mrf.mxu0 }
 0x233   : > { %v7727_v37 = vpop.f32.mrf.mxu0 }
 0x234   : > { %v7725_v51 = vpop.f32.mrf.mxu1  ;;  %5791 = vmatmul.mubr.msk.bf16.gmra.mxu1 %vm9125_vm14, %v3207_v36  ;;  %v3210_v36 = vsel %vm9135_vm0, %v3194_v2, 0  ;;  %vm9146_vm14 = vmmov %vm9134_vm1 }
 0x235   : > { %5891 = vmatmul.mubr.msk.bf16.gmra.mxu0 %vm9126_vm9, %v4153_v6  ;;  %5794 = vmatprep.mubr.msk.bf16.mxu1 %vm9128_vm10, %v3208_v46  ;;  %v7739_v54 = vpop.f32.mrf.mxu0  ;;  %v4156_v6 = vsel %vm9121_vm11, %v3191_v63, 0  ;;  %v3178_v46 = vld [vmem:[#allocation2 + $0x109] sm:$0xff]  ;;  %vm9143_vm11 = vmmov %vm9134_vm1 }
 0x236   : > { %5894 = vmatprep.mubr.msk.bf16.mxu0 %vm9129_vm4, %v4154_v60  ;;  %v7737_v30 = vpop.f32.mrf.mxu1  ;;  %v3179_v60 = vld [vmem:[#allocation2 + $0x111] sm:$0xff]  ;;  %v3792_v63 = vld [vmem:[#allocation2 + $0x28] sm:$0xff]  ;;  %vm9152_vm9 = vmmov %vm9134_vm1 }
 0x237   : > { %v7743_v26 = vpop.f32.mrf.mxu0  ;;  %v3195_v27 = vpack.c.bf16 %v3179_v60, %v3178_v46  ;;  %v4158_v60 = vsel %vm9127_vm3, %v3193_v11, 0  ;;  %v3796_v11 = vld [vmem:[#allocation2 + $0x48] sm:$0xff]  ;;  %vm9153_vm3 = vmmov %vm9134_vm1 }
 0x238   : > { %v7741_v3 = vpop.f32.mrf.mxu1  ;;  %vm9154_vm10 = vmmov %vm9134_vm1 }
 0x239   : > { %v7747_v34 = vpop.f32.mrf.mxu0  ;;  %vm9156_vm4 = vmmov %vm9134_vm1 }
 0x23a   : > { %v7745_v18 = vpop.f32.mrf.mxu1 }
 0x23b   : > { %9130 = vst [vmem:[#allocation29_spill] sm:$0xff] %v7745_v18 }
 0x23c   : > { %v7753_v38 = vpop.f32.mrf.mxu1  ;;  %v7755_v32 = vpop.f32.mrf.mxu0  ;;  %5795 = vmatmul.mubr.msk.bf16.gmra.mxu1 %vm9133_vm8, %v3209_v10  ;;  %vm9158_vm8 = vmmov %vm9134_vm1 }
 0x23d   : > { %9132 = vst [vmem:[#allocation22_spill] sm:$0xff] %v7753_v38  ;;  %5895 = vmatmul.mubr.msk.bf16.gmra.mxu0 %vm9134_vm1, %v4155_v53  ;;  %5798 = vmatprep.mubr.msk.bf16.mxu1 %vm9136_vm5, %v3210_v36  ;;  %v3211_v53 = vsel %vm9141_vm6, %v3195_v27, 0  ;;  %v4157_v36 = vsel %vm9124_vm2, %v3192_v17, 0  ;;  %v3795_v17 = vld [vmem:[#allocation2 + $0x40] sm:$0xff]  ;;  %vm9151_vm2 = vmmov %vm9134_vm1 }
 0x23e   : > { %5898 = vmatprep.mubr.msk.bf16.mxu0 %vm9137_vm12, %v4156_v6  ;;  %v7765_v23 = vpop.f32.mrf.mxu1  ;;  %v7767_v49 = vpop.f32.mrf.mxu0  ;;  %v3824_v6 = vpack.c.bf16 %v3793_v31, %v3792_v63  ;;  %v4129_v38 = vld [vmem:[#allocation2 + $0x121] sm:$0xff] }
 0x23f   : > { %9138 = vst [vmem:[#allocation24_spill] sm:$0xff] %v7765_v23 }
 0x240   : > { %v7769_v7 = vpop.f32.mrf.mxu1  ;;  %v7771_v21 = vpop.f32.mrf.mxu0 }
 0x241   : > { %9139 = vst [vmem:[#allocation25_spill] sm:$0xff] %v7769_v7 }
 0x242   : > { %v7773_v10 = vpop.f32.mrf.mxu1  ;;  %v7775_v5 = vpop.f32.mrf.mxu0 }
 0x243   : > { %9140 = vst [vmem:[#allocation27_spill] sm:$0xff] %v7773_v10 }
 0x244   : > { %v7781_v23 = vpop.f32.mrf.mxu1  ;;  %5799 = vmatmul.mubr.msk.bf16.gmra.mxu1 %vm9143_vm11, %v3211_v53  ;;  %v3794_v53 = vld [vmem:[#allocation2 + $0x38] sm:$0xff] }
 0x245   : > { %9142 = vst [vmem:[#allocation15_spill] sm:$0xff] %v7781_v23  ;;  %v7783_v46 = vpop.f32.mrf.mxu0  ;;  %5899 = vmatmul.mubr.msk.bf16.gmra.mxu0 %vm9144_vm7, %v4157_v36  ;;  %5842 = vmatprep.mubr.msk.bf16.mxu1 %vm9145_vm13, %v3824_v6  ;;  %v3797_v23 = vld [vmem:[#allocation2 + $0x50] sm:$0xff]  ;;  %v3825_v13 = vpack.c.bf16 %v3795_v17, %v3794_v53  ;;  %v4128_v6 = vld [vmem:[#allocation2 + $0x119] sm:$0xff] }
 0x246   : > { %5902 = vmatprep.mubr.msk.bf16.mxu0 %vm9146_vm14, %v4158_v60  ;;  %v7791_v10 = vpop.f32.mrf.mxu1  ;;  %v4159_v60 = vsel %vm9131_vm15, %v3194_v2, 0  ;;  %v4145_v17 = vpack.c.bf16 %v4129_v38, %v4128_v6  ;;  %v3799_v53 = vld [vmem:[#allocation2 + $0x60] sm:$0xff]  ;;  %v3800_v6 = vld [vmem:[#allocation2 + $0x68] sm:$0xff]  ;;  %vm9157_vm15 = vmmov %vm9134_vm1 }
 0x247   : > { %9147 = vst [vmem:[#allocation28_spill] sm:$0xff] %v7791_v10  ;;  %v7793_v41 = vpop.f32.mrf.mxu0  ;;  %v3826_v10 = vpack.c.bf16 %v3797_v23, %v3796_v11 }
 0x248   : > { %9148 = vst [vmem:[#allocation16_spill] sm:$0xff] %v7793_v41  ;;  %v7795_v31 = vpop.f32.mrf.mxu1 }
 0x249   : > { %9149 = vst [vmem:[#allocation17_spill] sm:$0xff] %v7795_v31  ;;  %v7797_v63 = vpop.f32.mrf.mxu0 }
 0x24a   : > { %v7799_v7 = vpop.f32.mrf.mxu1 }
 0x24b   : > { %9150 = vst [vmem:[#allocation18_spill] sm:$0xff] %v7799_v7  ;;  %v7801_v36 = vpop.f32.mrf.mxu0  ;;  %v4160_v7 = vsel %vm9135_vm0, %v3195_v27, 0  ;;  %v4161_v27 = vsel %vm9141_vm6, %v4145_v17, 0  ;;  %vm9159_vm0 = vmmov %vm9134_vm1 }
 0x24c   : > { %v5628_v18 = vpop.f32.mrf.mxu1  ;;  %5843 = vmatmul.mubr.msk.bf16.vlgmr.msra.gmra.mxu1 %vm9151_vm2, %v3825_v13  ;;  %vm9160_vm5 = vmmov %vm9159_vm0 }
 0x24d   : > { %v7805_v41 = vpop.f32.mrf.mxu0  ;;  %5903 = vmatmul.mubr.msk.bf16.gmra.mxu0 %vm9152_vm9, %v4159_v60  ;;  %v1952_v31 = vadd.f32 %v5628_v18, %v7596_v19  ;;  %5846 = vmatprep.mubr.msk.bf16.mxu1 %vm9153_vm3, %v3826_v10  ;;  %v3798_v18 = vld [vmem:[#allocation2 + $0x58] sm:$0xff]  ;;  %vm9161_vm12 = vmmov %vm9159_vm0 }
 0x24e   : > { %5906 = vmatprep.mubr.msk.bf16.mxu0 %vm9154_vm10, %v4160_v7  ;;  %v1943_v62 = vpop.f32.mrf.mxu1  ;;  %vm9162_vm6 = vmmov %vm9159_vm0 }
 0x24f   : > { %v7814_v2 = vpop.f32.mrf.mxu0  ;;  %v1944_v23 = vadd.f32 %v1943_v62, %v7611_v20  ;;  %v7818_v13 = vadd.f32 %v7643_v47, %v1952_v31  ;;  %v3827_v20 = vpack.c.bf16 %v3799_v53, %v3798_v18  ;;  %v3828_v31 = vpack.c.bf16 %v3801_v28, %v3800_v6  ;;  %vm9163_vm11 = vmmov %vm9159_vm0 }
 0x250   : > { %v5629_v11 = vpop.f32.mrf.mxu1  ;;  %vm9164_vm7 = vmmov %vm9159_vm0 }
 0x251   : > { %9155 = vst [vmem:[#allocation19_spill] sm:$0xff] %v7818_v13  ;;  %v7820_v60 = vpop.f32.mrf.mxu0  ;;  %v1955_v19 = vadd.f32 %v5629_v11, %v7613_v58  ;;  %v7826_v38 = vadd.f32 %v7655_v45, %v1944_v23  ;;  %v3803_v23 = vld [vmem:[#allocation2 + $0x80] sm:$0xff]  ;;  %vm9165_vm13 = vmmov %vm9159_vm0 }
 0x252   : > { %v1946_v7 = vpop.f32.mrf.mxu1  ;;  %vm9168_vm14 = vmmov %vm9159_vm0 }
 0x253   : > { %v7828_v10 = vpop.f32.mrf.mxu0  ;;  %v1947_v47 = vadd.f32 %v1946_v7, %v7615_v61  ;;  %v7832_v62 = vadd.f32 %v7659_v35, %v1955_v19  ;;  %v3805_v19 = vld [vmem:[#allocation2 + $0x90] sm:$0xff]  ;;  %vm9170_vm2 = vmmov %vm9159_vm0 }
 0x254   : > { %v5632_v13 = vpop.f32.mrf.mxu1  ;;  %5847 = vmatmul.mubr.msk.bf16.gmra.mxu1 %vm9156_vm4, %v3827_v20  ;;  %v3804_v20 = vld [vmem:[#allocation2 + $0x88] sm:$0xff]  ;;  %vm9177_vm9 = vmmov %vm9159_vm0 }
 0x255   : > { %v7834_v58 = vpop.f32.mrf.mxu0  ;;  %5907 = vmatmul.mubr.msk.bf16.gmra.mxu0 %vm9157_vm15, %v4161_v27  ;;  %v1968_v14 = vadd.f32 %v5632_v13, %v7621_v22  ;;  %5850 = vmatprep.mubr.msk.bf16.mxu1 %vm9158_vm8, %v3828_v31  ;;  %v7841_v45 = vadd.f32 %v7663_v42, %v1947_v47  ;;  %v3802_v13 = vld [vmem:[#allocation2 + $0x78] sm:$0xff]  ;;  %v3830_v6 = vpack.c.bf16 %v3805_v19, %v3804_v20  ;;  %v3809_v19 = vld [vmem:[#allocation2 + $0xb0] sm:$0xff]  ;;  %vm9204_vm3 = vmmov %vm9159_vm0 }
 0x256   : > { %v1959_v17 = vpop.f32.mrf.mxu1  ;;  %v3829_v7 = vpack.c.bf16 %v3803_v23, %v3802_v13  ;;  %v6056_v23 = vld [vmem:[%s8734_s7 + $0x8] sm:$0xff]   ;;  %vm9205_vm10 = vmmov %vm9159_vm0 }
 0x257   : > { %v7843_v61 = vpop.f32.mrf.mxu0  ;;  %v1960_v35 = vadd.f32 %v1959_v17, %v7631_v43  ;;  %v7847_v53 = vadd.f32 %v7671_v48, %v1968_v14  ;;  %5910 = vmatprep.subr.bf16.mxu1 %v6056_v23  ;;  %vm9209_vm4 = vmmov %vm9159_vm0 }
 0x258   : > { %v5633_v11 = vpop.f32.mrf.mxu1  ;;  %5911 = vmatpush3.bf16.msra.mxu1 %v6056_v23  ;;  %vm9210_vm15 = vmmov %vm9159_vm0 }
 0x259   : > { %v7849_v28 = vpop.f32.mrf.mxu0  ;;  %v1971_v22 = vadd.f32 %v5633_v11, %v7633_v52  ;;  %v7853_v18 = vadd.f32 %v7683_v33, %v1960_v35  ;;  %v3807_v35 = vld [vmem:[#allocation2 + $0xa0] sm:$0xff]  ;;  %vm9213_vm8 = vmmov %vm9159_vm0 }
 0x25a   : > { %v1962_v42 = vpop.f32.mrf.mxu1 }
 0x25b   : > { %v7855_v27 = vpop.f32.mrf.mxu0  ;;  %v1963_v43 = vadd.f32 %v1962_v42, %v7635_v9  ;;  %v7859_v48 = vadd.f32 %v7687_v8, %v1971_v22  ;;  %v3806_v22 = vld [vmem:[#allocation2 + $0x98] sm:$0xff] }
 0x25c   : > { %v5636_v47 = vpop.f32.mrf.mxu1  ;;  %5851 = vmatmul.mubr.msk.bf16.gmra.mxu1 %vm9134_vm1, %v3829_v7  ;;  %v3808_v7 = vld [vmem:[#allocation2 + $0xa8] sm:$0xff]  ;;  %vm9214_vm1 = vmmov %vm9159_vm0 }
 0x25d   : > { %v7861_v31 = vpop.f32.mrf.mxu0  ;;  %v1984_v52 = vadd.f32 %v5636_v47, %v7641_v50  ;;  %5854 = vmatprep.mubr.msk.bf16.mxu1 %vm9159_vm0, %v3830_v6  ;;  %v7867_v33 = vadd.f32 %v7691_v25, %v1963_v43  ;;  %v3832_v43 = vpack.c.bf16 %v3809_v19, %v3808_v7  ;;  %v3813_v19 = vld [vmem:[#allocation2 + $0xd0] sm:$0xff]  ;;  %v3812_v7 = vld [vmem:[#allocation2 + $0xc8] sm:$0xff] }
 0x25e   : > { %v1975_v14 = vpop.f32.mrf.mxu1 }
 0x25f   : > { %v7869_v17 = vpop.f32.mrf.mxu0  ;;  %v1976_v9 = vadd.f32 %v1975_v14, %v7653_v15  ;;  %v7873_v8 = vadd.f32 %v7699_v59, %v1984_v52  ;;  %v3831_v59 = vpack.c.bf16 %v3807_v35, %v3806_v22  ;;  %v3811_v35 = vld [vmem:[#allocation2 + $0xc0] sm:$0xff] }
 0x260   : > { %v5637_v11 = vpop.f32.mrf.mxu1 }
 0x261   : > { %v7878_v50 = vpop.f32.mrf.mxu0  ;;  %v1987_v25 = vadd.f32 %v5637_v11, %v7657_v57  ;;  %v7882_v13 = vadd.f32 %v7711_v24, %v1976_v9 }
 0x262   : > { %v1978_v15 = vpop.f32.mrf.mxu1 }
 0x263   : > { %v7884_v42 = vpop.f32.mrf.mxu0  ;;  %v1979_v20 = vadd.f32 %v1978_v15, %v7661_v55  ;;  %v7888_v6 = vadd.f32 %v7715_v16, %v1987_v25  ;;  %v3810_v25 = vld [vmem:[#allocation2 + $0xb8] sm:$0xff] }
 0x264   : > { %v5640_v47 = vpop.f32.mrf.mxu1  ;;  %5855 = vmatmul.mubr.msk.bf16.gmra.mxu1 %vm9160_vm5, %v3831_v59  ;;  %v3833_v59 = vpack.c.bf16 %v3811_v35, %v3810_v25  ;;  %vm9217_vm5 = vmmov %vm9159_vm0 }
 0x265   : > { %v7890_v52 = vpop.f32.mrf.mxu0  ;;  %v2000_v57 = vadd.f32 %v5640_v47, %v7669_v40  ;;  %5858 = vmatprep.mubr.msk.bf16.mxu1 %vm9161_vm12, %v3832_v43  ;;  %v7896_v24 = vadd.f32 %v7719_v12, %v1979_v20  ;;  %v3834_v20 = vpack.c.bf16 %v3813_v19, %v3812_v7  ;;  %v3817_v19 = vld [vmem:[#allocation2 + $0xf0] sm:$0xff]  ;;  %v3816_v7 = vld [vmem:[#allocation2 + $0xe8] sm:$0xff]  ;;  %vm9220_vm12 = vmmov %vm9159_vm0 }
 0x266   : > { %v1991_v14 = vpop.f32.mrf.mxu1 }
 0x267   : > { %v7898_v9 = vpop.f32.mrf.mxu0  ;;  %v1992_v55 = vadd.f32 %v1991_v14, %v7681_v0  ;;  %v7902_v16 = vadd.f32 %v7727_v37, %v2000_v57 }
 0x268   : > { %v5641_v23 = vpop.f32.mrf.mxu1 }
 0x269   : > { %v7904_v11 = vpop.f32.mrf.mxu0  ;;  %v2003_v40 = vadd.f32 %v5641_v23, %v7685_v29  ;;  %v7908_v22 = vadd.f32 %v7739_v54, %v1992_v55  ;;  %v3815_v55 = vld [vmem:[#allocation2 + $0xe0] sm:$0xff] }
 0x26a   : > { %v1994_v12 = vpop.f32.mrf.mxu1 }
 0x26b   : > { %v7910_v15 = vpop.f32.mrf.mxu0  ;;  %v1995_v0 = vadd.f32 %v1994_v12, %v7689_v4  ;;  %v7914_v37 = vadd.f32 %v7743_v26, %v2003_v40  ;;  %v3814_v40 = vld [vmem:[#allocation2 + $0xd8] sm:$0xff] }
 0x26c   : > { %v5644_v43 = vpop.f32.mrf.mxu1  ;;  %5859 = vmatmul.mubr.msk.bf16.gmra.mxu1 %vm9162_vm6, %v3833_v59  ;;  %v3835_v59 = vpack.c.bf16 %v3815_v55, %v3814_v40  ;;  %v9166_v40 = vld [vmem:[#allocation16_spill] sm:$0xff]  ;;  %vm9221_vm6 = vmmov %vm9159_vm0 }
 0x26d   : > { %v7916_v47 = vpop.f32.mrf.mxu0  ;;  %v2016_v29 = vadd.f32 %v5644_v43, %v7697_v56  ;;  %5862 = vmatprep.mubr.msk.bf16.mxu1 %vm9163_vm11, %v3834_v20  ;;  %v7922_v54 = vadd.f32 %v7747_v34, %v1995_v0  ;;  %v3836_v0 = vpack.c.bf16 %v3817_v19, %v3816_v7  ;;  %v3821_v19 = vld [vmem:[#allocation2 + $0x110] sm:$0xff]  ;;  %vm9224_vm11 = vmmov %vm9159_vm0 }
 0x26e   : > { %v2007_v57 = vpop.f32.mrf.mxu1 }
 0x26f   : > { %v7924_v14 = vpop.f32.mrf.mxu0  ;;  %v2008_v4 = vadd.f32 %v2007_v57, %v7709_v39  ;;  %v7928_v26 = vadd.f32 %v7755_v32, %v2016_v29 }
 0x270   : > { %v5645_v35 = vpop.f32.mrf.mxu1 }
 0x271   : > { %v7930_v23 = vpop.f32.mrf.mxu0  ;;  %v2019_v56 = vadd.f32 %v5645_v35, %v7713_v1  ;;  %v7934_v25 = vadd.f32 %v7767_v49, %v2008_v4  ;;  %v3819_v4 = vld [vmem:[#allocation2 + $0x100] sm:$0xff] }
 0x272   : > { %v2010_v34 = vpop.f32.mrf.mxu1 }
 0x273   : > { %v7936_v12 = vpop.f32.mrf.mxu0  ;;  %v2011_v39 = vadd.f32 %v2010_v34, %v7717_v44  ;;  %v7940_v32 = vadd.f32 %v7771_v21, %v2019_v56  ;;  %v3818_v56 = vld [vmem:[#allocation2 + $0xf8] sm:$0xff] }
 0x274   : > { %v5648_v20 = vpop.f32.mrf.mxu1  ;;  %5863 = vmatmul.mubr.msk.bf16.gmra.mxu1 %vm9164_vm7, %v3835_v59  ;;  %v3837_v7 = vpack.c.bf16 %v3819_v4, %v3818_v56  ;;  %vm9225_vm7 = vmmov %vm9159_vm0 }
 0x275   : > { %v7942_v43 = vpop.f32.mrf.mxu0  ;;  %v2032_v1 = vadd.f32 %v5648_v20, %v7725_v51  ;;  %5866 = vmatprep.mubr.msk.bf16.mxu1 %vm9165_vm13, %v3836_v0  ;;  %v7948_v49 = vadd.f32 %v7775_v5, %v2011_v39  ;;  %v3820_v39 = vld [vmem:[#allocation2 + $0x108] sm:$0xff]  ;;  %vm9227_vm13 = vmmov %vm9159_vm0 }
 0x276   : > { %v2023_v29 = vpop.f32.mrf.mxu1  ;;  %v3838_v20 = vpack.c.bf16 %v3821_v19, %v3820_v39  ;;  %v9172_v19 = vld [vmem:[#allocation24_spill] sm:$0xff] }
 0x277   : > { %v7950_v57 = vpop.f32.mrf.mxu0  ;;  %v2024_v44 = vadd.f32 %v2023_v29, %v7737_v30  ;;  %v7954_v21 = vadd.f32 %v7783_v46, %v2032_v1  ;;  %v9167_v30 = vld [vmem:[#allocation29_spill] sm:$0xff] }
 0x278   : > { %v5649_v55 = vpop.f32.mrf.mxu1 }
 0x279   : > { %v7956_v35 = vpop.f32.mrf.mxu0  ;;  %v2035_v51 = vadd.f32 %v5649_v55, %v7741_v3  ;;  %v7960_v34 = vadd.f32 %v9166_v40, %v2024_v44  ;;  %v9169_v3 = vld [vmem:[#allocation22_spill] sm:$0xff]  ;;  %v3823_v40 = vld [vmem:[#allocation2 + $0x120] sm:$0xff] }
 0x27a   : > { %v2026_v5 = vpop.f32.mrf.mxu1  ;;  %v3822_v44 = vld [vmem:[#allocation2 + $0x118] sm:$0xff] }
 0x27b   : > { %v7962_v59 = vpop.f32.mrf.mxu0  ;;  %v2027_v0 = vadd.f32 %v2026_v5, %v9167_v30  ;;  %v7966_v46 = vadd.f32 %v7797_v63, %v2035_v51 }
 0x27c   : > { %v5652_v1 = vpop.f32.mrf.mxu1  ;;  %5867 = vmatmul.mubr.msk.bf16.gmra.mxu1 %vm9168_vm14, %v3837_v7  ;;  %v6057_v7 = vld [vmem:[%s8734_s7] sm:$0xff]   ;;  %vm9228_vm14 = vmmov %vm9159_vm0 }
 0x27d   : > { %v7968_v29 = vpop.f32.mrf.mxu0  ;;  %v2048_v55 = vadd.f32 %v5652_v1, %v9169_v3  ;;  %5870 = vmatprep.mubr.msk.bf16.mxu1 %vm9170_vm2, %v3838_v20  ;;  %v7974_v4 = vadd.f32 %v7801_v36, %v2027_v0  ;;  %v3839_v20 = vpack.c.bf16 %v3823_v40, %v3822_v44  ;;  %v9174_v1 = vld [vmem:[#allocation25_spill] sm:$0xff]  ;;  %5912 = vmatprep.subr.bf16.mxu1 %v6057_v7  ;;  %v9178_v44 = vld [vmem:[#allocation15_spill] sm:$0xff]  ;;  %vm9229_vm2 = vmmov %vm9159_vm0 }
 0x27e   : > { %v2039_v56 = vpop.f32.mrf.mxu1  ;;  %5913 = vmatpush3.bf16.msra.mxu1 %v6057_v7 }
 0x27f   : > { %9171 = vst [vmem:[#allocation20_spill] sm:$0xff] %v7974_v4  ;;  %v7976_v5 = vpop.f32.mrf.mxu0  ;;  %v2040_v63 = vadd.f32 %v2039_v56, %v9172_v19  ;;  %v7980_v51 = vadd.f32 %v7805_v41, %v2048_v55  ;;  %v9175_v41 = vld [vmem:[#allocation27_spill] sm:$0xff] }
 0x280   : > { %v5653_v39 = vpop.f32.mrf.mxu1 }
 0x281   : > { %9173 = vst [vmem:[#allocation21_spill] sm:$0xff] %v7980_v51  ;;  %v7985_v30 = vpop.f32.mrf.mxu0  ;;  %v2051_v3 = vadd.f32 %v5653_v39, %v9174_v1  ;;  %v7989_v36 = vadd.f32 %v7814_v2, %v2040_v63  ;;  %v9180_v1 = vld [vmem:[#allocation28_spill] sm:$0xff] }
 0x282   : > { %v2042_v0 = vpop.f32.mrf.mxu1 }
 0x283   : > { %v7991_v4 = vpop.f32.mrf.mxu0  ;;  %v2043_v55 = vadd.f32 %v2042_v0, %v9175_v41  ;;  %v7995_v56 = vadd.f32 %v7820_v60, %v2051_v3  ;;  %v9182_v41 = vld [vmem:[#allocation17_spill] sm:$0xff] }
 0x284   : > { %v5656_v19 = vpop.f32.mrf.mxu1  ;;  %5871 = vmatmul.mubr.msk.bf16.gmra.mxu1 %vm9177_vm9, %v3839_v20  ;;  %vm9230_vm9 = vmmov %vm9159_vm0 }
 0x285   : > { %9176 = vst [vmem:[#allocation23_spill] sm:$0xff] %v7995_v56  ;;  %v7997_v51 = vpop.f32.mrf.mxu0  ;;  %v2064_v40 = vadd.f32 %v5656_v19, %v9178_v44  ;;  %v8002_v2 = vadd.f32 %v7828_v10, %v2043_v55  ;;  %v9183_v10 = vld [vmem:[#allocation18_spill] sm:$0xff] }
 0x286   : > { %v2055_v63 = vpop.f32.mrf.mxu1 }
 0x287   : > { %9179 = vst [vmem:[#allocation26_spill] sm:$0xff] %v8002_v2  ;;  %v8004_v39 = vpop.f32.mrf.mxu0  ;;  %v2056_v7 = vadd.f32 %v2055_v63, %v9180_v1  ;;  %v8008_v0 = vadd.f32 %v7834_v58, %v2064_v40  ;;  %v9184_v58 = vld [vmem:[#allocation19_spill] sm:$0xff] }
 0x288   : > { %v5657_v60 = vpop.f32.mrf.mxu1 }
 0x289   : > { %9181 = vst [vmem:[#allocation16_spill] sm:$0xff] %v8008_v0  ;;  %v8010_v3 = vpop.f32.mrf.mxu0  ;;  %v2067_v56 = vadd.f32 %v5657_v60, %v9182_v41  ;;  %v8014_v20 = vadd.f32 %v7843_v61, %v2056_v7 }
 0x28a   : > { %v2058_v19 = vpop.f32.mrf.mxu1 }
 0x28b   : > { %v8016_v44 = vpop.f32.mrf.mxu0  ;;  %v2059_v55 = vadd.f32 %v2058_v19, %v9183_v10  ;;  %v8020_v2 = vadd.f32 %v7849_v28, %v2067_v56 }
 0x28c   : > { %v5700_v63 = vpop.f32.mrf.mxu1 }
 0x28d   : > { %v8022_v1 = vpop.f32.mrf.mxu0  ;;  %v2812_v40 = vadd.f32 %v5700_v63, %v9184_v58  ;;  %v8026_v0 = vadd.f32 %v7855_v27, %v2059_v55 }
 0x28e   : > { %v2683_v60 = vpop.f32.mrf.mxu1 }
 0x28f   : > { %v8028_v41 = vpop.f32.mrf.mxu0  ;;  %v2810_v61 = vadd.f32 %v2683_v60, %v7826_v38  ;;  %v8032_v7 = vadd.f32 %v7861_v31, %v2812_v40 }
 0x290   : > { %v5701_v19 = vpop.f32.mrf.mxu1 }
 0x291   : > { %v8034_v10 = vpop.f32.mrf.mxu0  ;;  %v2813_v28 = vadd.f32 %v5701_v19, %v7832_v62  ;;  %v8038_v56 = vadd.f32 %v7869_v17, %v2810_v61 }
 0x292   : > { %v2686_v63 = vpop.f32.mrf.mxu1 }
 0x293   : > { %v8040_v58 = vpop.f32.mrf.mxu0  ;;  %v2811_v27 = vadd.f32 %v2686_v63, %v7841_v45  ;;  %v8044_v55 = vadd.f32 %v7878_v50, %v2813_v28 }
 0x294   : > { %v5704_v38 = vpop.f32.mrf.mxu1 }
 0x295   : > { %v8046_v60 = vpop.f32.mrf.mxu0  ;;  %v2816_v31 = vadd.f32 %v5704_v38, %v7847_v53  ;;  %v8050_v40 = vadd.f32 %v7884_v42, %v2811_v27 }
 0x296   : > { %v2699_v62 = vpop.f32.mrf.mxu1 }
 0x297   : > { %v8052_v19 = vpop.f32.mrf.mxu0  ;;  %v2814_v17 = vadd.f32 %v2699_v62, %v7853_v18  ;;  %v8056_v61 = vadd.f32 %v7890_v52, %v2816_v31 }
 0x298   : > { %v5705_v45 = vpop.f32.mrf.mxu1 }
 0x299   : > { %v8058_v63 = vpop.f32.mrf.mxu0  ;;  %v2817_v50 = vadd.f32 %v5705_v45, %v7859_v48  ;;  %v8062_v28 = vadd.f32 %v7898_v9, %v2814_v17 }
 0x29a   : > { %v2702_v53 = vpop.f32.mrf.mxu1 }
 0x29b   : > { %v8064_v38 = vpop.f32.mrf.mxu0  ;;  %v2815_v42 = vadd.f32 %v2702_v53, %v7867_v33  ;;  %v8068_v27 = vadd.f32 %v7904_v11, %v2817_v50 }
 0x29c   : > { %v5708_v18 = vpop.f32.mrf.mxu1 }
 0x29d   : > { %v8070_v62 = vpop.f32.mrf.mxu0  ;;  %v2820_v52 = vadd.f32 %v5708_v18, %v7873_v8  ;;  %v8074_v31 = vadd.f32 %v7910_v15, %v2815_v42 }
 0x29e   : > { %v2715_v48 = vpop.f32.mrf.mxu1 }
 0x29f   : > { %v8076_v45 = vpop.f32.mrf.mxu0  ;;  %v2818_v9 = vadd.f32 %v2715_v48, %v7882_v13  ;;  %v8080_v17 = vadd.f32 %v7916_v47, %v2820_v52 }
 0x2a0   : > { %v5709_v33 = vpop.f32.mrf.mxu1 }
 0x2a1   : > { %v8082_v53 = vpop.f32.mrf.mxu0  ;;  %v2821_v11 = vadd.f32 %v5709_v33, %v7888_v6  ;;  %v8086_v50 = vadd.f32 %v7924_v14, %v2818_v9 }
 0x2a2   : > { %v2718_v8 = vpop.f32.mrf.mxu1 }
 0x2a3   : > { %v8088_v18 = vpop.f32.mrf.mxu0  ;;  %v2819_v15 = vadd.f32 %v2718_v8, %v7896_v24  ;;  %v8092_v42 = vadd.f32 %v7930_v23, %v2821_v11 }
 0x2a4   : > { %v5712_v13 = vpop.f32.mrf.mxu1 }
 0x2a5   : > { %v8094_v48 = vpop.f32.mrf.mxu0  ;;  %v2824_v47 = vadd.f32 %v5712_v13, %v7902_v16  ;;  %v8098_v52 = vadd.f32 %v7936_v12, %v2819_v15 }
 0x2a6   : > { %v2731_v6 = vpop.f32.mrf.mxu1 }
 0x2a7   : > { %9185 = vst [vmem:[#allocation29_spill] sm:$0xff] %v8098_v52  ;;  %v8100_v33 = vpop.f32.mrf.mxu0  ;;  %v2822_v14 = vadd.f32 %v2731_v6, %v7908_v22  ;;  %v8104_v9 = vadd.f32 %v7942_v43, %v2824_v47 }
 0x2a8   : > { %v5713_v24 = vpop.f32.mrf.mxu1 }
 0x2a9   : > { %v8106_v8 = vpop.f32.mrf.mxu0  ;;  %v2825_v23 = vadd.f32 %v5713_v24, %v7914_v37  ;;  %v8110_v11 = vadd.f32 %v7950_v57, %v2822_v14 }
 0x2aa   : > { %v2734_v16 = vpop.f32.mrf.mxu1 }
 0x2ab   : > { %v8112_v13 = vpop.f32.mrf.mxu0  ;;  %v2823_v12 = vadd.f32 %v2734_v16, %v7922_v54  ;;  %v8116_v15 = vadd.f32 %v7956_v35, %v2825_v23 }
 0x2ac   : > { %v5716_v22 = vpop.f32.mrf.mxu1 }
 0x2ad   : > { %v8118_v6 = vpop.f32.mrf.mxu0  ;;  %v2828_v43 = vadd.f32 %v5716_v22, %v7928_v26  ;;  %v8122_v47 = vadd.f32 %v7962_v59, %v2823_v12 }
 0x2ae   : > { %v2747_v37 = vpop.f32.mrf.mxu1 }
 0x2af   : > { %9186 = vst [vmem:[#allocation22_spill] sm:$0xff] %v8122_v47  ;;  %v8124_v24 = vpop.f32.mrf.mxu0  ;;  %v2826_v57 = vadd.f32 %v2747_v37, %v7934_v25  ;;  %v8128_v14 = vadd.f32 %v7968_v29, %v2828_v43 }
 0x2b0   : > { %v5717_v54 = vpop.f32.mrf.mxu1 }
 0x2b1   : > { %v8130_v16 = vpop.f32.mrf.mxu0  ;;  %v2829_v35 = vadd.f32 %v5717_v54, %v7940_v32  ;;  %v8134_v23 = vadd.f32 %v7976_v5, %v2826_v57 }
 0x2b2   : > { %v2750_v26 = vpop.f32.mrf.mxu1 }
 0x2b3   : > { %v8136_v22 = vpop.f32.mrf.mxu0  ;;  %v2827_v59 = vadd.f32 %v2750_v26, %v7948_v49  ;;  %v8140_v12 = vadd.f32 %v7985_v30, %v2829_v35 }
 0x2b4   : > { %9187 = vst [vmem:[#allocation24_spill] sm:$0xff] %v8136_v22  ;;  %v5720_v25 = vpop.f32.mrf.mxu1 }
 0x2b5   : > { %v8142_v37 = vpop.f32.mrf.mxu0  ;;  %v2832_v29 = vadd.f32 %v5720_v25, %v7954_v21  ;;  %v8146_v43 = vadd.f32 %v7991_v4, %v2827_v59  ;;  %v9190_v4 = vld [vmem:[#allocation20_spill] sm:$0xff] }
 0x2b6   : > { %v2763_v32 = vpop.f32.mrf.mxu1 }
 0x2b7   : > { %9188 = vst [vmem:[#allocation25_spill] sm:$0xff] %v8146_v43  ;;  %v8148_v54 = vpop.f32.mrf.mxu0  ;;  %v2830_v5 = vadd.f32 %v2763_v32, %v7960_v34  ;;  %v8152_v57 = vadd.f32 %v7997_v51, %v2832_v29  ;;  %v9191_v51 = vld [vmem:[#allocation21_spill] sm:$0xff] }
 0x2b8   : > { %v5721_v49 = vpop.f32.mrf.mxu1 }
 0x2b9   : > { %v8154_v26 = vpop.f32.mrf.mxu0  ;;  %v2833_v30 = vadd.f32 %v5721_v49, %v7966_v46  ;;  %v8158_v35 = vadd.f32 %v8004_v39, %v2830_v5 }
 0x2ba   : > { %v2766_v21 = vpop.f32.mrf.mxu1 }
 0x2bb   : > { %v8160_v25 = vpop.f32.mrf.mxu0  ;;  %v2831_v59 = vadd.f32 %v2766_v21, %v9190_v4  ;;  %v8164_v43 = vadd.f32 %v8010_v3, %v2833_v30  ;;  %v9193_v3 = vld [vmem:[#allocation23_spill] sm:$0xff] }
 0x2bc   : > { %9189 = vst [vmem:[#allocation27_spill] sm:$0xff] %v8160_v25  ;;  %v5724_v34 = vpop.f32.mrf.mxu1 }
 0x2bd   : > { %v8166_v32 = vpop.f32.mrf.mxu0  ;;  %v2836_v29 = vadd.f32 %v5724_v34, %v9191_v51  ;;  %v8170_v47 = vadd.f32 %v8016_v44, %v2831_v59  ;;  %v9195_v44 = vld [vmem:[#allocation26_spill] sm:$0xff] }
 0x2be   : > { %v2779_v46 = vpop.f32.mrf.mxu1 }
 0x2bf   : > { %9192 = vst [vmem:[#allocation15_spill] sm:$0xff] %v8170_v47  ;;  %v8172_v49 = vpop.f32.mrf.mxu0  ;;  %v2834_v39 = vadd.f32 %v2779_v46, %v7989_v36  ;;  %v8176_v5 = vadd.f32 %v8022_v1, %v2836_v29  ;;  %v9196_v1 = vld [vmem:[#allocation16_spill] sm:$0xff] }
 0x2c0   : > { %v5725_v21 = vpop.f32.mrf.mxu1 }
 0x2c1   : > { %v8178_v4 = vpop.f32.mrf.mxu0  ;;  %v2837_v30 = vadd.f32 %v5725_v21, %v9193_v3  ;;  %v8182_v25 = vadd.f32 %v8028_v41, %v2834_v39 }
 0x2c2   : > { %v2782_v34 = vpop.f32.mrf.mxu1 }
 0x2c3   : > { %v8184_v51 = vpop.f32.mrf.mxu0  ;;  %v2835_v59 = vadd.f32 %v2782_v34, %v9195_v44  ;;  %v8188_v47 = vadd.f32 %v8034_v10, %v2837_v30 }
 0x2c4   : > { %9194 = vst [vmem:[#allocation28_spill] sm:$0xff] %v8184_v51  ;;  %v5728_v36 = vpop.f32.mrf.mxu1 }
 0x2c5   : > { %v8190_v46 = vpop.f32.mrf.mxu0  ;;  %v2840_v29 = vadd.f32 %v5728_v36, %v9196_v1  ;;  %v8194_v22 = vadd.f32 %v8040_v58, %v2835_v59 }
 0x2c6   : > { %v2795_v21 = vpop.f32.mrf.mxu1 }
 0x2c7   : > { %9197 = vst [vmem:[#allocation17_spill] sm:$0xff] %v8194_v22  ;;  %v8196_v3 = vpop.f32.mrf.mxu0  ;;  %v2838_v41 = vadd.f32 %v2795_v21, %v8014_v20  ;;  %v8200_v39 = vadd.f32 %v8046_v60, %v2840_v29 }
 0x2c8   : > { %v5729_v34 = vpop.f32.mrf.mxu1 }
 0x2c9   : > { %v8202_v44 = vpop.f32.mrf.mxu0  ;;  %v2841_v10 = vadd.f32 %v5729_v34, %v8020_v2  ;;  %v8206_v30 = vadd.f32 %v8052_v19, %v2838_v41 }
 0x2ca   : > { %v2798_v36 = vpop.f32.mrf.mxu1 }
 0x2cb   : > { %v8208_v1 = vpop.f32.mrf.mxu0  ;;  %v2839_v58 = vadd.f32 %v2798_v36, %v8026_v0  ;;  %v8212_v59 = vadd.f32 %v8058_v63, %v2841_v10 }
 0x2cc   : > { %9198 = vst [vmem:[#allocation18_spill] sm:$0xff] %v8208_v1  ;;  %v5772_v20 = vpop.f32.mrf.mxu1 }
 0x2cd   : > { %v8214_v21 = vpop.f32.mrf.mxu0  ;;  %v3440_v60 = vadd.f32 %v5772_v20, %v8032_v7  ;;  %v8218_v29 = vadd.f32 %v8064_v38, %v2839_v58 }
 0x2ce   : > { %v3311_v2 = vpop.f32.mrf.mxu1 }
 0x2cf   : > { %9199 = vst [vmem:[#allocation19_spill] sm:$0xff] %v8218_v29  ;;  %v8220_v34 = vpop.f32.mrf.mxu0  ;;  %v3438_v19 = vadd.f32 %v3311_v2, %v8038_v56  ;;  %v8224_v41 = vadd.f32 %v8070_v62, %v3440_v60 }
 0x2d0   : > { %v8226_v0 = vpop.f32.mrf.mxu1 }
 0x2d1   : > { %v8228_v63 = vpop.f32.mrf.mxu0  ;;  %v8231_v10 = vadd.f32 %v8076_v45, %v3438_v19 }
 0x2d2   : > { %v8233_v36 = vpop.f32.mrf.mxu1 }
 0x2d3   : > { %v8235_v7 = vpop.f32.mrf.mxu0 }
 0x2d4   : > { %9200 = vst [vmem:[#allocation20_spill] sm:$0xff] %v8235_v7  ;;  %v5776_v38 = vpop.f32.mrf.mxu1 }
 0x2d5   : > { %v8237_v58 = vpop.f32.mrf.mxu0  ;;  %v3444_v20 = vadd.f32 %v5776_v38, %v8056_v61 }
 0x2d6   : > { %v3327_v56 = vpop.f32.mrf.mxu1 }
 0x2d7   : > { %v8240_v2 = vpop.f32.mrf.mxu0  ;;  %v3442_v62 = vadd.f32 %v3327_v56, %v8062_v28  ;;  %v8244_v60 = vadd.f32 %v8094_v48, %v3444_v20 }
 0x2d8   : > { %v5777_v29 = vpop.f32.mrf.mxu1 }
 0x2d9   : > { %v8246_v45 = vpop.f32.mrf.mxu0  ;;  %v3445_v19 = vadd.f32 %v5777_v29, %v8068_v27  ;;  %v8250_v7 = vadd.f32 %v8100_v33, %v3442_v62 }
 0x2da   : > { %v8252_v22 = vpop.f32.mrf.mxu1 }
 0x2db   : > { %v8254_v1 = vpop.f32.mrf.mxu0  ;;  %v8257_v61 = vadd.f32 %v8106_v8, %v3445_v19 }
 0x2dc   : > { %9201 = vst [vmem:[#allocation21_spill] sm:$0xff] %v8254_v1  ;;  %v5780_v38 = vpop.f32.mrf.mxu1 }
 0x2dd   : > { %v8259_v28 = vpop.f32.mrf.mxu0  ;;  %v3448_v48 = vadd.f32 %v5780_v38, %v8080_v17 }
 0x2de   : > { %v3343_v20 = vpop.f32.mrf.mxu1 }
 0x2df   : > { %v8262_v56 = vpop.f32.mrf.mxu0  ;;  %v3446_v27 = vadd.f32 %v3343_v20, %v8086_v50  ;;  %v8266_v33 = vadd.f32 %v8118_v6, %v3448_v48 }
 0x2e0   : > { %v5781_v29 = vpop.f32.mrf.mxu1 }
 0x2e1   : > { %v8268_v62 = vpop.f32.mrf.mxu0  ;;  %v3449_v1 = vadd.f32 %v5781_v29, %v8092_v42  ;;  %v8272_v8 = vadd.f32 %v8124_v24, %v3446_v27 }
 0x2e2   : > { %v8274_v19 = vpop.f32.mrf.mxu1 }
 0x2e3   : > { %v8276_v51 = vpop.f32.mrf.mxu0  ;;  %v8279_v17 = vadd.f32 %v8130_v16, %v3449_v1 }
 0x2e4   : > { %v5784_v38 = vpop.f32.mrf.mxu1 }
 0x2e5   : > { %9202 = vst [vmem:[#allocation23_spill] sm:$0xff] %v8279_v17  ;;  %v8281_v50 = vpop.f32.mrf.mxu0  ;;  %v3452_v6 = vadd.f32 %v5784_v38, %v8104_v9 }
 0x2e6   : > { %v3359_v48 = vpop.f32.mrf.mxu1 }
 0x2e7   : > { %v3450_v20 = vadd.f32 %v3359_v48, %v8110_v11  ;;  %v8285_v52 = vpop.f32.mrf.mxu0  ;;  %v8288_v42 = vadd.f32 %v8142_v37, %v3452_v6 }
 0x2e8   : > { %v5785_v24 = vpop.f32.mrf.mxu1 }
 0x2e9   : > { %v3453_v27 = vadd.f32 %v5785_v24, %v8116_v15  ;;  %v8292_v29 = vadd.f32 %v8148_v54, %v3450_v20  ;;  %v8296_v1 = vpop.f32.mrf.mxu0 }
 0x2ea   : > { %v8294_v16 = vpop.f32.mrf.mxu1 }
 0x2eb   : > { %v8299_v9 = vadd.f32 %v8154_v26, %v3453_v27  ;;  %v8302_v17 = vpop.f32.mrf.mxu0 }
 0x2ec   : > { %v5788_v38 = vpop.f32.mrf.mxu1 }
 0x2ed   : > { %v3456_v11 = vadd.f32 %v5788_v38, %v8128_v14  ;;  %v8314_v26 = vpop.f32.mrf.mxu0 }
 0x2ee   : > { %v3375_v48 = vpop.f32.mrf.mxu1 }
 0x2ef   : > { %v3454_v37 = vadd.f32 %v3375_v48, %v8134_v23  ;;  %v8306_v15 = vadd.f32 %v8166_v32, %v3456_v11  ;;  %v8320_v48 = vpop.f32.mrf.mxu0 }
 0x2f0   : > { %v5789_v54 = vpop.f32.mrf.mxu1 }
 0x2f1   : > { %v3457_v6 = vadd.f32 %v5789_v54, %v8140_v12  ;;  %v8310_v20 = vadd.f32 %v8172_v49, %v3454_v37 }
 0x2f2   : > { %v8312_v24 = vpop.f32.mrf.mxu1 }
 0x2f3   : > { %v8317_v14 = vadd.f32 %v8178_v4, %v3457_v6  ;;  %v8332_v4 = vpop.f32.mrf.mxu0 }
 0x2f4   : > { %v5792_v27 = vpop.f32.mrf.mxu1 }
 0x2f5   : > { %v3460_v38 = vadd.f32 %v5792_v27, %v8152_v57 }
 0x2f6   : > { %v3391_v23 = vpop.f32.mrf.mxu1 }
 0x2f7   : > { %v3458_v32 = vadd.f32 %v3391_v23, %v8158_v35  ;;  %v8324_v12 = vadd.f32 %v8190_v46, %v3460_v38  ;;  %v8338_v23 = vpop.f32.mrf.mxu0 }
 0x2f8   : > { %v5793_v49 = vpop.f32.mrf.mxu1 }
 0x2f9   : > { %v3461_v11 = vadd.f32 %v5793_v49, %v8164_v43  ;;  %v8328_v37 = vadd.f32 %v8196_v3, %v3458_v32 }
 0x2fa   : > { %v8330_v54 = vpop.f32.mrf.mxu1 }
 0x2fb   : > { %v8335_v57 = vadd.f32 %v8202_v44, %v3461_v11  ;;  %v8350_v44 = vpop.f32.mrf.mxu0 }
 0x2fc   : > { %v5796_v6 = vpop.f32.mrf.mxu1 }
 0x2fd   : > { %v3464_v27 = vadd.f32 %v5796_v6, %v8176_v5 }
 0x2fe   : > { %v3407_v35 = vpop.f32.mrf.mxu1 }
 0x2ff   : > { %v3462_v46 = vadd.f32 %v3407_v35, %v8182_v25  ;;  %v8342_v43 = vadd.f32 %v8214_v21, %v3464_v27  ;;  %v8356_v35 = vpop.f32.mrf.mxu0 }
 0x300   : > { %v5797_v3 = vpop.f32.mrf.mxu1 }
 0x301   : > { %v3465_v38 = vadd.f32 %v5797_v3, %v8188_v47  ;;  %v8346_v32 = vadd.f32 %v8220_v34, %v3462_v46 }
 0x302   : > { %v8348_v49 = vpop.f32.mrf.mxu1 }
 0x303   : > { %v8353_v5 = vadd.f32 %v8228_v63, %v3465_v38  ;;  %v3441_v63 = vadd.f32 %v8226_v0, %v8044_v55 }
 0x304   : > { %v5800_v11 = vpop.f32.mrf.mxu1 }
 0x305   : > { %v3468_v6 = vadd.f32 %v5800_v11, %v8200_v39  ;;  %v8370_v39 = vpop.f32.mrf.mxu0 }
 0x306   : > { %v3423_v25 = vpop.f32.mrf.mxu1 }
 0x307   : > { %v3466_v21 = vadd.f32 %v3423_v25, %v8206_v30  ;;  %v8360_v47 = vadd.f32 %v8237_v58, %v3468_v6  ;;  %v3439_v58 = vadd.f32 %v8233_v36, %v8050_v40  ;;  %v8383_v6 = vpop.f32.mrf.mxu0  ;;  %v8392_v40 = vld [vmem:[%s8733_s6] ss:$0 sm:$0xff] }
 0x308   : > { %v5801_v34 = vpop.f32.mrf.mxu1 }
 0x309   : > { %v3469_v27 = vadd.f32 %v5801_v34, %v8212_v59  ;;  %v8364_v46 = vadd.f32 %v8240_v2, %v3466_v21  ;;  %v8381_v59 = vld [vmem:[%s8732_s5] ss:$0 sm:$0xff]  ;;  %v3761_v34 = vadd.f32 %v8088_v18, %v3439_v58 }
 0x30a   : > { %v8366_v3 = vpop.f32.mrf.mxu1 }
 0x30b   : > { %v8373_v38 = vadd.f32 %v8246_v45, %v3469_v27  ;;  %v3763_v45 = vadd.f32 %v8082_v53, %v3441_v63 }
 0x30c   : > { %v5844_v30 = vpop.f32.mrf.mxu1 }
 0x30d   : > { %v4068_v11 = vadd.f32 %v5844_v30, %v8224_v41  ;;  %v8396_v30 = vpop.f32.mrf.mxu0 }
 0x30e   : > { %v3939_v2 = vpop.f32.mrf.mxu1 }
 0x30f   : > { %v4390_v55 = vadd.f32 %v8259_v28, %v4068_v11  ;;  %v4066_v0 = vadd.f32 %v3939_v2, %v8231_v10 }
 0x310   : > { %v5845_v25 = vpop.f32.mrf.mxu1 }
 0x311   : > { %v4429_v21 = vmul.f32 %v8381_v59, %v4390_v55  ;;  %v4388_v41 = vadd.f32 %v8262_v56, %v4066_v0  ;;  %v4069_v36 = vadd.f32 %v5845_v25, %v3763_v45  ;;  %v3443_v56 = vadd.f32 %v8252_v22, %v8074_v31  ;;  %v8407_v45 = vpop.f32.mrf.mxu0 }
 0x312   : > { %v3942_v27 = vpop.f32.mrf.mxu1 }
 0x313   : > { %v4427_v10 = vmul.f32 %v8381_v59, %v4388_v41  ;;  %v4391_v53 = vadd.f32 %v8268_v62, %v4069_v36  ;;  %v4067_v28 = vadd.f32 %v3942_v27, %v3761_v34  ;;  %v4468_v63 = vadd.f32 %v8392_v40, %v4429_v21 }
 0x314   : > { %v5848_v11 = vpop.f32.mrf.mxu1 }
 0x315   : > { %v4430_v2 = vmul.f32 %v8381_v59, %v4391_v53  ;;  %v4389_v55 = vadd.f32 %v8276_v51, %v4067_v28  ;;  %v4466_v18 = vadd.f32 %v8392_v40, %v4427_v10  ;;  %v4072_v58 = vadd.f32 %v5848_v11, %v8244_v60  ;;  %v8418_v11 = vpop.f32.mrf.mxu0 }
 0x316   : > { %v3955_v0 = vpop.f32.mrf.mxu1  ;;  %v4500_v41 = vmax.f32 %v4468_v63, 0.0  ;;  %v3765_v53 = vadd.f32 %v8112_v13, %v3443_v56 }
 0x317   : > { %v4469_v62 = vadd.f32 %v8392_v40, %v4430_v2  ;;  %v4428_v25 = vmul.f32 %v8381_v59, %v4389_v55  ;;  %v4070_v21 = vadd.f32 %v3955_v0, %v8250_v7  ;;  %v4394_v36 = vadd.f32 %v8281_v50, %v4072_v58 }
 0x318   : > { %v5849_v51 = vpop.f32.mrf.mxu1  ;;  %v4498_v27 = vmax.f32 %v4466_v18, 0.0 }
 0x319   : > { %v4501_v34 = vmax.f32 %v4469_v62, 0.0  ;;  %v4467_v31 = vadd.f32 %v8392_v40, %v4428_v25  ;;  %v4392_v22 = vadd.f32 %v8285_v52, %v4070_v21  ;;  %v4073_v60 = vadd.f32 %v5849_v51, %v8257_v61  ;;  %v9203_v62 = vld [vmem:[#allocation29_spill] sm:$0xff]  ;;  %v8428_v21 = vpop.f32.mrf.mxu0 }
 0x31a   : > { %v4433_v10 = vmul.f32 %v8381_v59, %v4394_v36  ;;  %v3958_v28 = vpop.f32.mrf.mxu1  ;;  %v3447_v13 = vadd.f32 %v8274_v19, %v9203_v62 }
 0x31b   : > { %v4531_v7 = vpack.c.bf16 %v4501_v34, %v4500_v41  ;;  %v4499_v63 = vmax.f32 %v4467_v31, 0.0  ;;  %v4431_v50 = vmul.f32 %v8381_v59, %v4392_v22  ;;  %v4395_v2 = vadd.f32 %v8296_v1, %v4073_v60  ;;  %v9206_v60 = vld [vmem:[#allocation23_spill] sm:$0xff] }
 0x31c   : > { %v4472_v55 = vadd.f32 %v8392_v40, %v4433_v10  ;;  %v4071_v58 = vadd.f32 %v3958_v28, %v3765_v53  ;;  %v5852_v52 = vpop.f32.mrf.mxu1  ;;  %v8442_v28 = vpop.f32.mrf.mxu0 }
 0x31d   : > { %v4434_v61 = vmul.f32 %v8381_v59, %v4395_v2  ;;  %v4076_v18 = vadd.f32 %v5852_v52, %v8266_v33  ;;  %v4530_v0 = vpack.c.bf16 %v4499_v63, %v4498_v27  ;;  %v4470_v41 = vadd.f32 %v8392_v40, %v4431_v50 }
 0x31e   : > { %v4393_v56 = vadd.f32 %v8302_v17, %v4071_v58  ;;  %v3971_v25 = vpop.f32.mrf.mxu1  ;;  %v4504_v33 = vmax.f32 %v4472_v55, 0.0 }
 0x31f   : > { %v4473_v1 = vadd.f32 %v8392_v40, %v4434_v61  ;;  %v4398_v36 = vadd.f32 %v8314_v26, %v4076_v18  ;;  %v4074_v51 = vadd.f32 %v3971_v25, %v8272_v8  ;;  %5914 = vmatprep.mubr.msk.bf16.mxu1 %vm9204_vm3, %v4530_v0  ;;  %v9207_v26 = vld [vmem:[#allocation24_spill] sm:$0xff]  ;;  %v4502_v63 = vmax.f32 %v4470_v41, 0.0  ;;  %v9208_v0 = vld [vmem:[#allocation22_spill] sm:$0xff]  ;;  %v8452_v41 = vpop.f32.mrf.mxu0 }
 0x320   : > { %v4432_v34 = vmul.f32 %v8381_v59, %v4393_v56  ;;  %v5853_v31 = vpop.f32.mrf.mxu1  ;;  %5915 = vmatmul.mubr.msk.bf16.vlgmr.msra.gmra.mxu1 %vm9205_vm10, %v4531_v7  ;;  %v3769_v53 = vadd.f32 %v9207_v26, %v3447_v13  ;;  %v3451_v62 = vadd.f32 %v8294_v16, %v9208_v0 }
 0x321   : > { %v4505_v19 = vmax.f32 %v4473_v1, 0.0  ;;  %v4437_v17 = vmul.f32 %v8381_v59, %v4398_v36  ;;  %v4396_v22 = vadd.f32 %v8320_v48, %v4074_v51  ;;  %v4077_v27 = vadd.f32 %v5853_v31, %v9206_v60  ;;  %v8466_v60 = vpop.f32.mrf.mxu0 }
 0x322   : > { %v4471_v10 = vadd.f32 %v8392_v40, %v4432_v34  ;;  %v3974_v8 = vpop.f32.mrf.mxu1 }
 0x323   : > { %v4533_v50 = vpack.c.bf16 %v4505_v19, %v4504_v33  ;;  %v4399_v2 = vadd.f32 %v8332_v4, %v4077_v27  ;;  %v4476_v7 = vadd.f32 %v8392_v40, %v4437_v17  ;;  %v4435_v58 = vmul.f32 %v8381_v59, %v4396_v22 }
 0x324   : > { %v4503_v55 = vmax.f32 %v4471_v10, 0.0  ;;  %v4075_v52 = vadd.f32 %v3974_v8, %v3769_v53  ;;  %v5856_v48 = vpop.f32.mrf.mxu1 }
 0x325   : > { %v4438_v61 = vmul.f32 %v8381_v59, %v4399_v2  ;;  %v4080_v18 = vadd.f32 %v5856_v48, %v8288_v42  ;;  %v4508_v51 = vmax.f32 %v4476_v7, 0.0  ;;  %v4474_v33 = vadd.f32 %v8392_v40, %v4435_v58 }
 0x326   : > { %v4397_v13 = vadd.f32 %v8338_v23, %v4075_v52  ;;  %v3987_v56 = vpop.f32.mrf.mxu1  ;;  %v4532_v25 = vpack.c.bf16 %v4503_v55, %v4502_v63  ;;  %v9212_v55 = vld [vmem:[#allocation25_spill] sm:$0xff] }
 0x327   : > { %v4477_v4 = vadd.f32 %v8392_v40, %v4438_v61  ;;  %v4402_v1 = vadd.f32 %v8350_v44, %v4080_v18  ;;  %v4078_v36 = vadd.f32 %v3987_v56, %v8292_v29  ;;  %v9211_v29 = vld [vmem:[#allocation27_spill] sm:$0xff]  ;;  %v4506_v53 = vmax.f32 %v4474_v33, 0.0  ;;  %v4344_v61 = vpop.f32.mrf.mxu0 }
 0x328   : > { %v4436_v42 = vmul.f32 %v8381_v59, %v4397_v13  ;;  %5918 = vmatprep.mubr.msk.bf16.mxu1 %vm9209_vm4, %v4532_v25  ;;  %v5857_v16 = vpop.f32.mrf.mxu1  ;;  %v3773_v17 = vadd.f32 %v9211_v29, %v3451_v62  ;;  %v3455_v7 = vadd.f32 %v8312_v24, %v9212_v55  ;;  %v9216_v29 = vld [vmem:[#allocation15_spill] sm:$0xff] }
 0x329   : > { %v4509_v34 = vmax.f32 %v4477_v4, 0.0  ;;  %v4441_v23 = vmul.f32 %v8381_v59, %v4402_v1  ;;  %v4400_v31 = vadd.f32 %v8356_v35, %v4078_v36  ;;  %v4081_v19 = vadd.f32 %v5857_v16, %v8299_v9  ;;  %5919 = vmatmul.mubr.msk.bf16.gmra.mxu1 %vm9210_vm15, %v4533_v50 }
 0x32a   : > { %v4475_v44 = vadd.f32 %v8392_v40, %v4436_v42  ;;  %v3990_v22 = vpop.f32.mrf.mxu1 }
 0x32b   : > { %v4535_v27 = vpack.c.bf16 %v4509_v34, %v4508_v51  ;;  %v4439_v10 = vmul.f32 %v8381_v59, %v4400_v31  ;;  %v4403_v26 = vadd.f32 %v8370_v39, %v4081_v19  ;;  %v4480_v35 = vadd.f32 %v8392_v40, %v4441_v23  ;;  %v5904_v51 = vpop.f32.mrf.mxu0 }
 0x32c   : > { %v4507_v8 = vmax.f32 %v4475_v44, 0.0  ;;  %v4079_v63 = vadd.f32 %v3990_v22, %v3773_v17  ;;  %v5860_v9 = vpop.f32.mrf.mxu1  ;;  %v3459_v17 = vadd.f32 %v8330_v54, %v9216_v29 }
 0x32d   : > { %v4442_v50 = vmul.f32 %v8381_v59, %v4403_v26  ;;  %v4084_v2 = vadd.f32 %v5860_v9, %v8306_v15  ;;  %v4478_v39 = vadd.f32 %v8392_v40, %v4439_v10  ;;  %v4512_v13 = vmax.f32 %v4480_v35, 0.0  ;;  %v4357_v26 = vpop.f32.mrf.mxu0 }
 0x32e   : > { %v4401_v58 = vadd.f32 %v8383_v6, %v4079_v63  ;;  %v4003_v52 = vpop.f32.mrf.mxu1  ;;  %v4534_v48 = vpack.c.bf16 %v4507_v8, %v4506_v53 }
 0x32f   : > { %v4481_v18 = vadd.f32 %v8392_v40, %v4442_v50  ;;  %v4406_v0 = vadd.f32 %v8396_v30, %v4084_v2  ;;  %v4082_v62 = vadd.f32 %v4003_v52, %v8310_v20  ;;  %v9215_v30 = vld [vmem:[#allocation28_spill] sm:$0xff]  ;;  %v4510_v33 = vmax.f32 %v4478_v39, 0.0 }
 0x330   : > { %v4440_v56 = vmul.f32 %v8381_v59, %v4401_v58  ;;  %5922 = vmatprep.mubr.msk.bf16.mxu1 %vm9213_vm8, %v4534_v48  ;;  %v5861_v15 = vpop.f32.mrf.mxu1  ;;  %v3777_v36 = vadd.f32 %v9215_v30, %v3455_v7  ;;  %v5905_v58 = vpop.f32.mrf.mxu0 }
 0x331   : > { %v4513_v24 = vmax.f32 %v4481_v18, 0.0  ;;  %v4445_v6 = vmul.f32 %v8381_v59, %v4406_v0  ;;  %v4404_v25 = vadd.f32 %v8407_v45, %v4082_v62  ;;  %v4085_v4 = vadd.f32 %v5861_v15, %v8317_v14  ;;  %5923 = vmatmul.mubr.msk.bf16.gmra.mxu1 %vm9214_vm1, %v4535_v27  ;;  %v9219_v15 = vld [vmem:[#allocation17_spill] sm:$0xff] }
 0x332   : > { %v4479_v1 = vadd.f32 %v8392_v40, %v4440_v56  ;;  %v4006_v20 = vpop.f32.mrf.mxu1 }
 0x333   : > { %v4537_v42 = vpack.c.bf16 %v4513_v24, %v4512_v13  ;;  %v4407_v16 = vadd.f32 %v8418_v11, %v4085_v4  ;;  %v4484_v23 = vadd.f32 %v8392_v40, %v4445_v6  ;;  %v4443_v31 = vmul.f32 %v8381_v59, %v4404_v25 }
 0x334   : > { %v4511_v34 = vmax.f32 %v4479_v1, 0.0  ;;  %v4083_v45 = vadd.f32 %v4006_v20, %v3777_v36  ;;  %v5864_v19 = vpop.f32.mrf.mxu1  ;;  %v3463_v24 = vadd.f32 %v8348_v49, %v9219_v15  ;;  %v4360_v1 = vpop.f32.mrf.mxu0 }
 0x335   : > { %v4446_v14 = vmul.f32 %v8381_v59, %v4407_v16  ;;  %v4088_v44 = vadd.f32 %v5864_v19, %v8324_v12  ;;  %v4516_v35 = vmax.f32 %v4484_v23, 0.0  ;;  %v4482_v63 = vadd.f32 %v8392_v40, %v4443_v31 }
 0x336   : > { %v4405_v22 = vadd.f32 %v8428_v21, %v4083_v45  ;;  %v4019_v27 = vpop.f32.mrf.mxu1  ;;  %v4536_v10 = vpack.c.bf16 %v4511_v34, %v4510_v33  ;;  %v5908_v23 = vpop.f32.mrf.mxu0 }
 0x337   : > { %v4485_v11 = vadd.f32 %v8392_v40, %v4446_v14  ;;  %v4410_v53 = vadd.f32 %v8442_v28, %v4088_v44  ;;  %v4086_v8 = vadd.f32 %v4019_v27, %v8328_v37  ;;  %v9218_v37 = vld [vmem:[#allocation18_spill] sm:$0xff]  ;;  %v4514_v18 = vmax.f32 %v4482_v63, 0.0 }
 0x338   : > { %v4444_v9 = vmul.f32 %v8381_v59, %v4405_v22  ;;  %5926 = vmatprep.mubr.msk.bf16.mxu1 %vm9159_vm0, %v4536_v10  ;;  %v5865_v12 = vpop.f32.mrf.mxu1  ;;  %v3781_v55 = vadd.f32 %v9218_v37, %v3459_v17 }
 0x339   : > { %v4517_v54 = vmax.f32 %v4485_v11, 0.0  ;;  %v4449_v21 = vmul.f32 %v8381_v59, %v4410_v53  ;;  %v4408_v50 = vadd.f32 %v8452_v41, %v4086_v8  ;;  %v4089_v2 = vadd.f32 %v5865_v12, %v8335_v57  ;;  %5927 = vmatmul.mubr.msk.bf16.gmra.mxu1 %vm9217_vm5, %v4537_v42  ;;  %v9223_v53 = vld [vmem:[#allocation19_spill] sm:$0xff] }
 0x33a   : > { %v4483_v28 = vadd.f32 %v8392_v40, %v4444_v9  ;;  %v4022_v7 = vpop.f32.mrf.mxu1  ;;  %v3467_v8 = vadd.f32 %v8366_v3, %v9223_v53 }
 0x33b   : > { %v4539_v52 = vpack.c.bf16 %v4517_v54, %v4516_v35  ;;  %v4447_v48 = vmul.f32 %v8381_v59, %v4408_v50  ;;  %v4411_v39 = vadd.f32 %v8466_v60, %v4089_v2  ;;  %v4488_v62 = vadd.f32 %v8392_v40, %v4449_v21 }
 0x33c   : > { %v4515_v0 = vmax.f32 %v4483_v28, 0.0  ;;  %v4087_v41 = vadd.f32 %v4022_v7, %v3781_v55  ;;  %v5868_v13 = vpop.f32.mrf.mxu1 }
 0x33d   : > { %v4450_v57 = vmul.f32 %v8381_v59, %v4411_v39  ;;  %v4092_v56 = vadd.f32 %v5868_v13, %v8342_v43  ;;  %v4486_v30 = vadd.f32 %v8392_v40, %v4447_v48  ;;  %v4520_v33 = vmax.f32 %v4488_v62, 0.0 }
 0x33e   : > { %v4409_v6 = vadd.f32 %v4344_v61, %v4087_v41  ;;  %v4035_v25 = vpop.f32.mrf.mxu1  ;;  %v4538_v4 = vpack.c.bf16 %v4515_v0, %v4514_v18 }
 0x33f   : > { %v4489_v60 = vadd.f32 %v8392_v40, %v4450_v57  ;;  %v4414_v36 = vadd.f32 %v5904_v51, %v4092_v56  ;;  %v4090_v20 = vadd.f32 %v4035_v25, %v8346_v32  ;;  %v9222_v51 = vld [vmem:[#allocation20_spill] sm:$0xff]  ;;  %v4518_v19 = vmax.f32 %v4486_v30, 0.0 }
 0x340   : > { %v4448_v42 = vmul.f32 %v8381_v59, %v4409_v6  ;;  %5930 = vmatprep.mubr.msk.bf16.mxu1 %vm9220_vm12, %v4538_v4  ;;  %v5869_v43 = vpop.f32.mrf.mxu1  ;;  %v3785_v45 = vadd.f32 %v9222_v51, %v3463_v24 }
 0x341   : > { %v4521_v16 = vmax.f32 %v4489_v60, 0.0  ;;  %v4453_v49 = vmul.f32 %v8381_v59, %v4414_v36  ;;  %v4412_v61 = vadd.f32 %v4357_v26, %v4090_v20  ;;  %v4093_v34 = vadd.f32 %v5869_v43, %v8353_v5  ;;  %5931 = vmatmul.mubr.msk.bf16.gmra.mxu1 %vm9221_vm6, %v4539_v52  ;;  %v4373_v26 = vpop.f32.mrf.mxu0 }
 0x342   : > { %v4487_v31 = vadd.f32 %v8392_v40, %v4448_v42  ;;  %v4038_v32 = vpop.f32.mrf.mxu1 }
 0x343   : > { %v4541_v14 = vpack.c.bf16 %v4521_v16, %v4520_v33  ;;  %v4415_v44 = vadd.f32 %v5905_v58, %v4093_v34  ;;  %v4492_v17 = vadd.f32 %v8392_v40, %v4453_v49  ;;  %v4451_v22 = vmul.f32 %v8381_v59, %v4412_v61  ;;  %v5909_v3 = vpop.f32.mrf.mxu0  ;;  %v8560_v49 = vld [vmem:[%s8736_s9] ss:$0 sm:$0xff] }
 0x344   : > { %v4519_v29 = vmax.f32 %v4487_v31, 0.0  ;;  %v4091_v27 = vadd.f32 %v4038_v32, %v3785_v45  ;;  %v5872_v10 = vpop.f32.mrf.mxu1  ;;  %v6075_v31 = vld [vmem:[%s6405_s28] sm:$0xff]  }
 0x345   : > { %v4454_v5 = vmul.f32 %v8381_v59, %v4415_v44  ;;  %v4096_v11 = vadd.f32 %v5872_v10, %v8360_v47  ;;  %v4524_v50 = vmax.f32 %v4492_v17, 0.0  ;;  %v4490_v2 = vadd.f32 %v8392_v40, %v4451_v22  ;;  %v4376_v15 = vpop.f32.mrf.mxu0 }
 0x346   : > { %v4413_v35 = vadd.f32 %v4360_v1, %v4091_v27  ;;  %v4051_v63 = vpop.f32.mrf.mxu1  ;;  %v4540_v9 = vpack.c.bf16 %v4519_v29, %v4518_v19  ;;  %v4849_v51 = vunpack.c.l.bf16 %v6075_v31  ;;  %v4850_v22 = vunpack.c.h.bf16 %v6075_v31 }
 0x347   : > { %v4493_v12 = vadd.f32 %v8392_v40, %v4454_v5  ;;  %v4418_v54 = vadd.f32 %v5908_v23, %v4096_v11  ;;  %v4094_v21 = vadd.f32 %v4051_v63, %v8364_v46  ;;  %v9226_v46 = vld [vmem:[#allocation21_spill] sm:$0xff]  ;;  %v4522_v62 = vmax.f32 %v4490_v2, 0.0 }
 0x348   : > { %v4452_v28 = vmul.f32 %v8381_v59, %v4413_v35  ;;  %5934 = vmatprep.mubr.msk.bf16.mxu1 %vm9224_vm11, %v4540_v9  ;;  %v5873_v37 = vpop.f32.mrf.mxu1  ;;  %v3789_v48 = vadd.f32 %v9226_v46, %v3467_v8  ;;  %v6076_v9 = vld [vmem:[%s6405_s28 + $0x18] sm:$0xff]  }
 0x349   : > { %v4525_v47 = vmax.f32 %v4493_v12, 0.0  ;;  %v4457_v55 = vmul.f32 %v8381_v59, %v4418_v54  ;;  %v4416_v7 = vadd.f32 %v4373_v26, %v4094_v21  ;;  %v4097_v58 = vadd.f32 %v5873_v37, %v8373_v38  ;;  %5935 = vmatmul.mubr.msk.bf16.gmra.mxu1 %vm9225_vm7, %v4541_v14 }
 0x34a   : > { %v4491_v52 = vadd.f32 %v8392_v40, %v4452_v28  ;;  %v4054_v39 = vpop.f32.mrf.mxu1  ;;  %v4855_v12 = vunpack.c.l.bf16 %v6076_v9  ;;  %v6077_v28 = vld [vmem:[%s6405_s28 + $0x10] sm:$0xff]  }
 0x34b   : > { %v4543_v18 = vpack.c.bf16 %v4525_v47, %v4524_v50  ;;  %v4419_v0 = vadd.f32 %v5909_v3, %v4097_v58  ;;  %v4455_v13 = vmul.f32 %v8381_v59, %v4416_v7  ;;  %v4095_v57 = vadd.f32 %v4054_v39, %v3789_v48 }
 0x34c   : > { %v4523_v41 = vmax.f32 %v4491_v52, 0.0  ;;  %v4496_v56 = vadd.f32 %v8392_v40, %v4457_v55  ;;  %v4853_v37 = vunpack.c.l.bf16 %v6077_v28  ;;  %v4856_v58 = vunpack.c.h.bf16 %v6076_v9 }
 0x34d   : > { %v4458_v24 = vmul.f32 %v8381_v59, %v4419_v0  ;;  %v4417_v38 = vadd.f32 %v4376_v15, %v4095_v57  ;;  %v4494_v4 = vadd.f32 %v8392_v40, %v4455_v13  ;;  %v4854_v39 = vunpack.c.h.bf16 %v6077_v28  ;;  %v6078_v57 = vld [vmem:[%s6405_s28 + $0x28] sm:$0xff]  }
 0x34e   : > { %v4542_v6 = vpack.c.bf16 %v4523_v41, %v4522_v62  ;;  %v4528_v30 = vmax.f32 %v4496_v56, 0.0  ;;  %v4859_v56 = vunpack.c.l.bf16 %v6078_v57 }
 0x34f   : > { %v4497_v25 = vadd.f32 %v8392_v40, %v4458_v24  ;;  %v4456_v1 = vmul.f32 %v8381_v59, %v4417_v38  ;;  %v4526_v33 = vmax.f32 %v4494_v4, 0.0  ;;  %v8555_v59 = vld [vmem:[%s8735_s8] ss:$0 sm:$0xff]  ;;  %v6079_v4 = vld [vmem:[%s6405_s28 + $0x20] sm:$0xff]  }
 0x350   : > { %5938 = vmatprep.mubr.msk.bf16.mxu1 %vm9227_vm13, %v4542_v6 }
 0x351   : > { %v4529_v60 = vmax.f32 %v4497_v25, 0.0  ;;  %5939 = vmatmul.mubr.msk.bf16.gmra.mxu1 %vm9228_vm14, %v4543_v18  ;;  %v4495_v36 = vadd.f32 %v8392_v40, %v4456_v1  ;;  %v6074_v40 = vld [vmem:[%s6405_s28 + $0x8] sm:$0xff]   ;;  %v4857_v1 = vunpack.c.l.bf16 %v6079_v4 }
 0x352   : > { %v4851_v61 = vunpack.c.l.bf16 %v6074_v40  ;;  %v4852_v14 = vunpack.c.h.bf16 %v6074_v40 }
 0x353   : > { %v4545_v20 = vpack.c.bf16 %v4529_v60, %v4528_v30  ;;  %v4527_v42 = vmax.f32 %v4495_v36, 0.0 }
 0x355   : > { %v4544_v43 = vpack.c.bf16 %v4527_v42, %v4526_v33  ;;  %v4860_v42 = vunpack.c.h.bf16 %v6078_v57 }
 0x357   : > { %5942 = vmatprep.mubr.msk.bf16.mxu1 %vm9229_vm2, %v4544_v43 }
 0x359   : > { %5943 = vmatmul.mubr.msk.bf16.gmra.mxu1 %vm9230_vm9, %v4545_v20 }
 0x3e0   : > { %v5916_v16 = vpop.f32.mrf.mxu1 }
 0x3e1   : > { %v4780_v34 = vmul.f32 %v5916_v16, %v8555_v59 }
 0x3e2   : > { %v4644_v23 = vpop.f32.mrf.mxu1 }
 0x3e3   : > { %v4819_v45 = vadd.f32 %v8560_v49, %v4780_v34  ;;  %v4778_v32 = vmul.f32 %v8555_v59, %v4644_v23  ;;  %v4858_v23 = vunpack.c.h.bf16 %v6079_v4 }
 0x3e4   : > { %v5917_v19 = vpop.f32.mrf.mxu1 }
 0x3e5   : > { %v4883_v44 = vadd.f32 %v4851_v61, %v4819_v45  ;;  %v4817_v29 = vadd.f32 %v8560_v49, %v4778_v32  ;;  %v4781_v17 = vmul.f32 %v5917_v19, %v8555_v59 }
 0x3e6   : > { %v4647_v27 = vpop.f32.mrf.mxu1 }
 0x3e7   : > { %v4915_v10 = vmax.f32 %v4883_v44, 0.0  ;;  %v4881_v5 = vadd.f32 %v4849_v51, %v4817_v29  ;;  %v4820_v26 = vadd.f32 %v8560_v49, %v4781_v17  ;;  %v4779_v11 = vmul.f32 %v8555_v59, %v4647_v27 }
 0x3e9   : > { %4947 = vst [vmem:[%s8572_s24 + $0x10] sm:$0xff] %v4915_v10  ;;  %v4913_v53 = vmax.f32 %v4881_v5, 0.0  ;;  %v4884_v8 = vadd.f32 %v4852_v14, %v4820_v26  ;;  %v4818_v35 = vadd.f32 %v8560_v49, %v4779_v11  ;;  %v5920_v63 = vpop.f32.mrf.mxu1  ;;  %v6080_v14 = vld [vmem:[%s6405_s28 + $0x38] sm:$0xff]   ;;  %v6081_v5 = vld [vmem:[%s6405_s28 + $0x30] sm:$0xff]  }
 0x3ea   : > { %v4784_v54 = vmul.f32 %v5920_v63, %v8555_v59  ;;  %v4863_v44 = vunpack.c.l.bf16 %v6080_v14  ;;  %v4861_v26 = vunpack.c.l.bf16 %v6081_v5  ;;  %v4864_v9 = vunpack.c.h.bf16 %v6080_v14 }
 0x3eb   : > { %4945 = vst [vmem:[%s8572_s24] sm:$0xff] %v4913_v53  ;;  %v4916_v21 = vmax.f32 %v4884_v8, 0.0  ;;  %v4882_v50 = vadd.f32 %v4850_v22, %v4818_v35  ;;  %v4660_v2 = vpop.f32.mrf.mxu1  ;;  %v4862_v28 = vunpack.c.h.bf16 %v6081_v5 }
 0x3ec   : > { %v4823_v47 = vadd.f32 %v8560_v49, %v4784_v54  ;;  %v4782_v55 = vmul.f32 %v8555_v59, %v4660_v2 }
 0x3ed   : > { %4948 = vst [vmem:[%s8572_s24 + $0x18] sm:$0xff] %v4916_v21  ;;  %v4914_v3 = vmax.f32 %v4882_v50, 0.0  ;;  %v5921_v7 = vpop.f32.mrf.mxu1 }
 0x3ee   : > { %v4887_v52 = vadd.f32 %v4855_v12, %v4823_v47  ;;  %v4821_v46 = vadd.f32 %v8560_v49, %v4782_v55  ;;  %v4785_v48 = vmul.f32 %v5921_v7, %v8555_v59 }
 0x3ef   : > { %4946 = vst [vmem:[%s8572_s24 + $0x8] sm:$0xff] %v4914_v3  ;;  %v4663_v18 = vpop.f32.mrf.mxu1 }
 0x3f0   : > { %v4919_v0 = vmax.f32 %v4887_v52, 0.0  ;;  %v4885_v62 = vadd.f32 %v4853_v37, %v4821_v46  ;;  %v4824_v41 = vadd.f32 %v8560_v49, %v4785_v48  ;;  %v4783_v13 = vmul.f32 %v8555_v59, %v4663_v18 }
 0x3f1   : > { %v5924_v15 = vpop.f32.mrf.mxu1 }
 0x3f2   : > { %4951 = vst [vmem:[%s8572_s24 + $0x30] sm:$0xff] %v4919_v0  ;;  %v4917_v24 = vmax.f32 %v4885_v62, 0.0  ;;  %v4888_v38 = vadd.f32 %v4856_v58, %v4824_v41  ;;  %v4822_v6 = vadd.f32 %v8560_v49, %v4783_v13  ;;  %v4788_v25 = vmul.f32 %v5924_v15, %v8555_v59  ;;  %v6082_v58 = vld [vmem:[%s6405_s28 + $0x48] sm:$0xff]   ;;  %v6083_v62 = vld [vmem:[%s6405_s28 + $0x40] sm:$0xff]  }
 0x3f3   : > { %v4676_v30 = vpop.f32.mrf.mxu1  ;;  %v4867_v52 = vunpack.c.l.bf16 %v6082_v58  ;;  %v4865_v41 = vunpack.c.l.bf16 %v6083_v62 }
 0x3f4   : > { %4949 = vst [vmem:[%s8572_s24 + $0x20] sm:$0xff] %v4917_v24  ;;  %v4920_v60 = vmax.f32 %v4888_v38, 0.0  ;;  %v4886_v36 = vadd.f32 %v4854_v39, %v4822_v6  ;;  %v4827_v20 = vadd.f32 %v8560_v49, %v4788_v25  ;;  %v4786_v33 = vmul.f32 %v8555_v59, %v4676_v30 }
 0x3f5   : > { %v5925_v43 = vpop.f32.mrf.mxu1  ;;  %v4868_v38 = vunpack.c.h.bf16 %v6082_v58 }
 0x3f6   : > { %4952 = vst [vmem:[%s8572_s24 + $0x38] sm:$0xff] %v4920_v60  ;;  %v4918_v16 = vmax.f32 %v4886_v36, 0.0  ;;  %v4891_v40 = vadd.f32 %v4859_v56, %v4827_v20  ;;  %v4825_v61 = vadd.f32 %v8560_v49, %v4786_v33  ;;  %v4789_v34 = vmul.f32 %v5925_v43, %v8555_v59 }
 0x3f7   : > { %v4679_v31 = vpop.f32.mrf.mxu1  ;;  %v4866_v60 = vunpack.c.h.bf16 %v6083_v62 }
 0x3f8   : > { %4950 = vst [vmem:[%s8572_s24 + $0x28] sm:$0xff] %v4918_v16  ;;  %v4923_v51 = vmax.f32 %v4891_v40, 0.0  ;;  %v4889_v45 = vadd.f32 %v4857_v1, %v4825_v61  ;;  %v4828_v32 = vadd.f32 %v8560_v49, %v4789_v34  ;;  %v4787_v19 = vmul.f32 %v8555_v59, %v4679_v31  ;;  %v6084_v16 = vld [vmem:[%s6405_s28 + $0x58] sm:$0xff]  }
 0x3f9   : > { %v5928_v29 = vpop.f32.mrf.mxu1  ;;  %v4871_v40 = vunpack.c.l.bf16 %v6084_v16 }
 0x3fa   : > { %4955 = vst [vmem:[%s8572_s24 + $0x50] sm:$0xff] %v4923_v51  ;;  %v4921_v17 = vmax.f32 %v4889_v45, 0.0  ;;  %v4892_v22 = vadd.f32 %v4860_v42, %v4828_v32  ;;  %v4826_v27 = vadd.f32 %v8560_v49, %v4787_v19  ;;  %v4792_v10 = vmul.f32 %v5928_v29, %v8555_v59  ;;  %v6085_v45 = vld [vmem:[%s6405_s28 + $0x50] sm:$0xff]  }
 0x3fb   : > { %v4692_v11 = vpop.f32.mrf.mxu1  ;;  %v4869_v32 = vunpack.c.l.bf16 %v6085_v45 }
 0x3fc   : > { %4953 = vst [vmem:[%s8572_s24 + $0x40] sm:$0xff] %v4921_v17  ;;  %v4924_v53 = vmax.f32 %v4892_v22, 0.0  ;;  %v4890_v8 = vadd.f32 %v4858_v23, %v4826_v27  ;;  %v4831_v35 = vadd.f32 %v8560_v49, %v4792_v10  ;;  %v4790_v63 = vmul.f32 %v8555_v59, %v4692_v11 }
 0x3fd   : > { %v5929_v12 = vpop.f32.mrf.mxu1  ;;  %v4872_v22 = vunpack.c.h.bf16 %v6084_v16 }
 0x3fe   : > { %4956 = vst [vmem:[%s8572_s24 + $0x58] sm:$0xff] %v4924_v53  ;;  %v4922_v54 = vmax.f32 %v4890_v8, 0.0  ;;  %v4895_v21 = vadd.f32 %v4863_v44, %v4831_v35  ;;  %v4829_v50 = vadd.f32 %v8560_v49, %v4790_v63  ;;  %v4793_v2 = vmul.f32 %v5929_v12, %v8555_v59 }
 0x3ff   : > { %v4695_v37 = vpop.f32.mrf.mxu1  ;;  %v4870_v53 = vunpack.c.h.bf16 %v6085_v45 }
 0x400   : > { %4954 = vst [vmem:[%s8572_s24 + $0x48] sm:$0xff] %v4922_v54  ;;  %v4927_v47 = vmax.f32 %v4895_v21, 0.0  ;;  %v4893_v55 = vadd.f32 %v4861_v26, %v4829_v50  ;;  %v4832_v3 = vadd.f32 %v8560_v49, %v4793_v2  ;;  %v4791_v7 = vmul.f32 %v8555_v59, %v4695_v37  ;;  %v6086_v54 = vld [vmem:[%s6405_s28 + $0x68] sm:$0xff]  }
 0x401   : > { %v5932_v46 = vpop.f32.mrf.mxu1  ;;  %v4875_v21 = vunpack.c.l.bf16 %v6086_v54 }
 0x402   : > { %4959 = vst [vmem:[%s8572_s24 + $0x70] sm:$0xff] %v4927_v47  ;;  %v4925_v48 = vmax.f32 %v4893_v55, 0.0  ;;  %v4896_v39 = vadd.f32 %v4864_v9, %v4832_v3  ;;  %v4830_v18 = vadd.f32 %v8560_v49, %v4791_v7  ;;  %v4796_v0 = vmul.f32 %v5932_v46, %v8555_v59  ;;  %v6087_v55 = vld [vmem:[%s6405_s28 + $0x60] sm:$0xff]  }
 0x403   : > { %v4708_v13 = vpop.f32.mrf.mxu1  ;;  %v4873_v3 = vunpack.c.l.bf16 %v6087_v55 }
 0x404   : > { %4957 = vst [vmem:[%s8572_s24 + $0x60] sm:$0xff] %v4925_v48  ;;  %v4928_v57 = vmax.f32 %v4896_v39, 0.0  ;;  %v4894_v56 = vadd.f32 %v4862_v28, %v4830_v18  ;;  %v4835_v15 = vadd.f32 %v8560_v49, %v4796_v0  ;;  %v4794_v24 = vmul.f32 %v8555_v59, %v4708_v13 }
 0x405   : > { %v5933_v6 = vpop.f32.mrf.mxu1  ;;  %v4876_v39 = vunpack.c.h.bf16 %v6086_v54 }
 0x406   : > { %4960 = vst [vmem:[%s8572_s24 + $0x78] sm:$0xff] %v4928_v57  ;;  %v4926_v25 = vmax.f32 %v4894_v56, 0.0  ;;  %v4899_v4 = vadd.f32 %v4867_v52, %v4835_v15  ;;  %v4833_v1 = vadd.f32 %v8560_v49, %v4794_v24  ;;  %v4797_v30 = vmul.f32 %v5933_v6, %v8555_v59 }
 0x407   : > { %v4711_v36 = vpop.f32.mrf.mxu1  ;;  %v4874_v57 = vunpack.c.h.bf16 %v6087_v55 }
 0x408   : > { %4958 = vst [vmem:[%s8572_s24 + $0x68] sm:$0xff] %v4926_v25  ;;  %v4931_v20 = vmax.f32 %v4899_v4, 0.0  ;;  %v4897_v33 = vadd.f32 %v4865_v41, %v4833_v1  ;;  %v4836_v42 = vadd.f32 %v8560_v49, %v4797_v30  ;;  %v4795_v43 = vmul.f32 %v8555_v59, %v4711_v36  ;;  %v6088_v25 = vld [vmem:[%s6405_s28 + $0x78] sm:$0xff]  }
 0x409   : > { %v5936_v61 = vpop.f32.mrf.mxu1  ;;  %v4879_v4 = vunpack.c.l.bf16 %v6088_v25 }
 0x40a   : > { %4963 = vst [vmem:[%s8572_s24 + $0x90] sm:$0xff] %v4931_v20  ;;  %v4929_v34 = vmax.f32 %v4897_v33, 0.0  ;;  %v4900_v23 = vadd.f32 %v4868_v38, %v4836_v42  ;;  %v4834_v31 = vadd.f32 %v8560_v49, %v4795_v43  ;;  %v4800_v51 = vmul.f32 %v5936_v61, %v8555_v59  ;;  %v6089_v33 = vld [vmem:[%s6405_s28 + $0x70] sm:$0xff]   ;;  %s5333_s28 = sshll.u32 %s6300_s17, 12  ;;  %s6221_s17 = smov [#allocation8]  }
 0x40b   : > { %v4724_v19 = vpop.f32.mrf.mxu1  ;;  %v4877_v42 = vunpack.c.l.bf16 %v6089_v33  ;;  %s8680_s4 = scalar_lea.hbm %s8737_s10, %s5333_s28  ;;  %s6148_s11 = sshll.u32 %s6221_s17, 4  ;;  %s6149_s11 = int_to_ptr.vmem [resolvable:$false] %s6148_s11 }
 0x40c   : > { %4961 = vst [vmem:[%s8572_s24 + $0x80] sm:$0xff] %v4929_v34  ;;  %v4932_v14 = vmax.f32 %v4900_v23, 0.0  ;;  %v4898_v44 = vadd.f32 %v4866_v60, %v4834_v31  ;;  %v4839_v29 = vadd.f32 %v8560_v49, %v4800_v51  ;;  %v4798_v17 = vmul.f32 %v8555_v59, %v4724_v19  ;;  %s6150_s26 = scalar_lea.vmem %s6149_s11, 8192  ;;  %p6151_p10 = scmp.lt.s32.totalorder %s8682_s13, %s6149_s11 }
 0x40d   : > { %v5937_v27 = vpop.f32.mrf.mxu1  ;;  %v4880_v23 = vunpack.c.h.bf16 %v6088_v25  ;;  %p6152_p12 = scmp.lt.s32.totalorder %s6150_s26, %s6144_s21 }
 0x40e   : > { %4964 = vst [vmem:[%s8572_s24 + $0x98] sm:$0xff] %v4932_v14  ;;  %v4930_v10 = vmax.f32 %v4898_v44, 0.0  ;;  %v4903_v5 = vadd.f32 %v4871_v40, %v4839_v29  ;;  %v4837_v26 = vadd.f32 %v8560_v49, %v4798_v17  ;;  %v4801_v11 = vmul.f32 %v5937_v27, %v8555_v59 }
 0x40f   : > { %v4727_v8 = vpop.f32.mrf.mxu1  ;;  %v4878_v14 = vunpack.c.h.bf16 %v6089_v33  ;;  %p6153_p13 = por %p6152_p12, %p6151_p10 }
 0x410   : > { %4962 = vst [vmem:[%s8572_s24 + $0x88] sm:$0xff] %v4930_v10  ;;  %v4935_v35 = vmax.f32 %v4903_v5, 0.0  ;;  %v4901_v63 = vadd.f32 %v4869_v32, %v4837_v26  ;;  %v4840_v9 = vadd.f32 %v8560_v49, %v4801_v11  ;;  %v4799_v12 = vmul.f32 %v8555_v59, %v4727_v8 }
 0x411   : > { %v5940_v50 = vpop.f32.mrf.mxu1  ;;  %p6154_p0 = pnand %p6153_p13, %p6147_p9 }
 0x412   : > { %4967 = vst [vmem:[%s8572_s24 + $0xb0] sm:$0xff] %v4935_v35  ;;  %v4933_v2 = vmax.f32 %v4901_v63, 0.0  ;;  %v4904_v28 = vadd.f32 %v4872_v22, %v4840_v9  ;;  %v4838_v37 = vadd.f32 %v8560_v49, %v4799_v12  ;;  %v4804_v47 = vmul.f32 %v5940_v50, %v8555_v59 }
 0x413   : > { %v4740_v7 = vpop.f32.mrf.mxu1 }
 0x414   : > { %4965 = vst [vmem:[%s8572_s24 + $0xa0] sm:$0xff] %v4933_v2  ;;  %v4936_v58 = vmax.f32 %v4904_v28, 0.0  ;;  %v4902_v52 = vadd.f32 %v4870_v53, %v4838_v37  ;;  %v4843_v46 = vadd.f32 %v8560_v49, %v4804_v47  ;;  %v4802_v48 = vmul.f32 %v8555_v59, %v4740_v7 }
 0x415   : > { %v5941_v18 = vpop.f32.mrf.mxu1 }
 0x416   : > { %4968 = vst [vmem:[%s8572_s24 + $0xb8] sm:$0xff] %v4936_v58  ;;  %v4934_v0 = vmax.f32 %v4902_v52, 0.0  ;;  %v4907_v62 = vadd.f32 %v4875_v21, %v4843_v46  ;;  %v4841_v41 = vadd.f32 %v8560_v49, %v4802_v48  ;;  %v4805_v13 = vmul.f32 %v5941_v18, %v8555_v59 }
 0x417   : > { %v4743_v56 = vpop.f32.mrf.mxu1 }
 0x418   : > { %4966 = vst [vmem:[%s8572_s24 + $0xa8] sm:$0xff] %v4934_v0  ;;  %v4939_v15 = vmax.f32 %v4907_v62, 0.0  ;;  %v4905_v24 = vadd.f32 %v4873_v3, %v4841_v41  ;;  %v4844_v38 = vadd.f32 %v8560_v49, %v4805_v13  ;;  %v4803_v6 = vmul.f32 %v8555_v59, %v4743_v56 }
 0x419   : > { %v5944_v1 = vpop.f32.mrf.mxu1 }
 0x41a   : > { %4971 = vst [vmem:[%s8572_s24 + $0xd0] sm:$0xff] %v4939_v15  ;;  %v4937_v30 = vmax.f32 %v4905_v24, 0.0  ;;  %v4908_v60 = vadd.f32 %v4876_v39, %v4844_v38  ;;  %v4842_v36 = vadd.f32 %v8560_v49, %v4803_v6  ;;  %v4808_v20 = vmul.f32 %v5944_v1, %v8555_v59 }
 0x41b   : > { %v4756_v43 = vpop.f32.mrf.mxu1 }
 0x41c   : > { %4969 = vst [vmem:[%s8572_s24 + $0xc0] sm:$0xff] %v4937_v30  ;;  %v4940_v16 = vmax.f32 %v4908_v60, 0.0  ;;  %v4906_v40 = vadd.f32 %v4874_v57, %v4842_v36  ;;  %v4847_v61 = vadd.f32 %v8560_v49, %v4808_v20  ;;  %v4806_v34 = vmul.f32 %v8555_v59, %v4756_v43 }
 0x41d   : > { %v5945_v31 = vpop.f32.mrf.mxu1 }
 0x41e   : > { %4972 = vst [vmem:[%s8572_s24 + $0xd8] sm:$0xff] %v4940_v16  ;;  %v4938_v51 = vmax.f32 %v4906_v40, 0.0  ;;  %v4911_v45 = vadd.f32 %v4879_v4, %v4847_v61  ;;  %v4845_v32 = vadd.f32 %v8560_v49, %v4806_v34  ;;  %v4809_v19 = vmul.f32 %v5945_v31, %v8555_v59 }
 0x41f   : > { %v4759_v44 = vpop.f32.mrf.mxu1 }
 0x420   : > { %4970 = vst [vmem:[%s8572_s24 + $0xc8] sm:$0xff] %v4938_v51  ;;  %v4943_v29 = vmax.f32 %v4911_v45, 0.0  ;;  %v4909_v17 = vadd.f32 %v4877_v42, %v4845_v32  ;;  %v4848_v22 = vadd.f32 %v8560_v49, %v4809_v19  ;;  %v4807_v27 = vmul.f32 %v8555_v59, %v4759_v44 }
 0x422   : > { %4975 = vst [vmem:[%s8572_s24 + $0xf0] sm:$0xff] %v4943_v29  ;;  %v4941_v10 = vmax.f32 %v4909_v17, 0.0  ;;  %v4912_v5 = vadd.f32 %v4880_v23, %v4848_v22  ;;  %v4846_v26 = vadd.f32 %v8560_v49, %v4807_v27 }
 0x424   : > { %4973 = vst [vmem:[%s8572_s24 + $0xe0] sm:$0xff] %v4941_v10  ;;  %v4944_v11 = vmax.f32 %v4912_v5, 0.0  ;;  %v4910_v53 = vadd.f32 %v4878_v14, %v4846_v26 }
 0x426   : > { %4976 = vst [vmem:[%s8572_s24 + $0xf8] sm:$0xff] %v4944_v11  ;;  %v4942_v59 = vmax.f32 %v4910_v53, 0.0 }
 0x428   : > { %4974 = vst [vmem:[%s8572_s24 + $0xe8] sm:$0xff] %v4942_v59 }
 0x429   : > { %6157 = shalt.err (!%p6154_p0)
}
 0x42a   : > { %s6158_s27 = scalar_lea.hbm %s8680_s4, 4096  ;;  %s6162_s23 = scalar_lea.hbm %s8737_s10, 8192 }
 0x42b   : > { %p6159_p5 = scmp.ne.s32.totalorder %s8680_s4, %s6158_s27  ;;  %p6163_p4 = scmp.lt.s32.totalorder %s8680_s4, %s8737_s10 }
 0x42c   : > { %p6164_p6 = scmp.lt.s32.totalorder %s6162_s23, %s6158_s27 }
 0x42d   : > { %p6160_p2 = pnand %p6159_p5, %p9231_p11 }
 0x42e   : > { %p6165_p8 = por %p6164_p6, %p6163_p4 }
 0x42f   : > { %p6161_p1 = pneg %p6160_p2 }
 0x431   : > { %p6166_p3 = pnand %p6165_p8, %p6161_p1 }
 0x433   : > { %6169 = shalt.err (!%p6166_p3)
}
 0x434   : > { %s6222_s29 = smov 128   ;;  %s6223_s20 = smov 8  }
 0x435   : > { %5956 = dma.vmem_to_hbm [thread:$0]  (%p9231_p11), %s8682_s13, 4096, %s8680_s4, %s4978_s25, %s6222_s29, %s6222_s29, %s6223_s20  }
 0x436 PF: > { %s9232_s21 = sld [smem:[#allocation12_spill]]  ;;  %p9235_p9 = scmp.ge.s32.totalorder %s6212_s16, 2 }
 0x437   : > { %s9233_s17 = sld [smem:[#allocation13_spill]] }
 0x43c   : > { %s5006_s11 = sand.u32 1, %s9232_s21  }
 0x43d   : > { %p9234_p7 = scmp.ne.s32.totalorder %s9233_s17, 0  ;;  %s5007_s26 = scalar_lea.sflag [#allocation5], %s5006_s11 }
 0x43f   : > { %p5967_p10 = pnand %p9235_p9, %p9234_p7 }
 0x441   : > { %p5968_p12 = pneg %p5967_p10 }
 0x443   : > { %6195 = dma.done.wait (%p5968_p12), %s5007_s26, 4096  }
 0x444   : > { %6197 = vsyncadd (%p5968_p12), %s5007_s26, 4294963200  ;;  %s9236_s16 = sld [smem:[#allocation14_spill]]  ;;  %s9237_s13 = smov %s6204_s14 }
 0x445   : > { %s9238_s14 = smov %s6208_s15  ;;  %s9239_s15 = smov %s6353_s18 }
 0x44a   : > { %p24_p13 = scmp.ge.s32.totalorder %s9236_s16, 4  }
 0x44c   :  { %26 = sbr.rel (!%p24_p13) target bundleno = 8 (0x8), region = 117 }
 0x451   :  { %5012 = vsyncpa [#allocation4], 1 }
 0x452   :  { %5014 = vsyncpa [#allocation4 + $0x1], 1 }
 0x453   :  { %5015 = vsyncpa [#allocation7], 1 }
 0x454   :  { %5016 = vsyncpa [#allocation5], 1 }
 0x455   :  { %5018 = vsyncpa [#allocation5 + $0x1], 1 }

</bundles_post_ra>
